<compile_context>
chip_gen: v6e
topology: v6e:2x2x1
jax: 0.10.0
libtpu: 0.0.40
codegen_flags: <defaults>
</compile_context>

<pallas_src>
import jax
import jax.numpy as jnp
import numpy as np
from jax import lax
from jax.experimental import pallas as pl
from jax.experimental.pallas import tpu as pltpu


# ----------------------------------------------------------------------------
# VGG16 feature-prefix construction (mirrors VGGLoss.__init__ layer walk)
# ----------------------------------------------------------------------------
_VGG16_CFG = [64, 64, "M", 128, 128, "M", 256, 256, 256, "M",
              512, 512, 512, "M", 512, 512, 512, "M"]


def vgg16_feature_layers(use_batch_norm):
    layers, in_ch = [], 3
    for v in _VGG16_CFG:
        if v == "M":
            layers.append(("maxpool",))
        else:
            layers.append(("conv", in_ch, v))
            if use_batch_norm:
                layers.append(("batchnorm", v))
            layers.append(("relu",))
            in_ch = v
    return layers


def select_prefix(block_no, layer_within_block, use_batch_norm):
    # exact replica of the PyTorch selection loop in VGGLoss.__init__
    curr_block, curr_layer, selected = 1, 1, []
    for layer in vgg16_feature_layers(use_batch_norm):
        selected.append(layer)
        if curr_block == block_no and curr_layer == layer_within_block:
            break
        if layer[0] == "maxpool":
            curr_block += 1
            curr_layer = 1
        else:
            curr_layer += 1
    return selected


def init_params(layers, key):
    # TODO(synk): plumb in pretrained torchvision VGG16 weights; synthetic init for the demo.
    params = []
    for layer in layers:
        if layer[0] == "conv":
            _, cin, cout = layer
            key, kw, kb = jax.random.split(key, 3)
            w = jax.random.normal(kw, (3, 3, cin, cout), jnp.float32) * 0.05  # HWIO
            b = jax.random.normal(kb, (cout,), jnp.float32) * 0.05
            params.append((w, b))
        else:
            params.append(None)
    return params


def _matmul_operand_dtype(cin):
    # bf16 MXU operands for channel-rich convs (v6e/v7x fast path); tiny Cin=3 conv stays f32.
    return jnp.bfloat16 if cin >= 8 else jnp.float32


# ----------------------------------------------------------------------------
# Static execution plan: layer list -> kernel ops + padded-scratch shapes
# ----------------------------------------------------------------------------
def _build_plan(layers, H, W, C_in):
    """Walk the static layer prefix once; returns (ops, scratch_shapes, out_hwc, n_params)."""
    assert layers and layers[0][0] == "conv", "VGG features always start with a conv"
    ops, scratch_shapes = [], []
    h, w, c = H, W, C_in
    n_params, first_conv, i = 0, True, 0
    while i < len(layers):
        kind = layers[i][0]
        if kind == "conv":
            _, cin, cout = layers[i]
            assert cin == c
            fuse_relu = (i + 1 < len(layers)) and layers[i + 1][0] == "relu"
            if first_conv:
                # First conv consumes wrapper-prepacked (H*W, 9*cin) patches (Cin=3 fix).
                ops.append(("conv_first", h, w, cin, cout, fuse_relu, n_params))
            else:
                sidx = len(scratch_shapes)
                # Persistent padded activation in VMEM scratch (halo lives here, not in values).
                scratch_shapes.append(pltpu.VMEM((h + 2, w + 2, cin), jnp.float32))
                ops.append(("conv", h, w, cin, cout, fuse_relu, n_params, sidx))
            n_params += 2
            first_conv = False
            c = cout
            i += 2 if fuse_relu else 1
        elif kind == "relu":
            ops.append(("relu",))
            i += 1
        elif kind == "maxpool":
            ops.append(("maxpool",))
            h, w = h // 2, w // 2
            i += 1
        else:
            # TODO(synk): BatchNorm2d path (vgg16_bn) not implemented (demo uses plain vgg16).
            raise NotImplementedError(kind)
    return ops, scratch_shapes, (h, w, c), n_params


# ----------------------------------------------------------------------------
# In-kernel building blocks
# ----------------------------------------------------------------------------
def _maxpool2x2(x):
    """MaxPool2d(kernel_size=2, stride=2) on an (h, w, c) value (even h, w)."""
    h, w, c = x.shape
    x = x.reshape(h // 2, 2, w, c)
    x = jnp.maximum(x[:, 0, :, :], x[:, 1, :, :])            # (h/2, w, c)
    x = x.reshape(h // 2, w // 2, 2, c)
    x = jnp.maximum(x[:, :, 0, :], x[:, :, 1, :])            # (h/2, w/2, c)
    return x


def _conv3x3_from_scratch(pad_ref, x, w_ref, b_ref, *, h, w, cin, cout, relu):
    """3x3 conv, stride 1, pad 1: write `x` into the padded scratch interior, zero the
    1-element halo with direct border stores, then accumulate 9 K=cin matmuls whose taps
    are read from the ref at static (dy, dx) offsets.  f32 accumulation throughout."""
    # --- halo: zero the 1-element border with direct stores (per grid step, cheap) ---
    zrow = jnp.zeros((1, w + 2, cin), jnp.float32)
    pad_ref[0:1, :, :] = zrow
    pad_ref[h + 1:h + 2, :, :] = zrow
    zcol = jnp.zeros((h + 2, 1, cin), jnp.float32)
    pad_ref[:, 0:1, :] = zcol
    pad_ref[:, w + 1:w + 2, :] = zcol
    # --- interior: previous activation (pool output is stored here directly, no re-pad) ---
    pad_ref[1:h + 1, 1:w + 1, :] = x
    # --- 9 accumulated K=cin matmuls; cast to MXU operand dtype right before the dot ---
    op_dt = w_ref.dtype
    acc = jnp.zeros((h * w, cout), jnp.float32)
    for t in range(9):
        dy, dx = divmod(t, 3)
        tap = pad_ref[dy:dy + h, dx:dx + w, :]               # (h, w, cin), static offsets
        acc = acc + jnp.dot(tap.reshape(h * w, cin).astype(op_dt), w_ref[t],
                            preferred_element_type=jnp.float32)
    acc = acc + b_ref[...]
    if relu:
        acc = jnp.maximum(acc, 0.0)
    return acc.reshape(h, w, cout)


def _make_fused_kernel(ops, n_params):
    def kernel(*refs):
        x_ref = refs[0]                                      # pre-packed conv1 patches
        param_refs = refs[1:1 + n_params]
        o_ref = refs[1 + n_params]
        scratch_refs = refs[2 + n_params:]

        x = None                                             # current (h, w, c) f32 value
        for op in ops:
            if op[0] == "conv_first":
                _, h, w, cin, cout, relu, pidx = op
                w_ref, b_ref = param_refs[pidx], param_refs[pidx + 1]
                patches = x_ref[0]                           # (h*w, 9*cin) f32
                acc = jnp.dot(patches.astype(w_ref.dtype), w_ref[...],
                              preferred_element_type=jnp.float32)
                acc = acc + b_ref[...]
                if relu:
                    acc = jnp.maximum(acc, 0.0)
                x = acc.reshape(h, w, cout)
            elif op[0] == "conv":
                _, h, w, cin, cout, relu, pidx, sidx = op
                x = _conv3x3_from_scratch(scratch_refs[sidx], x,
                                          param_refs[pidx], param_refs[pidx + 1],
                                          h=h, w=w, cin=cin, cout=cout, relu=relu)
            elif op[0] == "relu":
                x = jnp.maximum(x, 0.0)
            elif op[0] == "maxpool":
                x = _maxpool2x2(x)                           # stored into next conv's scratch
        o_ref[...] = x[None, ...].astype(o_ref.dtype)        # lane-dense (last dim = Cout)
    return kernel


# ----------------------------------------------------------------------------
# Wrapper: single fused pallas_call, NCHW in / NCHW out
# ----------------------------------------------------------------------------
def _im2col_first_conv(x_nhwc):
    """Pre-pack the Cin=3 first conv's K in the wrapper: (N, H, W, 3) -> (N, H*W, 27).
    Cheap XLA pass; fixes the 3->128 lane padding / DMA inflation of a last-dim-3 block."""
    N, H, W, C = x_nhwc.shape
    xp = jnp.pad(x_nhwc, ((0, 0), (1, 1), (1, 1), (0, 0)))
    cols = [xp[:, dy:dy + H, dx:dx + W, :] for dy in range(3) for dx in range(3)]
    return jnp.concatenate(cols, axis=-1).reshape(N, H * W, 9 * C)


def _pick_vmem_limit():
    # Per-generation VMEM budget: ~3/4 of physical (leaves double-buffer headroom on v7x,
    # opens up larger tiles on v5e/v6e), capped; safe fallback if the query is unavailable.
    try:
        cap = int(pltpu.get_tpu_info().vmem_capacity_bytes)
        return min(cap * 3 // 4, 96 * 1024 * 1024)
    except Exception:
        return 32 * 1024 * 1024


def vgg_loss_forward(img_nchw, layers, params):
    N, C, H, W = img_nchw.shape
    x = jnp.transpose(img_nchw, (0, 2, 3, 1)).astype(jnp.float32)    # NCHW -> NHWC

    ops, scratch_shapes, (Ho, Wo, Co), n_params = _build_plan(layers, H, W, C)

    cin0 = layers[0][1]
    patches0 = _im2col_first_conv(x)                                 # (N, H*W, 9*cin0)

    flat_inputs = [patches0]
    in_specs = [pl.BlockSpec((1, H * W, 9 * cin0), lambda n: (n, 0, 0))]

    first_conv = True
    for layer, p in zip(layers, params):
        if layer[0] != "conv":
            continue
        _, cin, cout = layer
        w, b = p
        wdtype = _matmul_operand_dtype(cin)
        if first_conv:
            wk = w.reshape(9 * cin, cout).astype(wdtype)             # im2col-ready (27, 64)
            wspec = pl.BlockSpec((9 * cin, cout), lambda n: (0, 0))
            first_conv = False
        else:
            wk = w.reshape(9, cin, cout).astype(wdtype)              # per-tap (9, cin, cout)
            wspec = pl.BlockSpec((9, cin, cout), lambda n: (0, 0, 0))
        bk = b.reshape(1, cout).astype(jnp.float32)
        bspec = pl.BlockSpec((1, cout), lambda n: (0, 0))
        flat_inputs += [wk, bk]
        in_specs += [wspec, bspec]

    kernel = _make_fused_kernel(ops, n_params)

    out_nhwc = pl.pallas_call(
        kernel,
        out_shape=jax.ShapeDtypeStruct((N, Ho, Wo, Co), jnp.float32),
        grid=(N,),
        in_specs=in_specs,
        out_specs=pl.BlockSpec((1, Ho, Wo, Co), lambda n: (n, 0, 0, 0)),
        scratch_shapes=scratch_shapes,
        compiler_params=pltpu.CompilerParams(
            dimension_semantics=("parallel",),           # N=2 -> both v7x TCs get work
            vmem_limit_bytes=_pick_vmem_limit(),
        ),
    )(*flat_inputs)

    return jnp.transpose(out_nhwc, (0, 3, 1, 2))                     # NHWC -> NCHW


# ----------------------------------------------------------------------------
# Pure-JAX reference (same MXU operand precision policy as the kernel)
# ----------------------------------------------------------------------------
def vgg_loss_reference(img_nchw, layers, params):
    x = jnp.transpose(img_nchw, (0, 2, 3, 1)).astype(jnp.float32)
    for layer, p in zip(layers, params):
        if layer[0] == "conv":
            _, cin, _ = layer
            w, b = p
            opd = _matmul_operand_dtype(cin)
            x = lax.conv_general_dilated(
                x.astype(opd), w.astype(opd),
                window_strides=(1, 1), padding=((1, 1), (1, 1)),
                dimension_numbers=("NHWC", "HWIO", "NHWC"),
                preferred_element_type=jnp.float32) + b
        elif layer[0] == "relu":
            x = jnp.maximum(x, 0.0)
        elif layer[0] == "maxpool":
            n, h, w, c = x.shape
            x = x.reshape(n, h // 2, 2, w // 2, 2, c).max(axis=(2, 4))
    return jnp.transpose(x, (0, 3, 1, 2))


# ----------------------------------------------------------------------------
if __name__ == "__main__":
    BLOCK_NO = 2
    LAYER_WITHIN_BLOCK = 2
    USE_BATCH_NORM_VGG = False

    layers = select_prefix(BLOCK_NO, LAYER_WITHIN_BLOCK, USE_BATCH_NORM_VGG)

    kparam, kimg = jax.random.split(jax.random.PRNGKey(0))
    params = init_params(layers, kparam)

    # Small input consistent with the module: NCHW image, 3 channels, even H/W.
    img = jax.random.normal(kimg, (2, 3, 16, 16), jnp.float32)

    out = jax.block_until_ready(vgg_loss_forward(img, layers, params))
    ref = jax.block_until_ready(vgg_loss_reference(img, layers, params))

    assert out.shape == ref.shape == (2, 128, 8, 8), (out.shape, ref.shape)
    np.testing.assert_allclose(np.asarray(out), np.asarray(ref), rtol=1e-2, atol=1e-2)
    print("KERNEL_OK")
</pallas_src>

<mosaic_0001>
module attributes {stable_mosaic.version = 11 : i64} {
  func.func @kernel(%arg0: i32, %arg1: memref<1x256x27xf32, #tpu.memory_space<vmem>>, %arg2: memref<27x64xf32, #tpu.memory_space<vmem>>, %arg3: memref<1x64xf32, #tpu.memory_space<vmem>>, %arg4: memref<9x64x64xbf16, #tpu.memory_space<vmem>>, %arg5: memref<1x64xf32, #tpu.memory_space<vmem>>, %arg6: memref<9x64x128xbf16, #tpu.memory_space<vmem>>, %arg7: memref<1x128xf32, #tpu.memory_space<vmem>>, %arg8: memref<1x8x8x128xf32, #tpu.memory_space<vmem>>, %arg9: memref<18x18x64xf32, #tpu.memory_space<vmem>>, %arg10: memref<10x10x64xf32, #tpu.memory_space<vmem>>) attributes {dimension_semantics = [#tpu.dimension_semantics<parallel>], iteration_bounds = array<i64: 2>, scalar_prefetch = 0 : i64, scratch_operands = 2 : i64, tpu.core_type = #tpu.core_type<tc>, window_params = [{transform_indices = @transform_0, window_bounds = array<i64: 1, 256, 27>}, {pipeline_mode = #tpu.pipeline_mode<synchronous>, transform_indices = @transform_1, window_bounds = array<i64: 27, 64>}, {pipeline_mode = #tpu.pipeline_mode<synchronous>, transform_indices = @transform_2, window_bounds = array<i64: 1, 64>}, {pipeline_mode = #tpu.pipeline_mode<synchronous>, transform_indices = @transform_3, window_bounds = array<i64: 9, 64, 64>}, {pipeline_mode = #tpu.pipeline_mode<synchronous>, transform_indices = @transform_4, window_bounds = array<i64: 1, 64>}, {pipeline_mode = #tpu.pipeline_mode<synchronous>, transform_indices = @transform_5, window_bounds = array<i64: 9, 64, 128>}, {pipeline_mode = #tpu.pipeline_mode<synchronous>, transform_indices = @transform_6, window_bounds = array<i64: 1, 128>}, {transform_indices = @transform_7, window_bounds = array<i64: 1, 8, 8, 128>}]} {
    %c0 = arith.constant 0 : index
    %c0_0 = arith.constant 0 : index
    %c0_1 = arith.constant 0 : index
    %0 = vector.load %arg1[%c0, %c0_0, %c0_1] : memref<1x256x27xf32, #tpu.memory_space<vmem>>, vector<1x256x27xf32>
    %1 = vector.shape_cast %0 : vector<1x256x27xf32> to vector<256x27xf32>
    %c0_2 = arith.constant 0 : index
    %c0_3 = arith.constant 0 : index
    %2 = vector.load %arg2[%c0_2, %c0_3] : memref<27x64xf32, #tpu.memory_space<vmem>>, vector<27x64xf32>
    %cst = arith.constant dense<0.000000e+00> : vector<256x64xf32>
    %3 = tpu.matmul %1, %2, %cst {dimension_numbers = #tpu.dot_dimension_numbers<[1], [0], [0], [1], [0, 0, 1, 1], [], []>} : vector<256x27xf32>, vector<27x64xf32>, vector<256x64xf32> -> vector<256x64xf32>
    %c0_4 = arith.constant 0 : index
    %c0_5 = arith.constant 0 : index
    %4 = vector.load %arg3[%c0_4, %c0_5] : memref<1x64xf32, #tpu.memory_space<vmem>>, vector<1x64xf32>
    %5 = vector.broadcast %4 : vector<1x64xf32> to vector<256x64xf32>
    %6 = arith.addf %3, %5 : vector<256x64xf32>
    %cst_6 = arith.constant 0.000000e+00 : f32
    %7 = vector.broadcast %cst_6 : f32 to vector<256x64xf32>
    %8 = arith.maximumf %6, %7 : vector<256x64xf32>
    %9 = vector.shape_cast %8 : vector<256x64xf32> to vector<16x16x64xf32>
    %cst_7 = arith.constant 0.000000e+00 : f32
    %10 = vector.broadcast %cst_7 : f32 to vector<1x18x64xf32>
    %c0_8 = arith.constant 0 : index
    %c0_9 = arith.constant 0 : index
    %c0_10 = arith.constant 0 : index
    %11 = vector.load %arg9[%c0_8, %c0_9, %c0_10] : memref<18x18x64xf32, #tpu.memory_space<vmem>>, vector<1x18x64xf32>
    tpu.vector_store %arg9[%c0_8, %c0_9, %c0_10], %10 {strides = array<i32>} : memref<18x18x64xf32, #tpu.memory_space<vmem>>, vector<1x18x64xf32>,
    %c17 = arith.constant 17 : index
    %c0_11 = arith.constant 0 : index
    %c0_12 = arith.constant 0 : index
    %12 = vector.load %arg9[%c17, %c0_11, %c0_12] : memref<18x18x64xf32, #tpu.memory_space<vmem>>, vector<1x18x64xf32>
    tpu.vector_store %arg9[%c17, %c0_11, %c0_12], %10 {strides = array<i32>} : memref<18x18x64xf32, #tpu.memory_space<vmem>>, vector<1x18x64xf32>,
    %cst_13 = arith.constant 0.000000e+00 : f32
    %13 = vector.broadcast %cst_13 : f32 to vector<18x1x64xf32>
    %c0_14 = arith.constant 0 : index
    %c0_15 = arith.constant 0 : index
    %c0_16 = arith.constant 0 : index
    %14 = vector.load %arg9[%c0_14, %c0_15, %c0_16] : memref<18x18x64xf32, #tpu.memory_space<vmem>>, vector<18x1x64xf32>
    tpu.vector_store %arg9[%c0_14, %c0_15, %c0_16], %13 {strides = array<i32>} : memref<18x18x64xf32, #tpu.memory_space<vmem>>, vector<18x1x64xf32>,
    %c0_17 = arith.constant 0 : index
    %c17_18 = arith.constant 17 : index
    %c0_19 = arith.constant 0 : index
    %15 = vector.load %arg9[%c0_17, %c17_18, %c0_19] : memref<18x18x64xf32, #tpu.memory_space<vmem>>, vector<18x1x64xf32>
    tpu.vector_store %arg9[%c0_17, %c17_18, %c0_19], %13 {strides = array<i32>} : memref<18x18x64xf32, #tpu.memory_space<vmem>>, vector<18x1x64xf32>,
    %c1 = arith.constant 1 : index
    %c1_20 = arith.constant 1 : index
    %c0_21 = arith.constant 0 : index
    %16 = vector.load %arg9[%c1, %c1_20, %c0_21] : memref<18x18x64xf32, #tpu.memory_space<vmem>>, vector<16x16x64xf32>
    tpu.vector_store %arg9[%c1, %c1_20, %c0_21], %9 {strides = array<i32>} : memref<18x18x64xf32, #tpu.memory_space<vmem>>, vector<16x16x64xf32>,
    %cst_22 = arith.constant 0.000000e+00 : f32
    %17 = vector.broadcast %cst_22 : f32 to vector<256x64xf32>
    %c0_23 = arith.constant 0 : index
    %c0_24 = arith.constant 0 : index
    %c0_25 = arith.constant 0 : index
    %18 = vector.load %arg9[%c0_23, %c0_24, %c0_25] : memref<18x18x64xf32, #tpu.memory_space<vmem>>, vector<16x16x64xf32>
    %19 = vector.shape_cast %18 : vector<16x16x64xf32> to vector<256x64xf32>
    %20 = arith.truncf %19 : vector<256x64xf32> to vector<256x64xbf16>
    %c0_26 = arith.constant 0 : index
    %c0_27 = arith.constant 0 : index
    %c0_28 = arith.constant 0 : index
    %21 = vector.load %arg4[%c0_26, %c0_27, %c0_28] : memref<9x64x64xbf16, #tpu.memory_space<vmem>>, vector<1x64x64xbf16>
    %22 = vector.shape_cast %21 : vector<1x64x64xbf16> to vector<64x64xbf16>
    %cst_29 = arith.constant dense<0.000000e+00> : vector<256x64xf32>
    %23 = tpu.matmul %20, %22, %cst_29 {dimension_numbers = #tpu.dot_dimension_numbers<[1], [0], [0], [1], [0, 0, 1, 1], [], []>} : vector<256x64xbf16>, vector<64x64xbf16>, vector<256x64xf32> -> vector<256x64xf32>
    %24 = arith.addf %17, %23 : vector<256x64xf32>
    %c0_30 = arith.constant 0 : index
    %c1_31 = arith.constant 1 : index
    %c0_32 = arith.constant 0 : index
    %25 = vector.load %arg9[%c0_30, %c1_31, %c0_32] : memref<18x18x64xf32, #tpu.memory_space<vmem>>, vector<16x16x64xf32>
    %26 = vector.shape_cast %25 : vector<16x16x64xf32> to vector<256x64xf32>
    %27 = arith.truncf %26 : vector<256x64xf32> to vector<256x64xbf16>
    %c1_33 = arith.constant 1 : index
    %c0_34 = arith.constant 0 : index
    %c0_35 = arith.constant 0 : index
    %28 = vector.load %arg4[%c1_33, %c0_34, %c0_35] : memref<9x64x64xbf16, #tpu.memory_space<vmem>>, vector<1x64x64xbf16>
    %29 = vector.shape_cast %28 : vector<1x64x64xbf16> to vector<64x64xbf16>
    %cst_36 = arith.constant dense<0.000000e+00> : vector<256x64xf32>
    %30 = tpu.matmul %27, %29, %cst_36 {dimension_numbers = #tpu.dot_dimension_numbers<[1], [0], [0], [1], [0, 0, 1, 1], [], []>} : vector<256x64xbf16>, vector<64x64xbf16>, vector<256x64xf32> -> vector<256x64xf32>
    %31 = arith.addf %24, %30 : vector<256x64xf32>
    %c0_37 = arith.constant 0 : index
    %c2 = arith.constant 2 : index
    %c0_38 = arith.constant 0 : index
    %32 = vector.load %arg9[%c0_37, %c2, %c0_38] : memref<18x18x64xf32, #tpu.memory_space<vmem>>, vector<16x16x64xf32>
    %33 = vector.shape_cast %32 : vector<16x16x64xf32> to vector<256x64xf32>
    %34 = arith.truncf %33 : vector<256x64xf32> to vector<256x64xbf16>
    %c2_39 = arith.constant 2 : index
    %c0_40 = arith.constant 0 : index
    %c0_41 = arith.constant 0 : index
    %35 = vector.load %arg4[%c2_39, %c0_40, %c0_41] : memref<9x64x64xbf16, #tpu.memory_space<vmem>>, vector<1x64x64xbf16>
    %36 = vector.shape_cast %35 : vector<1x64x64xbf16> to vector<64x64xbf16>
    %cst_42 = arith.constant dense<0.000000e+00> : vector<256x64xf32>
    %37 = tpu.matmul %34, %36, %cst_42 {dimension_numbers = #tpu.dot_dimension_numbers<[1], [0], [0], [1], [0, 0, 1, 1], [], []>} : vector<256x64xbf16>, vector<64x64xbf16>, vector<256x64xf32> -> vector<256x64xf32>
    %38 = arith.addf %31, %37 : vector<256x64xf32>
    %c1_43 = arith.constant 1 : index
    %c0_44 = arith.constant 0 : index
    %c0_45 = arith.constant 0 : index
    %39 = vector.load %arg9[%c1_43, %c0_44, %c0_45] : memref<18x18x64xf32, #tpu.memory_space<vmem>>, vector<16x16x64xf32>
    %40 = vector.shape_cast %39 : vector<16x16x64xf32> to vector<256x64xf32>
    %41 = arith.truncf %40 : vector<256x64xf32> to vector<256x64xbf16>
    %c3 = arith.constant 3 : index
    %c0_46 = arith.constant 0 : index
    %c0_47 = arith.constant 0 : index
    %42 = vector.load %arg4[%c3, %c0_46, %c0_47] : memref<9x64x64xbf16, #tpu.memory_space<vmem>>, vector<1x64x64xbf16>
    %43 = vector.shape_cast %42 : vector<1x64x64xbf16> to vector<64x64xbf16>
    %cst_48 = arith.constant dense<0.000000e+00> : vector<256x64xf32>
    %44 = tpu.matmul %41, %43, %cst_48 {dimension_numbers = #tpu.dot_dimension_numbers<[1], [0], [0], [1], [0, 0, 1, 1], [], []>} : vector<256x64xbf16>, vector<64x64xbf16>, vector<256x64xf32> -> vector<256x64xf32>
    %45 = arith.addf %38, %44 : vector<256x64xf32>
    %c1_49 = arith.constant 1 : index
    %c1_50 = arith.constant 1 : index
    %c0_51 = arith.constant 0 : index
    %46 = vector.load %arg9[%c1_49, %c1_50, %c0_51] : memref<18x18x64xf32, #tpu.memory_space<vmem>>, vector<16x16x64xf32>
    %47 = vector.shape_cast %46 : vector<16x16x64xf32> to vector<256x64xf32>
    %48 = arith.truncf %47 : vector<256x64xf32> to vector<256x64xbf16>
    %c4 = arith.constant 4 : index
    %c0_52 = arith.constant 0 : index
    %c0_53 = arith.constant 0 : index
    %49 = vector.load %arg4[%c4, %c0_52, %c0_53] : memref<9x64x64xbf16, #tpu.memory_space<vmem>>, vector<1x64x64xbf16>
    %50 = vector.shape_cast %49 : vector<1x64x64xbf16> to vector<64x64xbf16>
    %cst_54 = arith.constant dense<0.000000e+00> : vector<256x64xf32>
    %51 = tpu.matmul %48, %50, %cst_54 {dimension_numbers = #tpu.dot_dimension_numbers<[1], [0], [0], [1], [0, 0, 1, 1], [], []>} : vector<256x64xbf16>, vector<64x64xbf16>, vector<256x64xf32> -> vector<256x64xf32>
    %52 = arith.addf %45, %51 : vector<256x64xf32>
    %c1_55 = arith.constant 1 : index
    %c2_56 = arith.constant 2 : index
    %c0_57 = arith.constant 0 : index
    %53 = vector.load %arg9[%c1_55, %c2_56, %c0_57] : memref<18x18x64xf32, #tpu.memory_space<vmem>>, vector<16x16x64xf32>
    %54 = vector.shape_cast %53 : vector<16x16x64xf32> to vector<256x64xf32>
    %55 = arith.truncf %54 : vector<256x64xf32> to vector<256x64xbf16>
    %c5 = arith.constant 5 : index
    %c0_58 = arith.constant 0 : index
    %c0_59 = arith.constant 0 : index
    %56 = vector.load %arg4[%c5, %c0_58, %c0_59] : memref<9x64x64xbf16, #tpu.memory_space<vmem>>, vector<1x64x64xbf16>
    %57 = vector.shape_cast %56 : vector<1x64x64xbf16> to vector<64x64xbf16>
    %cst_60 = arith.constant dense<0.000000e+00> : vector<256x64xf32>
    %58 = tpu.matmul %55, %57, %cst_60 {dimension_numbers = #tpu.dot_dimension_numbers<[1], [0], [0], [1], [0, 0, 1, 1], [], []>} : vector<256x64xbf16>, vector<64x64xbf16>, vector<256x64xf32> -> vector<256x64xf32>
    %59 = arith.addf %52, %58 : vector<256x64xf32>
    %c2_61 = arith.constant 2 : index
    %c0_62 = arith.constant 0 : index
    %c0_63 = arith.constant 0 : index
    %60 = vector.load %arg9[%c2_61, %c0_62, %c0_63] : memref<18x18x64xf32, #tpu.memory_space<vmem>>, vector<16x16x64xf32>
    %61 = vector.shape_cast %60 : vector<16x16x64xf32> to vector<256x64xf32>
    %62 = arith.truncf %61 : vector<256x64xf32> to vector<256x64xbf16>
    %c6 = arith.constant 6 : index
    %c0_64 = arith.constant 0 : index
    %c0_65 = arith.constant 0 : index
    %63 = vector.load %arg4[%c6, %c0_64, %c0_65] : memref<9x64x64xbf16, #tpu.memory_space<vmem>>, vector<1x64x64xbf16>
    %64 = vector.shape_cast %63 : vector<1x64x64xbf16> to vector<64x64xbf16>
    %cst_66 = arith.constant dense<0.000000e+00> : vector<256x64xf32>
    %65 = tpu.matmul %62, %64, %cst_66 {dimension_numbers = #tpu.dot_dimension_numbers<[1], [0], [0], [1], [0, 0, 1, 1], [], []>} : vector<256x64xbf16>, vector<64x64xbf16>, vector<256x64xf32> -> vector<256x64xf32>
    %66 = arith.addf %59, %65 : vector<256x64xf32>
    %c2_67 = arith.constant 2 : index
    %c1_68 = arith.constant 1 : index
    %c0_69 = arith.constant 0 : index
    %67 = vector.load %arg9[%c2_67, %c1_68, %c0_69] : memref<18x18x64xf32, #tpu.memory_space<vmem>>, vector<16x16x64xf32>
    %68 = vector.shape_cast %67 : vector<16x16x64xf32> to vector<256x64xf32>
    %69 = arith.truncf %68 : vector<256x64xf32> to vector<256x64xbf16>
    %c7 = arith.constant 7 : index
    %c0_70 = arith.constant 0 : index
    %c0_71 = arith.constant 0 : index
    %70 = vector.load %arg4[%c7, %c0_70, %c0_71] : memref<9x64x64xbf16, #tpu.memory_space<vmem>>, vector<1x64x64xbf16>
    %71 = vector.shape_cast %70 : vector<1x64x64xbf16> to vector<64x64xbf16>
    %cst_72 = arith.constant dense<0.000000e+00> : vector<256x64xf32>
    %72 = tpu.matmul %69, %71, %cst_72 {dimension_numbers = #tpu.dot_dimension_numbers<[1], [0], [0], [1], [0, 0, 1, 1], [], []>} : vector<256x64xbf16>, vector<64x64xbf16>, vector<256x64xf32> -> vector<256x64xf32>
    %73 = arith.addf %66, %72 : vector<256x64xf32>
    %c2_73 = arith.constant 2 : index
    %c2_74 = arith.constant 2 : index
    %c0_75 = arith.constant 0 : index
    %74 = vector.load %arg9[%c2_73, %c2_74, %c0_75] : memref<18x18x64xf32, #tpu.memory_space<vmem>>, vector<16x16x64xf32>
    %75 = vector.shape_cast %74 : vector<16x16x64xf32> to vector<256x64xf32>
    %76 = arith.truncf %75 : vector<256x64xf32> to vector<256x64xbf16>
    %c8 = arith.constant 8 : index
    %c0_76 = arith.constant 0 : index
    %c0_77 = arith.constant 0 : index
    %77 = vector.load %arg4[%c8, %c0_76, %c0_77] : memref<9x64x64xbf16, #tpu.memory_space<vmem>>, vector<1x64x64xbf16>
    %78 = vector.shape_cast %77 : vector<1x64x64xbf16> to vector<64x64xbf16>
    %cst_78 = arith.constant dense<0.000000e+00> : vector<256x64xf32>
    %79 = tpu.matmul %76, %78, %cst_78 {dimension_numbers = #tpu.dot_dimension_numbers<[1], [0], [0], [1], [0, 0, 1, 1], [], []>} : vector<256x64xbf16>, vector<64x64xbf16>, vector<256x64xf32> -> vector<256x64xf32>
    %80 = arith.addf %73, %79 : vector<256x64xf32>
    %c0_79 = arith.constant 0 : index
    %c0_80 = arith.constant 0 : index
    %81 = vector.load %arg5[%c0_79, %c0_80] : memref<1x64xf32, #tpu.memory_space<vmem>>, vector<1x64xf32>
    %82 = vector.broadcast %81 : vector<1x64xf32> to vector<256x64xf32>
    %83 = arith.addf %80, %82 : vector<256x64xf32>
    %cst_81 = arith.constant 0.000000e+00 : f32
    %84 = vector.broadcast %cst_81 : f32 to vector<256x64xf32>
    %85 = arith.maximumf %83, %84 : vector<256x64xf32>
    %86 = vector.shape_cast %85 : vector<256x64xf32> to vector<16x16x64xf32>
    %87 = vector.shape_cast %86 : vector<16x16x64xf32> to vector<8x2x16x64xf32>
    %88 = vector.extract_strided_slice %87 {offsets = [0, 0, 0, 0], sizes = [8, 1, 16, 64], strides = [1, 1, 1, 1]} : vector<8x2x16x64xf32> to vector<8x1x16x64xf32>
    %89 = vector.shape_cast %88 : vector<8x1x16x64xf32> to vector<8x16x64xf32>
    %90 = vector.extract_strided_slice %87 {offsets = [0, 1, 0, 0], sizes = [8, 1, 16, 64], strides = [1, 1, 1, 1]} : vector<8x2x16x64xf32> to vector<8x1x16x64xf32>
    %91 = vector.shape_cast %90 : vector<8x1x16x64xf32> to vector<8x16x64xf32>
    %92 = arith.maximumf %89, %91 : vector<8x16x64xf32>
    %93 = vector.shape_cast %92 : vector<8x16x64xf32> to vector<8x8x2x64xf32>
    %94 = vector.extract_strided_slice %93 {offsets = [0, 0, 0, 0], sizes = [8, 8, 1, 64], strides = [1, 1, 1, 1]} : vector<8x8x2x64xf32> to vector<8x8x1x64xf32>
    %95 = vector.shape_cast %94 : vector<8x8x1x64xf32> to vector<8x8x64xf32>
    %96 = vector.extract_strided_slice %93 {offsets = [0, 0, 1, 0], sizes = [8, 8, 1, 64], strides = [1, 1, 1, 1]} : vector<8x8x2x64xf32> to vector<8x8x1x64xf32>
    %97 = vector.shape_cast %96 : vector<8x8x1x64xf32> to vector<8x8x64xf32>
    %98 = arith.maximumf %95, %97 : vector<8x8x64xf32>
    %cst_82 = arith.constant 0.000000e+00 : f32
    %99 = vector.broadcast %cst_82 : f32 to vector<1x10x64xf32>
    %c0_83 = arith.constant 0 : index
    %c0_84 = arith.constant 0 : index
    %c0_85 = arith.constant 0 : index
    %100 = vector.load %arg10[%c0_83, %c0_84, %c0_85] : memref<10x10x64xf32, #tpu.memory_space<vmem>>, vector<1x10x64xf32>
    tpu.vector_store %arg10[%c0_83, %c0_84, %c0_85], %99 {strides = array<i32>} : memref<10x10x64xf32, #tpu.memory_space<vmem>>, vector<1x10x64xf32>,
    %c9 = arith.constant 9 : index
    %c0_86 = arith.constant 0 : index
    %c0_87 = arith.constant 0 : index
    %101 = vector.load %arg10[%c9, %c0_86, %c0_87] : memref<10x10x64xf32, #tpu.memory_space<vmem>>, vector<1x10x64xf32>
    tpu.vector_store %arg10[%c9, %c0_86, %c0_87], %99 {strides = array<i32>} : memref<10x10x64xf32, #tpu.memory_space<vmem>>, vector<1x10x64xf32>,
    %cst_88 = arith.constant 0.000000e+00 : f32
    %102 = vector.broadcast %cst_88 : f32 to vector<10x1x64xf32>
    %c0_89 = arith.constant 0 : index
    %c0_90 = arith.constant 0 : index
    %c0_91 = arith.constant 0 : index
    %103 = vector.load %arg10[%c0_89, %c0_90, %c0_91] : memref<10x10x64xf32, #tpu.memory_space<vmem>>, vector<10x1x64xf32>
    tpu.vector_store %arg10[%c0_89, %c0_90, %c0_91], %102 {strides = array<i32>} : memref<10x10x64xf32, #tpu.memory_space<vmem>>, vector<10x1x64xf32>,
    %c0_92 = arith.constant 0 : index
    %c9_93 = arith.constant 9 : index
    %c0_94 = arith.constant 0 : index
    %104 = vector.load %arg10[%c0_92, %c9_93, %c0_94] : memref<10x10x64xf32, #tpu.memory_space<vmem>>, vector<10x1x64xf32>
    tpu.vector_store %arg10[%c0_92, %c9_93, %c0_94], %102 {strides = array<i32>} : memref<10x10x64xf32, #tpu.memory_space<vmem>>, vector<10x1x64xf32>,
    %c1_95 = arith.constant 1 : index
    %c1_96 = arith.constant 1 : index
    %c0_97 = arith.constant 0 : index
    %105 = vector.load %arg10[%c1_95, %c1_96, %c0_97] : memref<10x10x64xf32, #tpu.memory_space<vmem>>, vector<8x8x64xf32>
    tpu.vector_store %arg10[%c1_95, %c1_96, %c0_97], %98 {strides = array<i32>} : memref<10x10x64xf32, #tpu.memory_space<vmem>>, vector<8x8x64xf32>,
    %cst_98 = arith.constant 0.000000e+00 : f32
    %106 = vector.broadcast %cst_98 : f32 to vector<64x128xf32>
    %c0_99 = arith.constant 0 : index
    %c0_100 = arith.constant 0 : index
    %c0_101 = arith.constant 0 : index
    %107 = vector.load %arg10[%c0_99, %c0_100, %c0_101] : memref<10x10x64xf32, #tpu.memory_space<vmem>>, vector<8x8x64xf32>
    %108 = vector.shape_cast %107 : vector<8x8x64xf32> to vector<64x64xf32>
    %109 = arith.truncf %108 : vector<64x64xf32> to vector<64x64xbf16>
    %c0_102 = arith.constant 0 : index
    %c0_103 = arith.constant 0 : index
    %c0_104 = arith.constant 0 : index
    %110 = vector.load %arg6[%c0_102, %c0_103, %c0_104] : memref<9x64x128xbf16, #tpu.memory_space<vmem>>, vector<1x64x128xbf16>
    %111 = vector.shape_cast %110 : vector<1x64x128xbf16> to vector<64x128xbf16>
    %cst_105 = arith.constant dense<0.000000e+00> : vector<64x128xf32>
    %112 = tpu.matmul %109, %111, %cst_105 {dimension_numbers = #tpu.dot_dimension_numbers<[1], [0], [0], [1], [0, 0, 1, 1], [], []>} : vector<64x64xbf16>, vector<64x128xbf16>, vector<64x128xf32> -> vector<64x128xf32>
    %113 = arith.addf %106, %112 : vector<64x128xf32>
    %c0_106 = arith.constant 0 : index
    %c1_107 = arith.constant 1 : index
    %c0_108 = arith.constant 0 : index
    %114 = vector.load %arg10[%c0_106, %c1_107, %c0_108] : memref<10x10x64xf32, #tpu.memory_space<vmem>>, vector<8x8x64xf32>
    %115 = vector.shape_cast %114 : vector<8x8x64xf32> to vector<64x64xf32>
    %116 = arith.truncf %115 : vector<64x64xf32> to vector<64x64xbf16>
    %c1_109 = arith.constant 1 : index
    %c0_110 = arith.constant 0 : index
    %c0_111 = arith.constant 0 : index
    %117 = vector.load %arg6[%c1_109, %c0_110, %c0_111] : memref<9x64x128xbf16, #tpu.memory_space<vmem>>, vector<1x64x128xbf16>
    %118 = vector.shape_cast %117 : vector<1x64x128xbf16> to vector<64x128xbf16>
    %cst_112 = arith.constant dense<0.000000e+00> : vector<64x128xf32>
    %119 = tpu.matmul %116, %118, %cst_112 {dimension_numbers = #tpu.dot_dimension_numbers<[1], [0], [0], [1], [0, 0, 1, 1], [], []>} : vector<64x64xbf16>, vector<64x128xbf16>, vector<64x128xf32> -> vector<64x128xf32>
    %120 = arith.addf %113, %119 : vector<64x128xf32>
    %c0_113 = arith.constant 0 : index
    %c2_114 = arith.constant 2 : index
    %c0_115 = arith.constant 0 : index
    %121 = vector.load %arg10[%c0_113, %c2_114, %c0_115] : memref<10x10x64xf32, #tpu.memory_space<vmem>>, vector<8x8x64xf32>
    %122 = vector.shape_cast %121 : vector<8x8x64xf32> to vector<64x64xf32>
    %123 = arith.truncf %122 : vector<64x64xf32> to vector<64x64xbf16>
    %c2_116 = arith.constant 2 : index
    %c0_117 = arith.constant 0 : index
    %c0_118 = arith.constant 0 : index
    %124 = vector.load %arg6[%c2_116, %c0_117, %c0_118] : memref<9x64x128xbf16, #tpu.memory_space<vmem>>, vector<1x64x128xbf16>
    %125 = vector.shape_cast %124 : vector<1x64x128xbf16> to vector<64x128xbf16>
    %cst_119 = arith.constant dense<0.000000e+00> : vector<64x128xf32>
    %126 = tpu.matmul %123, %125, %cst_119 {dimension_numbers = #tpu.dot_dimension_numbers<[1], [0], [0], [1], [0, 0, 1, 1], [], []>} : vector<64x64xbf16>, vector<64x128xbf16>, vector<64x128xf32> -> vector<64x128xf32>
    %127 = arith.addf %120, %126 : vector<64x128xf32>
    %c1_120 = arith.constant 1 : index
    %c0_121 = arith.constant 0 : index
    %c0_122 = arith.constant 0 : index
    %128 = vector.load %arg10[%c1_120, %c0_121, %c0_122] : memref<10x10x64xf32, #tpu.memory_space<vmem>>, vector<8x8x64xf32>
    %129 = vector.shape_cast %128 : vector<8x8x64xf32> to vector<64x64xf32>
    %130 = arith.truncf %129 : vector<64x64xf32> to vector<64x64xbf16>
    %c3_123 = arith.constant 3 : index
    %c0_124 = arith.constant 0 : index
    %c0_125 = arith.constant 0 : index
    %131 = vector.load %arg6[%c3_123, %c0_124, %c0_125] : memref<9x64x128xbf16, #tpu.memory_space<vmem>>, vector<1x64x128xbf16>
    %132 = vector.shape_cast %131 : vector<1x64x128xbf16> to vector<64x128xbf16>
    %cst_126 = arith.constant dense<0.000000e+00> : vector<64x128xf32>
    %133 = tpu.matmul %130, %132, %cst_126 {dimension_numbers = #tpu.dot_dimension_numbers<[1], [0], [0], [1], [0, 0, 1, 1], [], []>} : vector<64x64xbf16>, vector<64x128xbf16>, vector<64x128xf32> -> vector<64x128xf32>
    %134 = arith.addf %127, %133 : vector<64x128xf32>
    %c1_127 = arith.constant 1 : index
    %c1_128 = arith.constant 1 : index
    %c0_129 = arith.constant 0 : index
    %135 = vector.load %arg10[%c1_127, %c1_128, %c0_129] : memref<10x10x64xf32, #tpu.memory_space<vmem>>, vector<8x8x64xf32>
    %136 = vector.shape_cast %135 : vector<8x8x64xf32> to vector<64x64xf32>
    %137 = arith.truncf %136 : vector<64x64xf32> to vector<64x64xbf16>
    %c4_130 = arith.constant 4 : index
    %c0_131 = arith.constant 0 : index
    %c0_132 = arith.constant 0 : index
    %138 = vector.load %arg6[%c4_130, %c0_131, %c0_132] : memref<9x64x128xbf16, #tpu.memory_space<vmem>>, vector<1x64x128xbf16>
    %139 = vector.shape_cast %138 : vector<1x64x128xbf16> to vector<64x128xbf16>
    %cst_133 = arith.constant dense<0.000000e+00> : vector<64x128xf32>
    %140 = tpu.matmul %137, %139, %cst_133 {dimension_numbers = #tpu.dot_dimension_numbers<[1], [0], [0], [1], [0, 0, 1, 1], [], []>} : vector<64x64xbf16>, vector<64x128xbf16>, vector<64x128xf32> -> vector<64x128xf32>
    %141 = arith.addf %134, %140 : vector<64x128xf32>
    %c1_134 = arith.constant 1 : index
    %c2_135 = arith.constant 2 : index
    %c0_136 = arith.constant 0 : index
    %142 = vector.load %arg10[%c1_134, %c2_135, %c0_136] : memref<10x10x64xf32, #tpu.memory_space<vmem>>, vector<8x8x64xf32>
    %143 = vector.shape_cast %142 : vector<8x8x64xf32> to vector<64x64xf32>
    %144 = arith.truncf %143 : vector<64x64xf32> to vector<64x64xbf16>
    %c5_137 = arith.constant 5 : index
    %c0_138 = arith.constant 0 : index
    %c0_139 = arith.constant 0 : index
    %145 = vector.load %arg6[%c5_137, %c0_138, %c0_139] : memref<9x64x128xbf16, #tpu.memory_space<vmem>>, vector<1x64x128xbf16>
    %146 = vector.shape_cast %145 : vector<1x64x128xbf16> to vector<64x128xbf16>
    %cst_140 = arith.constant dense<0.000000e+00> : vector<64x128xf32>
    %147 = tpu.matmul %144, %146, %cst_140 {dimension_numbers = #tpu.dot_dimension_numbers<[1], [0], [0], [1], [0, 0, 1, 1], [], []>} : vector<64x64xbf16>, vector<64x128xbf16>, vector<64x128xf32> -> vector<64x128xf32>
    %148 = arith.addf %141, %147 : vector<64x128xf32>
    %c2_141 = arith.constant 2 : index
    %c0_142 = arith.constant 0 : index
    %c0_143 = arith.constant 0 : index
    %149 = vector.load %arg10[%c2_141, %c0_142, %c0_143] : memref<10x10x64xf32, #tpu.memory_space<vmem>>, vector<8x8x64xf32>
    %150 = vector.shape_cast %149 : vector<8x8x64xf32> to vector<64x64xf32>
    %151 = arith.truncf %150 : vector<64x64xf32> to vector<64x64xbf16>
    %c6_144 = arith.constant 6 : index
    %c0_145 = arith.constant 0 : index
    %c0_146 = arith.constant 0 : index
    %152 = vector.load %arg6[%c6_144, %c0_145, %c0_146] : memref<9x64x128xbf16, #tpu.memory_space<vmem>>, vector<1x64x128xbf16>
    %153 = vector.shape_cast %152 : vector<1x64x128xbf16> to vector<64x128xbf16>
    %cst_147 = arith.constant dense<0.000000e+00> : vector<64x128xf32>
    %154 = tpu.matmul %151, %153, %cst_147 {dimension_numbers = #tpu.dot_dimension_numbers<[1], [0], [0], [1], [0, 0, 1, 1], [], []>} : vector<64x64xbf16>, vector<64x128xbf16>, vector<64x128xf32> -> vector<64x128xf32>
    %155 = arith.addf %148, %154 : vector<64x128xf32>
    %c2_148 = arith.constant 2 : index
    %c1_149 = arith.constant 1 : index
    %c0_150 = arith.constant 0 : index
    %156 = vector.load %arg10[%c2_148, %c1_149, %c0_150] : memref<10x10x64xf32, #tpu.memory_space<vmem>>, vector<8x8x64xf32>
    %157 = vector.shape_cast %156 : vector<8x8x64xf32> to vector<64x64xf32>
    %158 = arith.truncf %157 : vector<64x64xf32> to vector<64x64xbf16>
    %c7_151 = arith.constant 7 : index
    %c0_152 = arith.constant 0 : index
    %c0_153 = arith.constant 0 : index
    %159 = vector.load %arg6[%c7_151, %c0_152, %c0_153] : memref<9x64x128xbf16, #tpu.memory_space<vmem>>, vector<1x64x128xbf16>
    %160 = vector.shape_cast %159 : vector<1x64x128xbf16> to vector<64x128xbf16>
    %cst_154 = arith.constant dense<0.000000e+00> : vector<64x128xf32>
    %161 = tpu.matmul %158, %160, %cst_154 {dimension_numbers = #tpu.dot_dimension_numbers<[1], [0], [0], [1], [0, 0, 1, 1], [], []>} : vector<64x64xbf16>, vector<64x128xbf16>, vector<64x128xf32> -> vector<64x128xf32>
    %162 = arith.addf %155, %161 : vector<64x128xf32>
    %c2_155 = arith.constant 2 : index
    %c2_156 = arith.constant 2 : index
    %c0_157 = arith.constant 0 : index
    %163 = vector.load %arg10[%c2_155, %c2_156, %c0_157] : memref<10x10x64xf32, #tpu.memory_space<vmem>>, vector<8x8x64xf32>
    %164 = vector.shape_cast %163 : vector<8x8x64xf32> to vector<64x64xf32>
    %165 = arith.truncf %164 : vector<64x64xf32> to vector<64x64xbf16>
    %c8_158 = arith.constant 8 : index
    %c0_159 = arith.constant 0 : index
    %c0_160 = arith.constant 0 : index
    %166 = vector.load %arg6[%c8_158, %c0_159, %c0_160] : memref<9x64x128xbf16, #tpu.memory_space<vmem>>, vector<1x64x128xbf16>
    %167 = vector.shape_cast %166 : vector<1x64x128xbf16> to vector<64x128xbf16>
    %cst_161 = arith.constant dense<0.000000e+00> : vector<64x128xf32>
    %168 = tpu.matmul %165, %167, %cst_161 {dimension_numbers = #tpu.dot_dimension_numbers<[1], [0], [0], [1], [0, 0, 1, 1], [], []>} : vector<64x64xbf16>, vector<64x128xbf16>, vector<64x128xf32> -> vector<64x128xf32>
    %169 = arith.addf %162, %168 : vector<64x128xf32>
    %c0_162 = arith.constant 0 : index
    %c0_163 = arith.constant 0 : index
    %170 = vector.load %arg7[%c0_162, %c0_163] : memref<1x128xf32, #tpu.memory_space<vmem>>, vector<1x128xf32>
    %171 = vector.broadcast %170 : vector<1x128xf32> to vector<64x128xf32>
    %172 = arith.addf %169, %171 : vector<64x128xf32>
    %cst_164 = arith.constant 0.000000e+00 : f32
    %173 = vector.broadcast %cst_164 : f32 to vector<64x128xf32>
    %174 = arith.maximumf %172, %173 : vector<64x128xf32>
    %175 = vector.shape_cast %174 : vector<64x128xf32> to vector<8x8x128xf32>
    %176 = vector.shape_cast %175 : vector<8x8x128xf32> to vector<1x8x8x128xf32>
    %c0_165 = arith.constant 0 : index
    %c0_166 = arith.constant 0 : index
    %c0_167 = arith.constant 0 : index
    %c0_168 = arith.constant 0 : index
    %177 = vector.load %arg8[%c0_165, %c0_166, %c0_167, %c0_168] : memref<1x8x8x128xf32, #tpu.memory_space<vmem>>, vector<1x8x8x128xf32>
    tpu.vector_store %arg8[%c0_165, %c0_166, %c0_167, %c0_168], %176 {strides = array<i32>} : memref<1x8x8x128xf32, #tpu.memory_space<vmem>>, vector<1x8x8x128xf32>,
    return
  }
  func.func @transform_0(%arg0: i32) -> (i32, i32, i32) {
    %c0_i32 = arith.constant 0 : i32
    %c0_i32_0 = arith.constant 0 : i32
    %c0_i32_1 = arith.constant 0 : i32
    return %arg0, %c0_i32, %c0_i32_0 : i32, i32, i32
  }
  func.func @transform_1(%arg0: i32) -> (i32, i32) {
    %c0_i32 = arith.constant 0 : i32
    %c0_i32_0 = arith.constant 0 : i32
    %c0_i32_1 = arith.constant 0 : i32
    return %c0_i32, %c0_i32_0 : i32, i32
  }
  func.func @transform_2(%arg0: i32) -> (i32, i32) {
    %c0_i32 = arith.constant 0 : i32
    %c0_i32_0 = arith.constant 0 : i32
    %c0_i32_1 = arith.constant 0 : i32
    return %c0_i32, %c0_i32_0 : i32, i32
  }
  func.func @transform_3(%arg0: i32) -> (i32, i32, i32) {
    %c0_i32 = arith.constant 0 : i32
    %c0_i32_0 = arith.constant 0 : i32
    %c0_i32_1 = arith.constant 0 : i32
    %c0_i32_2 = arith.constant 0 : i32
    return %c0_i32, %c0_i32_0, %c0_i32_1 : i32, i32, i32
  }
  func.func @transform_4(%arg0: i32) -> (i32, i32) {
    %c0_i32 = arith.constant 0 : i32
    %c0_i32_0 = arith.constant 0 : i32
    %c0_i32_1 = arith.constant 0 : i32
    return %c0_i32, %c0_i32_0 : i32, i32
  }
  func.func @transform_5(%arg0: i32) -> (i32, i32, i32) {
    %c0_i32 = arith.constant 0 : i32
    %c0_i32_0 = arith.constant 0 : i32
    %c0_i32_1 = arith.constant 0 : i32
    %c0_i32_2 = arith.constant 0 : i32
    return %c0_i32, %c0_i32_0, %c0_i32_1 : i32, i32, i32
  }
  func.func @transform_6(%arg0: i32) -> (i32, i32) {
    %c0_i32 = arith.constant 0 : i32
    %c0_i32_0 = arith.constant 0 : i32
    %c0_i32_1 = arith.constant 0 : i32
    return %c0_i32, %c0_i32_0 : i32, i32
  }
  func.func @transform_7(%arg0: i32) -> (i32, i32, i32, i32) {
    %c0_i32 = arith.constant 0 : i32
    %c0_i32_0 = arith.constant 0 : i32
    %c0_i32_1 = arith.constant 0 : i32
    %c0_i32_2 = arith.constant 0 : i32
    return %arg0, %c0_i32, %c0_i32_0, %c0_i32_1 : i32, i32, i32, i32
  }
}

</mosaic_0001>

<bundles_post_ra>
// kernel: tpu_custom_call.1
= control target key start
LH: loop header
LB: loop body
LE: loop exit
PB: predicated region body
PF: predicated region fallthrough
CT: control target
= control target key end

     0   :  { %12 = vsyncpa [#allocation5], 0  ;;  %s9450_s0 = inlined_call_operand.vmem [shape: f32[2,256,27], index: 0, kind: input, shape index: {}]   ;;  %s9451_s1 = inlined_call_operand.vmem [shape: f32[27,64], index: 1, kind: input, shape index: {}]   ;;  %s9452_s2 = inlined_call_operand.vmem [shape: f32[1,64], index: 2, kind: input, shape index: {}]   ;;  %s9453_s3 = inlined_call_operand.vmem [shape: bf16[9,64,64], index: 3, kind: input, shape index: {}]   ;;  %s9454_s4 = inlined_call_operand.vmem [shape: f32[1,64], index: 4, kind: input, shape index: {}]   ;;  %s9455_s5 = inlined_call_operand.vmem [shape: bf16[9,64,128], index: 5, kind: input, shape index: {}]   ;;  %s9456_s6 = inlined_call_operand.vmem [shape: f32[1,128], index: 6, kind: input, shape index: {}]   ;;  %s9457_s7 = inlined_call_operand.hbm [shape: f32[2,8,8,128], index: 7, kind: output, shape index: {}]  }
   0x1   :  { %14 = vsyncpa [#allocation5 + $0x1], 0  ;;  %s7537_s24 = smov 0   ;;  %s7539_s25 = smov 0  }
   0x2   :  { %s7541_s26 = smov 0   ;;  %s7543_s27 = smov 0  }
   0x3 LB: > { %s7558_s28 = sadd.s32 4294967295, %s7490_s27   ;;  %s5973_s29 = sadd.s32 4294967294, %s7490_s27   ;;  %s7490_s27 = sphi %s7543_s27, %s9497_s27   ;;  %s7486_s26 = sphi %s7541_s26, %s9496_s26   ;;  %s7482_s25 = sphi %s7539_s25, %s9495_s25   ;;  %s7478_s24 = sphi %s7537_s24, %s9494_s24  }
   0x4   : > { %s7562_s30 = sadd.s32 1, %s7490_s27   ;;  %s179_s8 = sadd.s32 1, %s7486_s26 }
   0x5   : > { %s176_s9 = ssub.s32 %s7490_s27, %s7562_s30  ;;  %p189_p0 = scmp.ne.s32.totalorder %s7486_s26, %s7482_s25 }
   0x6   : > { %p177_p1 = scmp.eq.s32.totalorder %s176_s9, 0  ;;  %p190_p2 = scmp.eq.s32.totalorder %s7558_s28, 1 }
   0x7   : > { %p195_p3 = scmp.ne.s32.totalorder %s7482_s25, %s7478_s24  ;;  %p196_p4 = scmp.eq.s32.totalorder %s5973_s29, 1 }
   0x8   : > { %s7573_s10 = scalar_select %p177_p1, %s7486_s26, %s179_s8  }
   0x9   : > { %p7575_p5 = por %p190_p2, %p189_p0  ;;  %p7579_p6 = por %p196_p4, %p195_p3 }
   0xa   : > { %p5976_p7 = scmp.ge.s32.totalorder %s7490_s27, 1  ;;  %p240_p8 = scmp.lt.s32.totalorder %s7490_s27, 3 }
   0xc   : > { %p241_p9 = pnand %p5976_p7, %p240_p8 }
   0xe   : > { %244 = sbr.rel (%p241_p9) target bundleno = 1093 (0x445), region = 48 }
  0x13   : > { %v313_v0 = vld [vmem:[%s9451_s1 + $0x18] sm:$0x7]  ;;  %vm418_vm0 = vcmask 1042432   ;;  %v312_v1 = vld [vmem:[%s9451_s1 + $0x10] sm:$0xff]  ;;  %p272_p10 = scmp.lt.s32.totalorder %s7558_s28, 1  ;;  %v311_v2 = vld [vmem:[%s9451_s1 + $0x8] sm:$0xff] }
  0x14   : > { %6755 = vmatprep.subr.msk.mxu0 %vm418_vm0, %v313_v0  ;;  %v310_v3 = vld [vmem:[%s9451_s1] sm:$0xff]  ;;  %vm321_vm1 = vcmask 220160   ;;  %v7358_v36 = vld [vmem:[%s9453_s3 + $0x38] sm:$0xff]   ;;  %vm679_vm2 = vcmask 523264   ;;  %v7360_v38 = vld [vmem:[%s9453_s3 + $0x30] sm:$0xff]   ;;  %vm688_vm3 = vcmask 516096  }
  0x15   : > { %6756 = vmatpush3.msk.msra.mxu0 %vm418_vm0, %v313_v0  ;;  %s273_s21 = scalar_select %p272_p10, %s7558_s28, 1  ;;  %v7359_v37 = vld [vmem:[%s9453_s3 + $0x18] sm:$0xff]   ;;  %6811 = vmatprep.subr.bf16.mxu1 %v7358_v36  ;;  %v7361_v39 = vld [vmem:[%s9453_s3 + $0x10] sm:$0xff]   ;;  %v7492_v40 = vmov 0.0   ;;  %vm682_vm4 = vcmask 517120   ;;  %v7362_v41 = vld [vmem:[%s9453_s3 + $0x28] sm:$0xff]  }
  0x16   : > { %6757 = vmatprep.subr.mxu0 %v312_v1  ;;  %6812 = vmatpush3.bf16.msra.mxu1 %v7358_v36  ;;  %680 = vst.msk [vmem:[#allocation2] sm:$0xff] %vm679_vm2, %v7492_v40  ;;  %681 = vst.msk [vmem:[#allocation2 + $0x8] sm:$0xff] %vm679_vm2, %v7492_v40  ;;  %v7363_v42 = vld [vmem:[%s9453_s3 + $0x8] sm:$0xff]   ;;  %v7364_v43 = vld [vmem:[%s9453_s3 + $0x20] sm:$0xff]   ;;  %vm4632_vm5 = vcmask 1041409   ;;  %vm4634_vm6 = vcmask 1042434  }
  0x17   : > { %6758 = vmatpush3.msra.mxu0 %v312_v1  ;;  %s6465_s22 = sshll.u32 %s273_s21, 8  ;;  %6813 = vmatprep.subr.bf16.mxu1 %v7360_v38  ;;  %685 = vst.msk [vmem:[#allocation2 + $0x198] sm:$0xff] %vm679_vm2, %v7492_v40  ;;  %686 = vst.msk [vmem:[#allocation2 + $0x1a0] sm:$0xff] %vm679_vm2, %v7492_v40  ;;  %v7365_v44 = vld [vmem:[%s9453_s3] sm:$0xff]   ;;  %v7366_v51 = vld [vmem:[%s9453_s3 + $0x58] sm:$0xff]   ;;  %vm4636_vm7 = vcmask 1043459  }
  0x18   : > { %6759 = vmatprep.subr.mxu0 %v311_v2  ;;  %s7602_s8 = scalar_lea.vmem %s9450_s0, %s6465_s22  ;;  %690 = vst.msk [vmem:[#allocation2 + $0x18] sm:$0x1] %vm688_vm3, %v7492_v40  ;;  %691 = vst.msk [vmem:[#allocation2 + $0x30] sm:$0x1] %vm688_vm3, %v7492_v40  ;;  %v7370_v52 = vld [vmem:[%s9453_s3 + $0x78] sm:$0xff]   ;;  %vm4638_vm8 = vcmask 1044484  }
  0x19   : > { %6760 = vmatpush3.msra.mxu0 %v311_v2  ;;  %v278_v4 = vld [vmem:[%s7602_s8] sm:$0xff]  ;;  %v279_v5 = vld [vmem:[%s7602_s8 + $0x8] sm:$0xff]  ;;  %v280_v6 = vld [vmem:[%s7602_s8 + $0x10] sm:$0xff]  ;;  %692 = vst.msk [vmem:[#allocation2 + $0x48] sm:$0x1] %vm688_vm3, %v7492_v40  ;;  %vm4640_vm9 = vcmask 1045509  }
  0x1a   : > { %6761 = vmatprep.subr.mxu0 %v310_v3  ;;  %6763 = vmatprep.mubr.msk.f32.mxu0 %vm321_vm1, %v278_v4  ;;  %v281_v7 = vld [vmem:[%s7602_s8 + $0x18] sm:$0xff]  ;;  %v282_v8 = vld [vmem:[%s7602_s8 + $0x20] sm:$0xff]  ;;  %v283_v9 = vld [vmem:[%s7602_s8 + $0x28] sm:$0xff]  ;;  %693 = vst.msk [vmem:[#allocation2 + $0x60] sm:$0x1] %vm688_vm3, %v7492_v40  ;;  %vm4642_vm10 = vcmask 1046534  }
  0x1b   : > { %6762 = vmatpush3.msra.mxu0 %v310_v3  ;;  %v284_v10 = vld [vmem:[%s7602_s8 + $0x30] sm:$0xff]  ;;  %v285_v11 = vld [vmem:[%s7602_s8 + $0x38] sm:$0xff]  ;;  %v286_v12 = vld [vmem:[%s7602_s8 + $0x40] sm:$0xff]  ;;  %694 = vst.msk [vmem:[#allocation2 + $0x78] sm:$0x1] %vm688_vm3, %v7492_v40  ;;  %6814 = vmatpush3.bf16.msra.mxu1 %v7360_v38  ;;  %vm4644_vm11 = vcmask 1047559  }
  0x1c   : > { %6764 = vmatmul.mubr.msk.f32.vlgmr.msra.gmra.mxu0 %vm321_vm1, %v279_v5  ;;  %v287_v13 = vld [vmem:[%s7602_s8 + $0x48] sm:$0xff]  ;;  %v288_v14 = vld [vmem:[%s7602_s8 + $0x50] sm:$0xff]  ;;  %v289_v15 = vld [vmem:[%s7602_s8 + $0x58] sm:$0xff]  ;;  %6851 = vmatprep.subr.bf16.mxu0 %v7359_v37  ;;  %695 = vst.msk [vmem:[#allocation2 + $0x90] sm:$0x1] %vm688_vm3, %v7492_v40  ;;  %s269_s20 = sand.u32 1, %s7482_s25  }
  0x1d   : > { %6766 = vmatprep.mubr.msk.f32.mxu0 %vm321_vm1, %v280_v6  ;;  %v290_v16 = vld [vmem:[%s7602_s8 + $0x60] sm:$0xff]  ;;  %v291_v17 = vld [vmem:[%s7602_s8 + $0x68] sm:$0xff]  ;;  %v292_v18 = vld [vmem:[%s7602_s8 + $0x70] sm:$0xff]  ;;  %6852 = vmatpush3.bf16.msra.mxu0 %v7359_v37  ;;  %696 = vst.msk [vmem:[#allocation2 + $0xa8] sm:$0x1] %vm688_vm3, %v7492_v40  ;;  %s5977_s23 = sshll.u32 %s269_s20, 6 }
  0x1e   : > { %v293_v19 = vld [vmem:[%s7602_s8 + $0x78] sm:$0xff]  ;;  %v294_v20 = vld [vmem:[%s7602_s8 + $0x80] sm:$0xff]  ;;  %v295_v21 = vld [vmem:[%s7602_s8 + $0x88] sm:$0xff]  ;;  %6853 = vmatprep.subr.bf16.mxu0 %v7361_v39  ;;  %697 = vst.msk [vmem:[#allocation2 + $0xc0] sm:$0x1] %vm688_vm3, %v7492_v40  ;;  %6815 = vmatprep.subr.bf16.mxu1 %v7362_v41  ;;  %s9389_s29 = scalar_lea.vmem [#allocation4], %s5977_s23 }
  0x1f   : > { %v296_v22 = vld [vmem:[%s7602_s8 + $0x90] sm:$0xff]  ;;  %v297_v23 = vld [vmem:[%s7602_s8 + $0x98] sm:$0xff]  ;;  %v298_v24 = vld [vmem:[%s7602_s8 + $0xa0] sm:$0xff]  ;;  %698 = vst.msk [vmem:[#allocation2 + $0xd8] sm:$0x1] %vm688_vm3, %v7492_v40  ;;  %6816 = vmatpush3.bf16.msra.mxu1 %v7362_v41  ;;  %s5911_s9 = sshll.u32 %s9389_s29, 4  ;;  %s9404_s9 = int_to_ptr.vmem [resolvable:$true] %s5911_s9 }
  0x20   : > { %6767 = vmatmul.mubr.msk.f32.gmra.mxu0 %vm321_vm1, %v281_v7  ;;  %v299_v25 = vld [vmem:[%s7602_s8 + $0xa8] sm:$0xff]  ;;  %v300_v26 = vld [vmem:[%s7602_s8 + $0xb0] sm:$0xff]  ;;  %v301_v27 = vld [vmem:[%s7602_s8 + $0xb8] sm:$0xff]  ;;  %699 = vst.msk [vmem:[#allocation2 + $0xf0] sm:$0x1] %vm688_vm3, %v7492_v40  ;;  %6817 = vmatprep.subr.bf16.mxu1 %v7364_v43  ;;  %s9410_s16 = scalar_lea.sflag [#allocation5], %s269_s20 }
  0x21   : > { %6769 = vmatprep.mubr.msk.f32.mxu0 %vm321_vm1, %v282_v8  ;;  %v302_v28 = vld [vmem:[%s7602_s8 + $0xc0] sm:$0xff]  ;;  %v303_v29 = vld [vmem:[%s7602_s8 + $0xc8] sm:$0xff]  ;;  %v304_v30 = vld [vmem:[%s7602_s8 + $0xd0] sm:$0xff]  ;;  %700 = vst.msk [vmem:[#allocation2 + $0x108] sm:$0x1] %vm688_vm3, %v7492_v40  ;;  %6854 = vmatpush3.bf16.msra.mxu0 %v7361_v39  ;;  %s7494_s17 = smov [#allocation4]  }
  0x22   : > { %v305_v31 = vld [vmem:[%s7602_s8 + $0xd8] sm:$0xff]  ;;  %v306_v32 = vld [vmem:[%s7602_s8 + $0xe0] sm:$0xff]  ;;  %v307_v33 = vld [vmem:[%s7602_s8 + $0xe8] sm:$0xff]  ;;  %701 = vst.msk [vmem:[#allocation2 + $0x120] sm:$0x1] %vm688_vm3, %v7492_v40  ;;  %6855 = vmatprep.subr.bf16.mxu0 %v7363_v42  ;;  %s7434_s18 = sshll.u32 %s7494_s17, 4  ;;  %s7435_s18 = int_to_ptr.vmem [resolvable:$false] %s7434_s18 }
  0x23   : > { %v308_v34 = vld [vmem:[%s7602_s8 + $0xf0] sm:$0xff]  ;;  %v309_v35 = vld [vmem:[%s7602_s8 + $0xf8] sm:$0xff]  ;;  %702 = vst.msk [vmem:[#allocation2 + $0x138] sm:$0x1] %vm688_vm3, %v7492_v40  ;;  %703 = vst.msk [vmem:[#allocation2 + $0x150] sm:$0x1] %vm688_vm3, %v7492_v40  ;;  %6818 = vmatpush3.bf16.msra.mxu1 %v7364_v43  ;;  %p7437_p0 = scmp.lt.s32.totalorder %s9404_s9, %s7435_s18 }
  0x24   : > { %6770 = vmatmul.mubr.msk.f32.gmra.mxu0 %vm321_vm1, %v283_v9  ;;  %704 = vst.msk [vmem:[#allocation2 + $0x168] sm:$0x1] %vm688_vm3, %v7492_v40  ;;  %705 = vst.msk [vmem:[#allocation2 + $0x180] sm:$0x1] %vm688_vm3, %v7492_v40  ;;  %v814_v45 = vld [vmem:[#allocation2 + $0x1] sm:$0xff]  ;;  %6891 = vmatprep.subr.bf16.mxu1 %v7366_v51  ;;  %s6466_s8 = sshll.u32 %s7558_s28, 10 }
  0x25   : > { %6772 = vmatprep.mubr.msk.f32.mxu0 %vm321_vm1, %v284_v10  ;;  %708 = vst.msk [vmem:[#allocation2 + $0x29] sm:$0x1] %vm688_vm3, %v7492_v40  ;;  %709 = vst.msk [vmem:[#allocation2 + $0x41] sm:$0x1] %vm688_vm3, %v7492_v40  ;;  %6856 = vmatpush3.bf16.msra.mxu0 %v7363_v42  ;;  %v759_v49 = vld [vmem:[#allocation2 + $0x8] sm:$0xff]  ;;  %s9402_s15 = scalar_lea.hbm %s9457_s7, %s6466_s8  ;;  %s7430_s28 = scalar_lea.vmem %s9404_s9, 1024 }
  0x26   : > { %710 = vst.msk [vmem:[#allocation2 + $0x59] sm:$0x1] %vm688_vm3, %v7492_v40  ;;  %711 = vst.msk [vmem:[#allocation2 + $0x71] sm:$0x1] %vm688_vm3, %v7492_v40  ;;  %6857 = vmatprep.subr.bf16.mxu0 %v7365_v44  ;;  %v7835_v53 = vld [vmem:[%s9452_s2] ss:$0 sm:$0xff]  ;;  %p7431_p11 = scmp.ne.s32.totalorder %s9404_s9, %s7430_s28 }
  0x27   : > { %712 = vst.msk [vmem:[#allocation2 + $0x89] sm:$0x1] %vm688_vm3, %v7492_v40  ;;  %713 = vst.msk [vmem:[#allocation2 + $0xa1] sm:$0x1] %vm688_vm3, %v7492_v40  ;;  %s7436_s19 = scalar_lea.vmem %s7435_s18, 2048 }
  0x28   : > { %6773 = vmatmul.mubr.msk.f32.gmra.mxu0 %vm321_vm1, %v285_v11  ;;  %714 = vst.msk [vmem:[#allocation2 + $0xb9] sm:$0x1] %vm688_vm3, %v7492_v40  ;;  %715 = vst.msk [vmem:[#allocation2 + $0xd1] sm:$0x1] %vm688_vm3, %v7492_v40  ;;  %p7432_p12 = pnand %p7431_p11, %p7575_p5  ;;  %p7438_p1 = scmp.lt.s32.totalorder %s7436_s19, %s7430_s28 }
  0x29   : > { %6775 = vmatprep.mubr.msk.f32.mxu0 %vm321_vm1, %v286_v12  ;;  %716 = vst.msk [vmem:[#allocation2 + $0xe9] sm:$0x1] %vm688_vm3, %v7492_v40  ;;  %717 = vst.msk [vmem:[#allocation2 + $0x101] sm:$0x1] %vm688_vm3, %v7492_v40  ;;  %6858 = vmatpush3.bf16.msra.mxu0 %v7365_v44 }
  0x2a   : > { %718 = vst.msk [vmem:[#allocation2 + $0x119] sm:$0x1] %vm688_vm3, %v7492_v40  ;;  %719 = vst.msk [vmem:[#allocation2 + $0x131] sm:$0x1] %vm688_vm3, %v7492_v40  ;;  %6931 = vmatprep.subr.bf16.mxu0 %v7370_v52  ;;  %p7433_p13 = pneg %p7432_p12  ;;  %p7439_p2 = por %p7438_p1, %p7437_p0 }
  0x2b   : > { %720 = vst.msk [vmem:[#allocation2 + $0x149] sm:$0x1] %vm688_vm3, %v7492_v40  ;;  %721 = vst.msk [vmem:[#allocation2 + $0x161] sm:$0x1] %vm688_vm3, %v7492_v40 }
  0x2c   : > { %6776 = vmatmul.mubr.msk.f32.gmra.mxu0 %vm321_vm1, %v287_v13  ;;  %722 = vst.msk [vmem:[#allocation2 + $0x179] sm:$0x1] %vm688_vm3, %v7492_v40  ;;  %723 = vst.msk [vmem:[#allocation2 + $0x191] sm:$0x1] %vm688_vm3, %v7492_v40  ;;  %p7440_p3 = pnand %p7439_p2, %p7433_p13 }
  0x2d   : > { %6778 = vmatprep.mubr.msk.f32.mxu0 %vm321_vm1, %v288_v14  ;;  %4287 = vst.msk [vmem:[#allocation3] sm:$0xff] %vm679_vm2, %v7492_v40  ;;  %4290 = vst.msk [vmem:[#allocation3 + $0x90] sm:$0xff] %vm679_vm2, %v7492_v40 }
  0x2e   : > { %4293 = vst.msk [vmem:[#allocation3 + $0x10] sm:$0x1] %vm688_vm3, %v7492_v40  ;;  %4294 = vst.msk [vmem:[#allocation3 + $0x20] sm:$0x1] %vm688_vm3, %v7492_v40 }
  0x2f   : > { %4295 = vst.msk [vmem:[#allocation3 + $0x30] sm:$0x1] %vm688_vm3, %v7492_v40  ;;  %4296 = vst.msk [vmem:[#allocation3 + $0x40] sm:$0x1] %vm688_vm3, %v7492_v40 }
  0x30   : > { %6779 = vmatmul.mubr.msk.f32.gmra.mxu0 %vm321_vm1, %v289_v15  ;;  %4297 = vst.msk [vmem:[#allocation3 + $0x50] sm:$0x1] %vm688_vm3, %v7492_v40  ;;  %4298 = vst.msk [vmem:[#allocation3 + $0x60] sm:$0x1] %vm688_vm3, %v7492_v40 }
  0x31   : > { %6781 = vmatprep.mubr.msk.f32.mxu0 %vm321_vm1, %v290_v16  ;;  %4299 = vst.msk [vmem:[#allocation3 + $0x70] sm:$0x1] %vm688_vm3, %v7492_v40  ;;  %4300 = vst.msk [vmem:[#allocation3 + $0x80] sm:$0x1] %vm688_vm3, %v7492_v40 }
  0x32   : > { %4303 = vst.msk [vmem:[#allocation3 + $0x19] sm:$0x1] %vm688_vm3, %v7492_v40  ;;  %4304 = vst.msk [vmem:[#allocation3 + $0x29] sm:$0x1] %vm688_vm3, %v7492_v40 }
  0x33   : > { %4305 = vst.msk [vmem:[#allocation3 + $0x39] sm:$0x1] %vm688_vm3, %v7492_v40  ;;  %4306 = vst.msk [vmem:[#allocation3 + $0x49] sm:$0x1] %vm688_vm3, %v7492_v40 }
  0x34   : > { %6782 = vmatmul.mubr.msk.f32.gmra.mxu0 %vm321_vm1, %v291_v17  ;;  %4307 = vst.msk [vmem:[#allocation3 + $0x59] sm:$0x1] %vm688_vm3, %v7492_v40  ;;  %4308 = vst.msk [vmem:[#allocation3 + $0x69] sm:$0x1] %vm688_vm3, %v7492_v40 }
  0x35   : > { %6784 = vmatprep.mubr.msk.f32.mxu0 %vm321_vm1, %v292_v18  ;;  %4309 = vst.msk [vmem:[#allocation3 + $0x79] sm:$0x1] %vm688_vm3, %v7492_v40  ;;  %4310 = vst.msk [vmem:[#allocation3 + $0x89] sm:$0x1] %vm688_vm3, %v7492_v40 }
  0x36   : > { %683 = vst.msk [vmem:[#allocation2 + $0x10] sm:$0x3] %vm682_vm4, %v7492_v40  ;;  %687 = vst.msk [vmem:[#allocation2 + $0x1a8] sm:$0x3] %vm682_vm4, %v7492_v40 }
  0x37   : > { %689 = vst.msk [vmem:[#allocation2] sm:$0x1] %vm688_vm3, %v7492_v40  ;;  %706 = vst.msk [vmem:[#allocation2 + $0x198] sm:$0x1] %vm688_vm3, %v7492_v40 }
  0x38   : > { %6785 = vmatmul.mubr.msk.f32.gmra.mxu0 %vm321_vm1, %v293_v19  ;;  %4291 = vst.msk [vmem:[#allocation3 + $0x98] sm:$0x3] %vm682_vm4, %v7492_v40  ;;  %4288 = vst.msk [vmem:[#allocation3 + $0x8] sm:$0x3] %vm682_vm4, %v7492_v40  ;;  %v7367_v19 = vld [vmem:[%s9453_s3 + $0x50] sm:$0xff]  }
  0x39   : > { %6787 = vmatprep.mubr.msk.f32.mxu0 %vm321_vm1, %v294_v20  ;;  %4292 = vst.msk [vmem:[#allocation3] sm:$0x1] %vm688_vm3, %v7492_v40  ;;  %4301 = vst.msk [vmem:[#allocation3 + $0x90] sm:$0x1] %vm688_vm3, %v7492_v40  ;;  %v7371_v20 = vld [vmem:[%s9453_s3 + $0x70] sm:$0xff]  }
  0x3a   : > { %707 = vst.msk [vmem:[#allocation2 + $0x11] sm:$0x1] %vm688_vm3, %v7492_v40  ;;  %724 = vst.msk [vmem:[#allocation2 + $0x1a9] sm:$0x1] %vm688_vm3, %v7492_v40 }
  0x3b   : > { %4311 = vst.msk [vmem:[#allocation3 + $0x99] sm:$0x1] %vm688_vm3, %v7492_v40  ;;  %4302 = vst.msk [vmem:[#allocation3 + $0x9] sm:$0x1] %vm688_vm3, %v7492_v40 }
  0x3c   : > { %6788 = vmatmul.mubr.msk.f32.gmra.mxu0 %vm321_vm1, %v295_v21 }
  0x3d   : > { %6790 = vmatprep.mubr.msk.f32.mxu0 %vm321_vm1, %v296_v22  ;;  %v815_v46 = vld [vmem:[#allocation2 + $0x9] sm:$0xff] }
  0x3e   : > { %v758_v47 = vld [vmem:[#allocation2] sm:$0xff]  ;;  %v846_v48 = vpack.c.bf16 %v815_v46, %v814_v45 }
  0x3f   : > { %v790_v50 = vpack.c.bf16 %v759_v49, %v758_v47  ;;  %v7369_v47 = vld [vmem:[%s9453_s3 + $0x40] sm:$0xff]  }
  0x40   : > { %6791 = vmatmul.mubr.msk.f32.gmra.mxu0 %vm321_vm1, %v297_v23  ;;  %6819 = vmatprep.mubr.msk.bf16.mxu1 %vm679_vm2, %v846_v48  ;;  %v7373_v48 = vld [vmem:[%s9453_s3 + $0x60] sm:$0xff]  }
  0x41   : > { %6793 = vmatprep.mubr.msk.f32.mxu0 %vm321_vm1, %v298_v24 }
  0x44   : > { %6794 = vmatmul.mubr.msk.f32.gmra.mxu0 %vm321_vm1, %v299_v25 }
  0x45   : > { %6796 = vmatprep.mubr.msk.f32.mxu0 %vm321_vm1, %v300_v26 }
  0x48   : > { %6797 = vmatmul.mubr.msk.f32.gmra.mxu0 %vm321_vm1, %v301_v27 }
  0x49   : > { %6799 = vmatprep.mubr.msk.f32.mxu0 %vm321_vm1, %v302_v28 }
  0x4c   : > { %6800 = vmatmul.mubr.msk.f32.gmra.mxu0 %vm321_vm1, %v303_v29 }
  0x4d   : > { %6802 = vmatprep.mubr.msk.f32.mxu0 %vm321_vm1, %v304_v30 }
  0x50   : > { %6803 = vmatmul.mubr.msk.f32.gmra.mxu0 %vm321_vm1, %v305_v31 }
  0x51   : > { %6805 = vmatprep.mubr.msk.f32.mxu0 %vm321_vm1, %v306_v32 }
  0x54   : > { %6806 = vmatmul.mubr.msk.f32.gmra.mxu0 %vm321_vm1, %v307_v33  ;;  %v7368_v33 = vld [vmem:[%s9453_s3 + $0x48] sm:$0xff]  }
  0x55   : > { %6808 = vmatprep.mubr.msk.f32.mxu0 %vm321_vm1, %v308_v34  ;;  %v7372_v34 = vld [vmem:[%s9453_s3 + $0x68] sm:$0xff]  }
  0x58   : > { %6809 = vmatmul.mubr.msk.f32.gmra.mxu0 %vm321_vm1, %v309_v35 }
  0x59   : > { %6859 = vmatprep.mubr.msk.bf16.mxu0 %vm679_vm2, %v790_v50 }
  0xdc   : > { %v6765_v54 = vpop.f32.mrf.mxu0 }
  0xdd   : > { %v494_v55 = vadd.f32 %v6765_v54, %v7835_v53 }
  0xde   : > { %v488_v56 = vpop.f32.mrf.mxu0 }
  0xdf   : > { %v648_v57 = vmax.f32 %v494_v55, 0.0  ;;  %v489_v58 = vadd.f32 %v7835_v53, %v488_v56 }
  0xe0   : > { %v6768_v59 = vpop.f32.mrf.mxu0 }
  0xe1   : > { %727 = vst.msk [vmem:[#allocation2 + $0x21] sm:$0xff] %vm679_vm2, %v648_v57  ;;  %v647_v60 = vmax.f32 %v489_v58, 0.0  ;;  %v504_v61 = vadd.f32 %v6768_v59, %v7835_v53 }
  0xe2   : > { %v498_v62 = vpop.f32.mrf.mxu0 }
  0xe3   : > { %726 = vst.msk [vmem:[#allocation2 + $0x19] sm:$0xff] %vm679_vm2, %v647_v60  ;;  %v650_v63 = vmax.f32 %v504_v61, 0.0  ;;  %v499_v0 = vadd.f32 %v7835_v53, %v498_v62  ;;  %v7912_v62 = vld [vmem:[%s9453_s3 + $0x98] sm:$0xff]  }
  0xe4   : > { %v6771_v1 = vpop.f32.mrf.mxu0 }
  0xe5   : > { %729 = vst.msk [vmem:[#allocation2 + $0x39] sm:$0xff] %vm679_vm2, %v650_v63  ;;  %v649_v2 = vmax.f32 %v499_v0, 0.0  ;;  %v514_v3 = vadd.f32 %v6771_v1, %v7835_v53  ;;  %v7917_v63 = vld [vmem:[%s9453_s3 + $0xb8] sm:$0xff]  }
  0xe6   : > { %v508_v4 = vpop.f32.mrf.mxu0 }
  0xe7   : > { %728 = vst.msk [vmem:[#allocation2 + $0x31] sm:$0xff] %vm679_vm2, %v649_v2  ;;  %v652_v5 = vmax.f32 %v514_v3, 0.0  ;;  %v509_v6 = vadd.f32 %v7835_v53, %v508_v4 }
  0xe8   : > { %v6774_v7 = vpop.f32.mrf.mxu0  ;;  %v817_v10 = vld [vmem:[#allocation2 + $0x21] sm:$0xff] }
  0xe9   : > { %731 = vst.msk [vmem:[#allocation2 + $0x51] sm:$0xff] %vm679_vm2, %v652_v5  ;;  %v651_v8 = vmax.f32 %v509_v6, 0.0  ;;  %v524_v9 = vadd.f32 %v6774_v7, %v7835_v53 }
  0xea   : > { %v518_v11 = vpop.f32.mrf.mxu0  ;;  %v816_v12 = vld [vmem:[#allocation2 + $0x19] sm:$0xff] }
  0xeb   : > { %v760_v13 = vld [vmem:[#allocation2 + $0x18] sm:$0xff]  ;;  %v761_v14 = vld [vmem:[#allocation2 + $0x20] sm:$0xff]  ;;  %730 = vst.msk [vmem:[#allocation2 + $0x49] sm:$0xff] %vm679_vm2, %v651_v8  ;;  %v654_v15 = vmax.f32 %v524_v9, 0.0  ;;  %v519_v16 = vadd.f32 %v7835_v53, %v518_v11  ;;  %v7851_v17 = vpack.c.bf16 %v817_v10, %v816_v12 }
  0xec   : > { %v7853_v18 = vpack.c.bf16 %v761_v14, %v760_v13  ;;  %v6777_v21 = vpop.f32.mrf.mxu0  ;;  %v819_v24 = vld [vmem:[#allocation2 + $0x39] sm:$0xff] }
  0xed   : > { %733 = vst.msk [vmem:[#allocation2 + $0x69] sm:$0xff] %vm679_vm2, %v654_v15  ;;  %v653_v22 = vmax.f32 %v519_v16, 0.0  ;;  %v534_v23 = vadd.f32 %v6777_v21, %v7835_v53  ;;  %6820 = vmatmul.mubr.msk.bf16.vlgmr.msra.gmra.mxu1 %vm679_vm2, %v7851_v17 }
  0xee   : > { %6860 = vmatmul.mubr.msk.bf16.vlgmr.msra.gmra.mxu0 %vm679_vm2, %v7853_v18  ;;  %6892 = vmatpush3.bf16.msra.mxu1 %v7366_v51  ;;  %v528_v25 = vpop.f32.mrf.mxu0  ;;  %v818_v26 = vld [vmem:[#allocation2 + $0x31] sm:$0xff] }
  0xef   : > { %v762_v27 = vld [vmem:[#allocation2 + $0x30] sm:$0xff]  ;;  %v763_v28 = vld [vmem:[#allocation2 + $0x38] sm:$0xff]  ;;  %6932 = vmatpush3.bf16.msra.mxu0 %v7370_v52  ;;  %732 = vst.msk [vmem:[#allocation2 + $0x61] sm:$0xff] %vm679_vm2, %v653_v22  ;;  %v656_v29 = vmax.f32 %v534_v23, 0.0  ;;  %v529_v30 = vadd.f32 %v7835_v53, %v528_v25  ;;  %v7869_v31 = vpack.c.bf16 %v819_v24, %v818_v26  ;;  %6893 = vmatprep.subr.bf16.mxu1 %v7367_v19 }
  0xf0   : > { %v7871_v32 = vpack.c.bf16 %v763_v28, %v762_v27  ;;  %6933 = vmatprep.subr.bf16.mxu0 %v7371_v20  ;;  %v6780_v35 = vpop.f32.mrf.mxu0  ;;  %v821_v38 = vld [vmem:[#allocation2 + $0x51] sm:$0xff] }
  0xf1   : > { %735 = vst.msk [vmem:[#allocation2 + $0x81] sm:$0xff] %vm679_vm2, %v656_v29  ;;  %v655_v36 = vmax.f32 %v529_v30, 0.0  ;;  %v544_v37 = vadd.f32 %v6780_v35, %v7835_v53  ;;  %6823 = vmatprep.mubr.msk.bf16.mxu1 %vm679_vm2, %v7869_v31 }
  0xf2   : > { %6863 = vmatprep.mubr.msk.bf16.mxu0 %vm679_vm2, %v7871_v32  ;;  %v538_v39 = vpop.f32.mrf.mxu0  ;;  %v820_v40 = vld [vmem:[#allocation2 + $0x49] sm:$0xff]  ;;  %6894 = vmatpush3.bf16.msra.mxu1 %v7367_v19 }
  0xf3   : > { %v764_v41 = vld [vmem:[#allocation2 + $0x48] sm:$0xff]  ;;  %v765_v42 = vld [vmem:[#allocation2 + $0x50] sm:$0xff]  ;;  %6934 = vmatpush3.bf16.msra.mxu0 %v7371_v20  ;;  %734 = vst.msk [vmem:[#allocation2 + $0x79] sm:$0xff] %vm679_vm2, %v655_v36  ;;  %v658_v43 = vmax.f32 %v544_v37, 0.0  ;;  %v539_v44 = vadd.f32 %v7835_v53, %v538_v39  ;;  %v7887_v45 = vpack.c.bf16 %v821_v38, %v820_v40  ;;  %6895 = vmatprep.subr.bf16.mxu1 %v7368_v33 }
  0xf4   : > { %v7889_v46 = vpack.c.bf16 %v765_v42, %v764_v41  ;;  %6935 = vmatprep.subr.bf16.mxu0 %v7372_v34  ;;  %v6783_v49 = vpop.f32.mrf.mxu0  ;;  %v823_v52 = vld [vmem:[#allocation2 + $0x69] sm:$0xff] }
  0xf5   : > { %737 = vst.msk [vmem:[#allocation2 + $0x99] sm:$0xff] %vm679_vm2, %v658_v43  ;;  %v657_v50 = vmax.f32 %v539_v44, 0.0  ;;  %v554_v51 = vadd.f32 %v6783_v49, %v7835_v53  ;;  %6824 = vmatmul.mubr.msk.bf16.gmra.mxu1 %vm679_vm2, %v7887_v45 }
  0xf6   : > { %6864 = vmatmul.mubr.msk.bf16.gmra.mxu0 %vm679_vm2, %v7889_v46  ;;  %v548_v54 = vpop.f32.mrf.mxu0  ;;  %v822_v55 = vld [vmem:[#allocation2 + $0x61] sm:$0xff]  ;;  %6896 = vmatpush3.bf16.msra.mxu1 %v7368_v33 }
  0xf7   : > { %v766_v56 = vld [vmem:[#allocation2 + $0x60] sm:$0xff]  ;;  %v767_v57 = vld [vmem:[#allocation2 + $0x68] sm:$0xff]  ;;  %6936 = vmatpush3.bf16.msra.mxu0 %v7372_v34  ;;  %736 = vst.msk [vmem:[#allocation2 + $0x91] sm:$0xff] %vm679_vm2, %v657_v50  ;;  %v660_v58 = vmax.f32 %v554_v51, 0.0  ;;  %v549_v59 = vadd.f32 %v7835_v53, %v548_v54  ;;  %v7905_v60 = vpack.c.bf16 %v823_v52, %v822_v55  ;;  %6897 = vmatprep.subr.bf16.mxu1 %v7369_v47 }
  0xf8   : > { %v7907_v61 = vpack.c.bf16 %v767_v57, %v766_v56  ;;  %6937 = vmatprep.subr.bf16.mxu0 %v7373_v48  ;;  %v6786_v0 = vpop.f32.mrf.mxu0  ;;  %v825_v3 = vld [vmem:[#allocation2 + $0x81] sm:$0xff] }
  0xf9   : > { %739 = vst.msk [vmem:[#allocation2 + $0xb1] sm:$0xff] %vm679_vm2, %v660_v58  ;;  %v659_v1 = vmax.f32 %v549_v59, 0.0  ;;  %v564_v2 = vadd.f32 %v6786_v0, %v7835_v53  ;;  %6827 = vmatprep.mubr.msk.bf16.mxu1 %vm679_vm2, %v7905_v60 }
  0xfa   : > { %6867 = vmatprep.mubr.msk.bf16.mxu0 %vm679_vm2, %v7907_v61  ;;  %v558_v4 = vpop.f32.mrf.mxu0  ;;  %v824_v5 = vld [vmem:[#allocation2 + $0x79] sm:$0xff]  ;;  %6898 = vmatpush3.bf16.msra.mxu1 %v7369_v47 }
  0xfb   : > { %v768_v6 = vld [vmem:[#allocation2 + $0x78] sm:$0xff]  ;;  %v769_v7 = vld [vmem:[#allocation2 + $0x80] sm:$0xff]  ;;  %6938 = vmatpush3.bf16.msra.mxu0 %v7373_v48  ;;  %738 = vst.msk [vmem:[#allocation2 + $0xa9] sm:$0xff] %vm679_vm2, %v659_v1  ;;  %v662_v8 = vmax.f32 %v564_v2, 0.0  ;;  %v559_v9 = vadd.f32 %v7835_v53, %v558_v4  ;;  %v7927_v10 = vpack.c.bf16 %v825_v3, %v824_v5  ;;  %6971 = vmatprep.subr.bf16.mxu1 %v7912_v62 }
  0xfc   : > { %v7929_v11 = vpack.c.bf16 %v769_v7, %v768_v6  ;;  %7011 = vmatprep.subr.bf16.mxu0 %v7917_v63  ;;  %v6789_v12 = vpop.f32.mrf.mxu0  ;;  %v827_v15 = vld [vmem:[#allocation2 + $0x99] sm:$0xff] }
  0xfd   : > { %741 = vst.msk [vmem:[#allocation2 + $0xc9] sm:$0xff] %vm679_vm2, %v662_v8  ;;  %v661_v13 = vmax.f32 %v559_v9, 0.0  ;;  %v574_v14 = vadd.f32 %v6789_v12, %v7835_v53  ;;  %6828 = vmatmul.mubr.msk.bf16.gmra.mxu1 %vm679_vm2, %v7927_v10 }
  0xfe   : > { %6868 = vmatmul.mubr.msk.bf16.gmra.mxu0 %vm679_vm2, %v7929_v11  ;;  %v568_v16 = vpop.f32.mrf.mxu0  ;;  %v826_v19 = vld [vmem:[#allocation2 + $0x91] sm:$0xff] }
  0xff   : > { %v770_v20 = vld [vmem:[#allocation2 + $0x90] sm:$0xff]  ;;  %v771_v21 = vld [vmem:[#allocation2 + $0x98] sm:$0xff]  ;;  %740 = vst.msk [vmem:[#allocation2 + $0xc1] sm:$0xff] %vm679_vm2, %v661_v13  ;;  %v664_v22 = vmax.f32 %v574_v14, 0.0  ;;  %v569_v23 = vadd.f32 %v7835_v53, %v568_v16  ;;  %v7941_v24 = vpack.c.bf16 %v827_v15, %v826_v19 }
 0x100   : > { %v7943_v25 = vpack.c.bf16 %v771_v21, %v770_v20  ;;  %v6792_v26 = vpop.f32.mrf.mxu0  ;;  %v829_v29 = vld [vmem:[#allocation2 + $0xb1] sm:$0xff] }
 0x101   : > { %743 = vst.msk [vmem:[#allocation2 + $0xe1] sm:$0xff] %vm679_vm2, %v664_v22  ;;  %v663_v27 = vmax.f32 %v569_v23, 0.0  ;;  %v584_v28 = vadd.f32 %v6792_v26, %v7835_v53  ;;  %6831 = vmatprep.mubr.msk.bf16.mxu1 %vm679_vm2, %v7941_v24 }
 0x102   : > { %6871 = vmatprep.mubr.msk.bf16.mxu0 %vm679_vm2, %v7943_v25  ;;  %v578_v30 = vpop.f32.mrf.mxu0  ;;  %v828_v33 = vld [vmem:[#allocation2 + $0xa9] sm:$0xff] }
 0x103   : > { %v772_v34 = vld [vmem:[#allocation2 + $0xa8] sm:$0xff]  ;;  %v773_v35 = vld [vmem:[#allocation2 + $0xb0] sm:$0xff]  ;;  %742 = vst.msk [vmem:[#allocation2 + $0xd9] sm:$0xff] %vm679_vm2, %v663_v27  ;;  %v666_v36 = vmax.f32 %v584_v28, 0.0  ;;  %v579_v37 = vadd.f32 %v7835_v53, %v578_v30  ;;  %v7953_v38 = vpack.c.bf16 %v829_v29, %v828_v33 }
 0x104   : > { %v7955_v39 = vpack.c.bf16 %v773_v35, %v772_v34  ;;  %v6795_v40 = vpop.f32.mrf.mxu0  ;;  %v831_v43 = vld [vmem:[#allocation2 + $0xc9] sm:$0xff] }
 0x105   : > { %745 = vst.msk [vmem:[#allocation2 + $0xf9] sm:$0xff] %vm679_vm2, %v666_v36  ;;  %v665_v41 = vmax.f32 %v579_v37, 0.0  ;;  %v594_v42 = vadd.f32 %v6795_v40, %v7835_v53  ;;  %6832 = vmatmul.mubr.msk.bf16.gmra.mxu1 %vm679_vm2, %v7953_v38 }
 0x106   : > { %6872 = vmatmul.mubr.msk.bf16.gmra.mxu0 %vm679_vm2, %v7955_v39  ;;  %v588_v44 = vpop.f32.mrf.mxu0  ;;  %v830_v47 = vld [vmem:[#allocation2 + $0xc1] sm:$0xff] }
 0x107   : > { %v774_v48 = vld [vmem:[#allocation2 + $0xc0] sm:$0xff]  ;;  %v775_v49 = vld [vmem:[#allocation2 + $0xc8] sm:$0xff]  ;;  %744 = vst.msk [vmem:[#allocation2 + $0xf1] sm:$0xff] %vm679_vm2, %v665_v41  ;;  %v668_v50 = vmax.f32 %v594_v42, 0.0  ;;  %v589_v51 = vadd.f32 %v7835_v53, %v588_v44  ;;  %v7965_v52 = vpack.c.bf16 %v831_v43, %v830_v47 }
 0x108   : > { %v7967_v54 = vpack.c.bf16 %v775_v49, %v774_v48  ;;  %v6798_v55 = vpop.f32.mrf.mxu0  ;;  %v833_v58 = vld [vmem:[#allocation2 + $0xe1] sm:$0xff] }
 0x109   : > { %747 = vst.msk [vmem:[#allocation2 + $0x111] sm:$0xff] %vm679_vm2, %v668_v50  ;;  %v667_v56 = vmax.f32 %v589_v51, 0.0  ;;  %v604_v57 = vadd.f32 %v6798_v55, %v7835_v53  ;;  %6835 = vmatprep.mubr.msk.bf16.mxu1 %vm679_vm2, %v7965_v52 }
 0x10a   : > { %6875 = vmatprep.mubr.msk.bf16.mxu0 %vm679_vm2, %v7967_v54  ;;  %v598_v59 = vpop.f32.mrf.mxu0  ;;  %v832_v0 = vld [vmem:[#allocation2 + $0xd9] sm:$0xff] }
 0x10b   : > { %v776_v1 = vld [vmem:[#allocation2 + $0xd8] sm:$0xff]  ;;  %v777_v2 = vld [vmem:[#allocation2 + $0xe0] sm:$0xff]  ;;  %746 = vst.msk [vmem:[#allocation2 + $0x109] sm:$0xff] %vm679_vm2, %v667_v56  ;;  %v670_v3 = vmax.f32 %v604_v57, 0.0  ;;  %v599_v4 = vadd.f32 %v7835_v53, %v598_v59  ;;  %v7977_v5 = vpack.c.bf16 %v833_v58, %v832_v0 }
 0x10c   : > { %v7979_v6 = vpack.c.bf16 %v777_v2, %v776_v1  ;;  %v6801_v7 = vpop.f32.mrf.mxu0  ;;  %v835_v12 = vld [vmem:[#allocation2 + $0xf9] sm:$0xff] }
 0x10d   : > { %749 = vst.msk [vmem:[#allocation2 + $0x129] sm:$0xff] %vm679_vm2, %v670_v3  ;;  %v669_v8 = vmax.f32 %v599_v4, 0.0  ;;  %v614_v9 = vadd.f32 %v6801_v7, %v7835_v53  ;;  %6836 = vmatmul.mubr.msk.bf16.gmra.mxu1 %vm679_vm2, %v7977_v5 }
 0x10e   : > { %6876 = vmatmul.mubr.msk.bf16.gmra.mxu0 %vm679_vm2, %v7979_v6  ;;  %v608_v13 = vpop.f32.mrf.mxu0  ;;  %v834_v14 = vld [vmem:[#allocation2 + $0xf1] sm:$0xff] }
 0x10f   : > { %v778_v15 = vld [vmem:[#allocation2 + $0xf0] sm:$0xff]  ;;  %v779_v16 = vld [vmem:[#allocation2 + $0xf8] sm:$0xff]  ;;  %748 = vst.msk [vmem:[#allocation2 + $0x121] sm:$0xff] %vm679_vm2, %v669_v8  ;;  %v672_v19 = vmax.f32 %v614_v9, 0.0  ;;  %v609_v20 = vadd.f32 %v7835_v53, %v608_v13  ;;  %v7989_v21 = vpack.c.bf16 %v835_v12, %v834_v14 }
 0x110   : > { %v7991_v22 = vpack.c.bf16 %v779_v16, %v778_v15  ;;  %v6804_v23 = vpop.f32.mrf.mxu0  ;;  %v837_v28 = vld [vmem:[#allocation2 + $0x111] sm:$0xff] }
 0x111   : > { %751 = vst.msk [vmem:[#allocation2 + $0x141] sm:$0xff] %vm679_vm2, %v672_v19  ;;  %v671_v26 = vmax.f32 %v609_v20, 0.0  ;;  %v624_v27 = vadd.f32 %v6804_v23, %v7835_v53  ;;  %6839 = vmatprep.mubr.msk.bf16.mxu1 %vm679_vm2, %v7989_v21 }
 0x112   : > { %6879 = vmatprep.mubr.msk.bf16.mxu0 %vm679_vm2, %v7991_v22  ;;  %v618_v29 = vpop.f32.mrf.mxu0  ;;  %v836_v30 = vld [vmem:[#allocation2 + $0x109] sm:$0xff] }
 0x113   : > { %v780_v33 = vld [vmem:[#allocation2 + $0x108] sm:$0xff]  ;;  %v781_v34 = vld [vmem:[#allocation2 + $0x110] sm:$0xff]  ;;  %750 = vst.msk [vmem:[#allocation2 + $0x139] sm:$0xff] %vm679_vm2, %v671_v26  ;;  %v674_v35 = vmax.f32 %v624_v27, 0.0  ;;  %v619_v36 = vadd.f32 %v7835_v53, %v618_v29  ;;  %v8001_v37 = vpack.c.bf16 %v837_v28, %v836_v30 }
 0x114   : > { %v8003_v40 = vpack.c.bf16 %v781_v34, %v780_v33  ;;  %v6807_v41 = vpop.f32.mrf.mxu0  ;;  %v839_v44 = vld [vmem:[#allocation2 + $0x129] sm:$0xff] }
 0x115   : > { %753 = vst.msk [vmem:[#allocation2 + $0x159] sm:$0xff] %vm679_vm2, %v674_v35  ;;  %v673_v42 = vmax.f32 %v619_v36, 0.0  ;;  %v634_v43 = vadd.f32 %v6807_v41, %v7835_v53  ;;  %6840 = vmatmul.mubr.msk.bf16.gmra.mxu1 %vm679_vm2, %v8001_v37  ;;  %v1337_v27 = vld [vmem:[#allocation2 + $0x2] sm:$0xff]  ;;  %v1338_v28 = vld [vmem:[#allocation2 + $0xa] sm:$0xff]  ;;  %v1339_v41 = vld [vmem:[#allocation2 + $0x1a] sm:$0xff] }
 0x116   : > { %6880 = vmatmul.mubr.msk.bf16.gmra.mxu0 %vm679_vm2, %v8003_v40  ;;  %v628_v47 = vpop.f32.mrf.mxu0  ;;  %v838_v48 = vld [vmem:[#allocation2 + $0x121] sm:$0xff]  ;;  %v1369_v34 = vpack.c.bf16 %v1338_v28, %v1337_v27 }
 0x117   : > { %v782_v49 = vld [vmem:[#allocation2 + $0x120] sm:$0xff]  ;;  %v783_v50 = vld [vmem:[#allocation2 + $0x128] sm:$0xff]  ;;  %752 = vst.msk [vmem:[#allocation2 + $0x151] sm:$0xff] %vm679_vm2, %v673_v42  ;;  %v676_v51 = vmax.f32 %v634_v43, 0.0  ;;  %v629_v55 = vadd.f32 %v7835_v53, %v628_v47  ;;  %v8013_v56 = vpack.c.bf16 %v839_v44, %v838_v48  ;;  %v1341_v42 = vld [vmem:[#allocation2 + $0x32] sm:$0xff] }
 0x118   : > { %v8015_v57 = vpack.c.bf16 %v783_v50, %v782_v49  ;;  %v6810_v58 = vpop.f32.mrf.mxu0  ;;  %v841_v0 = vld [vmem:[#allocation2 + $0x141] sm:$0xff]  ;;  %v7375_v48 = vld [vmem:[%s9453_s3 + $0x90] sm:$0xff]  }
 0x119   : > { %755 = vst.msk [vmem:[#allocation2 + $0x171] sm:$0xff] %vm679_vm2, %v676_v51  ;;  %v675_v59 = vmax.f32 %v629_v55, 0.0  ;;  %6843 = vmatprep.mubr.msk.bf16.mxu1 %vm679_vm2, %v8013_v56  ;;  %v644_v1 = vadd.f32 %v6810_v58, %v7835_v53  ;;  %v1340_v43 = vld [vmem:[#allocation2 + $0x22] sm:$0xff]  ;;  %v1342_v47 = vld [vmem:[#allocation2 + $0x3a] sm:$0xff]  ;;  %v1343_v51 = vld [vmem:[#allocation2 + $0x4a] sm:$0xff] }
 0x11a   : > { %6883 = vmatprep.mubr.msk.bf16.mxu0 %vm679_vm2, %v8015_v57  ;;  %v840_v2 = vld [vmem:[#allocation2 + $0x139] sm:$0xff]  ;;  %v638_v7 = vpop.f32.mrf.mxu0  ;;  %v8054_v44 = vpack.c.bf16 %v1340_v43, %v1339_v41  ;;  %v8059_v49 = vpack.c.bf16 %v1342_v47, %v1341_v42  ;;  %v7376_v50 = vld [vmem:[%s9453_s3 + $0x88] sm:$0xff]  }
 0x11b   : > { %v784_v3 = vld [vmem:[#allocation2 + $0x138] sm:$0xff]  ;;  %v785_v4 = vld [vmem:[#allocation2 + $0x140] sm:$0xff]  ;;  %754 = vst.msk [vmem:[#allocation2 + $0x169] sm:$0xff] %vm679_vm2, %v675_v59  ;;  %v8024_v8 = vpack.c.bf16 %v841_v0, %v840_v2  ;;  %v678_v12 = vmax.f32 %v644_v1, 0.0  ;;  %v639_v13 = vadd.f32 %v7835_v53, %v638_v7 }
 0x11c   : > { %v8026_v9 = vpack.c.bf16 %v785_v4, %v784_v3  ;;  %v843_v14 = vld [vmem:[#allocation2 + $0x159] sm:$0xff]  ;;  %v1348_v3 = vld [vmem:[#allocation2 + $0x82] sm:$0xff] }
 0x11d   : > { %6844 = vmatmul.mubr.msk.bf16.gmra.mxu1 %vm679_vm2, %v8024_v8  ;;  %757 = vst.msk [vmem:[#allocation2 + $0x189] sm:$0xff] %vm679_vm2, %v678_v12  ;;  %v677_v15 = vmax.f32 %v639_v13, 0.0  ;;  %v1344_v55 = vld [vmem:[#allocation2 + $0x52] sm:$0xff]  ;;  %v7377_v0 = vld [vmem:[%s9453_s3 + $0x80] sm:$0xff]   ;;  %v1351_v13 = vld [vmem:[#allocation2 + $0xaa] sm:$0xff] }
 0x11e   : > { %6884 = vmatmul.mubr.msk.bf16.gmra.mxu0 %vm679_vm2, %v8026_v9  ;;  %v842_v16 = vld [vmem:[#allocation2 + $0x151] sm:$0xff]  ;;  %v8077_v58 = vpack.c.bf16 %v1344_v55, %v1343_v51  ;;  %v1347_v1 = vld [vmem:[#allocation2 + $0x7a] sm:$0xff]  ;;  %v1356_v27 = vld [vmem:[#allocation2 + $0xe2] sm:$0xff] }
 0x11f   : > { %v786_v19 = vld [vmem:[#allocation2 + $0x150] sm:$0xff]  ;;  %v787_v20 = vld [vmem:[#allocation2 + $0x158] sm:$0xff]  ;;  %v8034_v23 = vpack.c.bf16 %v843_v14, %v842_v16  ;;  %756 = vst.msk [vmem:[#allocation2 + $0x181] sm:$0xff] %vm679_vm2, %v677_v15  ;;  %v8103_v4 = vpack.c.bf16 %v1348_v3, %v1347_v1  ;;  %v1353_v14 = vld [vmem:[#allocation2 + $0xc2] sm:$0xff] }
 0x120   : > { %v8036_v26 = vpack.c.bf16 %v787_v20, %v786_v19  ;;  %v845_v53 = vld [vmem:[#allocation2 + $0x171] sm:$0xff]  ;;  %v1350_v7 = vld [vmem:[#allocation2 + $0x9a] sm:$0xff]  ;;  %v1364_v42 = vld [vmem:[#allocation2 + $0x142] sm:$0xff] }
 0x121   : > { %6847 = vmatprep.mubr.msk.bf16.mxu1 %vm679_vm2, %v8034_v23  ;;  %v8101_v2 = vld [vmem:[%s9453_s3 + $0xd8] sm:$0xff]   ;;  %v1354_v19 = vld [vmem:[#allocation2 + $0xca] sm:$0xff] }
 0x122   : > { %6887 = vmatprep.mubr.msk.bf16.mxu0 %vm679_vm2, %v8036_v26  ;;  %v844_v29 = vld [vmem:[#allocation2 + $0x169] sm:$0xff]  ;;  %v1352_v15 = vld [vmem:[#allocation2 + $0xb2] sm:$0xff]  ;;  %v8124_v20 = vpack.c.bf16 %v1354_v19, %v1353_v14  ;;  %v1366_v47 = vld [vmem:[#allocation2 + $0x15a] sm:$0xff] }
 0x123   : > { %v788_v30 = vld [vmem:[#allocation2 + $0x168] sm:$0xff]  ;;  %v789_v33 = vld [vmem:[#allocation2 + $0x170] sm:$0xff]  ;;  %v8043_v35 = vpack.c.bf16 %v845_v53, %v844_v29  ;;  %v8122_v16 = vpack.c.bf16 %v1352_v15, %v1351_v13  ;;  %v1358_v53 = vld [vmem:[#allocation2 + $0xfa] sm:$0xff] }
 0x124   : > { %v8045_v36 = vpack.c.bf16 %v789_v33, %v788_v30  ;;  %v1360_v30 = vld [vmem:[#allocation2 + $0x112] sm:$0xff] }
 0x125   : > { %6848 = vmatmul.mubr.msk.bf16.gmra.mxu1 %vm679_vm2, %v8043_v35  ;;  %v1368_v51 = vld [vmem:[#allocation2 + $0x172] sm:$0xff] }
 0x126   : > { %6888 = vmatmul.mubr.msk.bf16.gmra.mxu0 %vm679_vm2, %v8045_v36  ;;  %6899 = vmatprep.mubr.msk.bf16.mxu1 %vm679_vm2, %v1369_v34  ;;  %v1362_v34 = vld [vmem:[#allocation2 + $0x12a] sm:$0xff] }
 0x127   : > { %6939 = vmatprep.mubr.msk.bf16.mxu0 %vm679_vm2, %v7853_v18  ;;  %v7379_v18 = vld [vmem:[%s9453_s3 + $0xb0] sm:$0xff]  }
 0x12d   : > { %6900 = vmatmul.mubr.msk.bf16.vlgmr.msra.gmra.mxu1 %vm679_vm2, %v8054_v44 }
 0x12e   : > { %6940 = vmatmul.mubr.msk.bf16.vlgmr.msra.gmra.mxu0 %vm679_vm2, %v7871_v32  ;;  %6972 = vmatpush3.bf16.msra.mxu1 %v7912_v62  ;;  %v1345_v32 = vld [vmem:[#allocation2 + $0x62] sm:$0xff]  ;;  %v1346_v62 = vld [vmem:[#allocation2 + $0x6a] sm:$0xff] }
 0x12f   : > { %6903 = vmatprep.mubr.msk.bf16.mxu1 %vm679_vm2, %v8059_v49  ;;  %6943 = vmatprep.mubr.msk.bf16.mxu0 %vm679_vm2, %v7889_v46  ;;  %v7380_v46 = vld [vmem:[%s9453_s3 + $0xa8] sm:$0xff]   ;;  %v8082_v59 = vpack.c.bf16 %v1346_v62, %v1345_v32 }
 0x130   : > { %6973 = vmatprep.subr.bf16.mxu1 %v7375_v48  ;;  %7012 = vmatpush3.bf16.msra.mxu0 %v7917_v63  ;;  %v7381_v63 = vld [vmem:[%s9453_s3 + $0xa0] sm:$0xff]   ;;  %v2950_v62 = vld [vmem:[#allocation2 + $0x49] sm:$0xff] }
 0x131   : > { %7013 = vmatprep.subr.bf16.mxu0 %v7379_v18 }
 0x132   : > { %6974 = vmatpush3.bf16.msra.mxu1 %v7375_v48 }
 0x133   : > { %6975 = vmatprep.subr.bf16.mxu1 %v7376_v50 }
 0x134   : > { %7014 = vmatpush3.bf16.msra.mxu0 %v7379_v18  ;;  %v1690_v18 = vld [vmem:[#allocation2 + $0x188] sm:$0xff] }
 0x135   : > { %6904 = vmatmul.mubr.msk.bf16.gmra.mxu1 %vm679_vm2, %v8077_v58  ;;  %7015 = vmatprep.subr.bf16.mxu0 %v7380_v46 }
 0x136   : > { %6944 = vmatmul.mubr.msk.bf16.gmra.mxu0 %vm679_vm2, %v7907_v61  ;;  %6907 = vmatprep.mubr.msk.bf16.mxu1 %vm679_vm2, %v8082_v59  ;;  %v1349_v61 = vld [vmem:[#allocation2 + $0x92] sm:$0xff] }
 0x137   : > { %6947 = vmatprep.mubr.msk.bf16.mxu0 %vm679_vm2, %v7929_v11  ;;  %6976 = vmatpush3.bf16.msra.mxu1 %v7376_v50  ;;  %v8108_v11 = vld [vmem:[%s9453_s3 + $0xf8] sm:$0xff]   ;;  %v8110_v12 = vpack.c.bf16 %v1350_v7, %v1349_v61  ;;  %v1367_v50 = vld [vmem:[#allocation2 + $0x16a] sm:$0xff] }
 0x138   : > { %6977 = vmatprep.subr.bf16.mxu1 %v7377_v0  ;;  %7016 = vmatpush3.bf16.msra.mxu0 %v7380_v46  ;;  %v1384_v32 = vpack.c.bf16 %v1368_v51, %v1367_v50  ;;  %v2630_v46 = vld [vmem:[#allocation2 + $0x60] sm:$0xff]  ;;  %v7391_v61 = vld [vmem:[%s9453_s3 + $0x110] sm:$0xff]  }
 0x139   : > { %7017 = vmatprep.subr.bf16.mxu0 %v7381_v63 }
 0x13b   : > { %6978 = vmatpush3.bf16.msra.mxu1 %v7377_v0  ;;  %v2951_v0 = vld [vmem:[#allocation2 + $0x51] sm:$0xff] }
 0x13c   : > { %7018 = vmatpush3.bf16.msra.mxu0 %v7381_v63  ;;  %7051 = vmatprep.subr.bf16.mxu1 %v8101_v2  ;;  %v2952_v63 = vld [vmem:[#allocation2 + $0x61] sm:$0xff] }
 0x13d   : > { %6908 = vmatmul.mubr.msk.bf16.gmra.mxu1 %vm679_vm2, %v8103_v4  ;;  %7091 = vmatprep.subr.bf16.mxu0 %v8108_v11 }
 0x13e   : > { %6948 = vmatmul.mubr.msk.bf16.gmra.mxu0 %vm679_vm2, %v7943_v25  ;;  %6911 = vmatprep.mubr.msk.bf16.mxu1 %vm679_vm2, %v8110_v12  ;;  %v1355_v25 = vld [vmem:[#allocation2 + $0xda] sm:$0xff] }
 0x13f   : > { %6951 = vmatprep.mubr.msk.bf16.mxu0 %vm679_vm2, %v7955_v39  ;;  %v1357_v39 = vld [vmem:[#allocation2 + $0xf2] sm:$0xff]  ;;  %v8134_v28 = vpack.c.bf16 %v1356_v27, %v1355_v25  ;;  %v2633_v25 = vld [vmem:[#allocation2 + $0x80] sm:$0xff] }
 0x140   : > { %v8136_v29 = vpack.c.bf16 %v1358_v53, %v1357_v39  ;;  %v2954_v39 = vld [vmem:[#allocation2 + $0x79] sm:$0xff]  ;;  %v2634_v53 = vld [vmem:[#allocation2 + $0x90] sm:$0xff] }
 0x145   : > { %6912 = vmatmul.mubr.msk.bf16.gmra.mxu1 %vm679_vm2, %v8122_v16 }
 0x146   : > { %6952 = vmatmul.mubr.msk.bf16.gmra.mxu0 %vm679_vm2, %v7967_v54  ;;  %6915 = vmatprep.mubr.msk.bf16.mxu1 %vm679_vm2, %v8124_v20  ;;  %v1359_v54 = vld [vmem:[#allocation2 + $0x10a] sm:$0xff] }
 0x147   : > { %6955 = vmatprep.mubr.msk.bf16.mxu0 %vm679_vm2, %v7979_v6  ;;  %v1361_v6 = vld [vmem:[#allocation2 + $0x122] sm:$0xff]  ;;  %v8146_v33 = vpack.c.bf16 %v1360_v30, %v1359_v54  ;;  %v2956_v54 = vld [vmem:[#allocation2 + $0x91] sm:$0xff] }
 0x148   : > { %v8148_v41 = vpack.c.bf16 %v1362_v34, %v1361_v6  ;;  %v2955_v30 = vld [vmem:[#allocation2 + $0x81] sm:$0xff] }
 0x14d   : > { %6916 = vmatmul.mubr.msk.bf16.gmra.mxu1 %vm679_vm2, %v8134_v28 }
 0x14e   : > { %6956 = vmatmul.mubr.msk.bf16.gmra.mxu0 %vm679_vm2, %v7991_v22  ;;  %6919 = vmatprep.mubr.msk.bf16.mxu1 %vm679_vm2, %v8136_v29  ;;  %v1363_v22 = vld [vmem:[#allocation2 + $0x13a] sm:$0xff] }
 0x14f   : > { %6959 = vmatprep.mubr.msk.bf16.mxu0 %vm679_vm2, %v8003_v40  ;;  %v1365_v40 = vld [vmem:[#allocation2 + $0x152] sm:$0xff]  ;;  %v1382_v43 = vpack.c.bf16 %v1364_v42, %v1363_v22  ;;  %v2983_v22 = vpack.c.bf16 %v2955_v30, %v2954_v39 }
 0x150   : > { %v1383_v48 = vpack.c.bf16 %v1366_v47, %v1365_v40  ;;  %v2957_v40 = vld [vmem:[#allocation2 + $0x99] sm:$0xff] }
 0x151   : > { %v2984_v47 = vpack.c.bf16 %v2957_v40, %v2956_v54 }
 0x155   : > { %6920 = vmatmul.mubr.msk.bf16.gmra.mxu1 %vm679_vm2, %v8146_v33 }
 0x156   : > { %6960 = vmatmul.mubr.msk.bf16.gmra.mxu0 %vm679_vm2, %v8015_v57  ;;  %6923 = vmatprep.mubr.msk.bf16.mxu1 %vm679_vm2, %v8148_v41  ;;  %v1689_v57 = vld [vmem:[#allocation2 + $0x180] sm:$0xff] }
 0x157   : > { %6963 = vmatprep.mubr.msk.bf16.mxu0 %vm679_vm2, %v8026_v9  ;;  %v8164_v9 = vpack.c.bf16 %v1690_v18, %v1689_v57 }
 0x15d   : > { %6924 = vmatmul.mubr.msk.bf16.gmra.mxu1 %vm679_vm2, %v1382_v43 }
 0x15e   : > { %6964 = vmatmul.mubr.msk.bf16.gmra.mxu0 %vm679_vm2, %v8036_v26  ;;  %6927 = vmatprep.mubr.msk.bf16.mxu1 %vm679_vm2, %v1383_v48  ;;  %v7383_v26 = vld [vmem:[%s9453_s3 + $0xd0] sm:$0xff]  }
 0x15f   : > { %6967 = vmatprep.mubr.msk.bf16.mxu0 %vm679_vm2, %v8045_v36  ;;  %v7387_v36 = vld [vmem:[%s9453_s3 + $0xf0] sm:$0xff]  }
 0x165   : > { %6928 = vmatmul.mubr.msk.bf16.gmra.mxu1 %vm679_vm2, %v1384_v32 }
 0x166   : > { %6968 = vmatmul.mubr.msk.bf16.gmra.mxu0 %vm679_vm2, %v8164_v9  ;;  %6979 = vmatprep.mubr.msk.bf16.mxu1 %vm679_vm2, %v7851_v17  ;;  %v7384_v17 = vld [vmem:[%s9453_s3 + $0xc8] sm:$0xff]  }
 0x167   : > { %7019 = vmatprep.mubr.msk.bf16.mxu0 %vm679_vm2, %v8054_v44  ;;  %v7389_v44 = vld [vmem:[%s9453_s3 + $0xe0] sm:$0xff]  }
 0x16d   : > { %6980 = vmatmul.mubr.msk.bf16.vlgmr.msra.gmra.mxu1 %vm679_vm2, %v7869_v31  ;;  %v7388_v31 = vld [vmem:[%s9453_s3 + $0xe8] sm:$0xff]  }
 0x16e   : > { %7020 = vmatmul.mubr.msk.bf16.vlgmr.msra.gmra.mxu0 %vm679_vm2, %v8059_v49  ;;  %7052 = vmatpush3.bf16.msra.mxu1 %v8101_v2  ;;  %v2949_v49 = vld [vmem:[#allocation2 + $0x39] sm:$0xff]  ;;  %v2981_v2 = vpack.c.bf16 %v2951_v0, %v2950_v62 }
 0x16f   : > { %6983 = vmatprep.mubr.msk.bf16.mxu1 %vm679_vm2, %v7887_v45  ;;  %7023 = vmatprep.mubr.msk.bf16.mxu0 %vm679_vm2, %v8077_v58  ;;  %v7385_v45 = vld [vmem:[%s9453_s3 + $0xc0] sm:$0xff]   ;;  %v2629_v58 = vld [vmem:[#allocation2 + $0x50] sm:$0xff] }
 0x170   : > { %7053 = vmatprep.subr.bf16.mxu1 %v7383_v26  ;;  %7092 = vmatpush3.bf16.msra.mxu0 %v8108_v11 }
 0x171   : > { %7093 = vmatprep.subr.bf16.mxu0 %v7387_v36 }
 0x172   : > { %7054 = vmatpush3.bf16.msra.mxu1 %v7383_v26 }
 0x173   : > { %7055 = vmatprep.subr.bf16.mxu1 %v7384_v17 }
 0x174   : > { %7094 = vmatpush3.bf16.msra.mxu0 %v7387_v36  ;;  %v2636_v36 = vld [vmem:[#allocation2 + $0xa8] sm:$0xff] }
 0x175   : > { %6984 = vmatmul.mubr.msk.bf16.gmra.mxu1 %vm679_vm2, %v7905_v60  ;;  %7095 = vmatprep.subr.bf16.mxu0 %v7388_v31  ;;  %v7390_v60 = vld [vmem:[%s9453_s3 + $0x118] sm:$0xff]  }
 0x176   : > { %7024 = vmatmul.mubr.msk.bf16.gmra.mxu0 %vm679_vm2, %v8082_v59  ;;  %6987 = vmatprep.mubr.msk.bf16.mxu1 %vm679_vm2, %v7927_v10  ;;  %v2012_v10 = vld [vmem:[#allocation2 + $0x189] sm:$0xff] }
 0x177   : > { %7027 = vmatprep.mubr.msk.bf16.mxu0 %vm679_vm2, %v8103_v4  ;;  %7056 = vmatpush3.bf16.msra.mxu1 %v7384_v17  ;;  %v2631_v59 = vld [vmem:[#allocation2 + $0x68] sm:$0xff]  ;;  %v2637_v17 = vld [vmem:[#allocation2 + $0xb0] sm:$0xff] }
 0x178   : > { %7057 = vmatprep.subr.bf16.mxu1 %v7385_v45  ;;  %7096 = vmatpush3.bf16.msra.mxu0 %v7388_v31  ;;  %v2660_v3 = vpack.c.bf16 %v2631_v59, %v2630_v46  ;;  %v2953_v4 = vld [vmem:[#allocation2 + $0x69] sm:$0xff] }
 0x179   : > { %7097 = vmatprep.subr.bf16.mxu0 %v7389_v44  ;;  %v2958_v31 = vld [vmem:[#allocation2 + $0xa9] sm:$0xff] }
 0x17b   : > { %7058 = vmatpush3.bf16.msra.mxu1 %v7385_v45 }
 0x17c   : > { %7098 = vmatpush3.bf16.msra.mxu0 %v7389_v44  ;;  %7131 = vmatprep.subr.bf16.mxu1 %v7390_v60 }
 0x17d   : > { %6988 = vmatmul.mubr.msk.bf16.gmra.mxu1 %vm679_vm2, %v7941_v24  ;;  %v2011_v24 = vld [vmem:[#allocation2 + $0x181] sm:$0xff] }
 0x17e   : > { %7028 = vmatmul.mubr.msk.bf16.gmra.mxu0 %vm679_vm2, %v8110_v12  ;;  %6991 = vmatprep.mubr.msk.bf16.mxu1 %vm679_vm2, %v7953_v38  ;;  %v2333_v38 = vld [vmem:[#allocation2 + $0x182] sm:$0xff]  ;;  %v2982_v12 = vpack.c.bf16 %v2953_v4, %v2952_v63 }
 0x17f   : > { %7031 = vmatprep.mubr.msk.bf16.mxu0 %vm679_vm2, %v8122_v16  ;;  %v7392_v16 = vld [vmem:[%s9453_s3 + $0x108] sm:$0xff]  }
 0x185   : > { %6992 = vmatmul.mubr.msk.bf16.gmra.mxu1 %vm679_vm2, %v7965_v52  ;;  %v2334_v52 = vld [vmem:[#allocation2 + $0x18a] sm:$0xff] }
 0x186   : > { %7032 = vmatmul.mubr.msk.bf16.gmra.mxu0 %vm679_vm2, %v8124_v20  ;;  %6995 = vmatprep.mubr.msk.bf16.mxu1 %vm679_vm2, %v7977_v5  ;;  %v2626_v5 = vld [vmem:[#allocation2 + $0x30] sm:$0xff]  ;;  %v2632_v20 = vld [vmem:[#allocation2 + $0x78] sm:$0xff] }
 0x187   : > { %7035 = vmatprep.mubr.msk.bf16.mxu0 %vm679_vm2, %v8134_v28 }
 0x18d   : > { %6996 = vmatmul.mubr.msk.bf16.gmra.mxu1 %vm679_vm2, %v7989_v21  ;;  %v2627_v21 = vld [vmem:[#allocation2 + $0x38] sm:$0xff] }
 0x18e   : > { %7036 = vmatmul.mubr.msk.bf16.gmra.mxu0 %vm679_vm2, %v8136_v29  ;;  %6999 = vmatprep.mubr.msk.bf16.mxu1 %vm679_vm2, %v8001_v37  ;;  %v2948_v37 = vld [vmem:[#allocation2 + $0x31] sm:$0xff] }
 0x18f   : > { %7039 = vmatprep.mubr.msk.bf16.mxu0 %vm679_vm2, %v8146_v33  ;;  %v2980_v55 = vpack.c.bf16 %v2949_v49, %v2948_v37  ;;  %v2635_v29 = vld [vmem:[#allocation2 + $0x98] sm:$0xff]  ;;  %v2663_v37 = vpack.c.bf16 %v2637_v17, %v2636_v36  ;;  %v2968_v36 = vld [vmem:[#allocation2 + $0x121] sm:$0xff] }
 0x195   : > { %7000 = vmatmul.mubr.msk.bf16.gmra.mxu1 %vm679_vm2, %v8013_v56  ;;  %v8249_v56 = vpack.c.bf16 %v2012_v10, %v2011_v24  ;;  %v2639_v10 = vld [vmem:[#allocation2 + $0xc8] sm:$0xff] }
 0x196   : > { %7040 = vmatmul.mubr.msk.bf16.gmra.mxu0 %vm679_vm2, %v8148_v41  ;;  %7003 = vmatprep.mubr.msk.bf16.mxu1 %vm679_vm2, %v8024_v8  ;;  %v8251_v8 = vpack.c.bf16 %v2334_v52, %v2333_v38  ;;  %v2661_v41 = vpack.c.bf16 %v2633_v25, %v2632_v20  ;;  %v2960_v24 = vld [vmem:[#allocation2 + $0xc1] sm:$0xff]  ;;  %v2959_v52 = vld [vmem:[#allocation2 + $0xb1] sm:$0xff] }
 0x197   : > { %7043 = vmatprep.mubr.msk.bf16.mxu0 %vm679_vm2, %v1382_v43  ;;  %v2662_v43 = vpack.c.bf16 %v2635_v29, %v2634_v53  ;;  %v2985_v49 = vpack.c.bf16 %v2959_v52, %v2958_v31  ;;  %v2967_v31 = vld [vmem:[#allocation2 + $0x111] sm:$0xff] }
 0x19d   : > { %7004 = vmatmul.mubr.msk.bf16.gmra.mxu1 %vm679_vm2, %v8034_v23  ;;  %v2658_v23 = vpack.c.bf16 %v2627_v21, %v2626_v5 }
 0x19e   : > { %7044 = vmatmul.mubr.msk.bf16.gmra.mxu0 %vm679_vm2, %v1383_v48  ;;  %7007 = vmatprep.mubr.msk.bf16.mxu1 %vm679_vm2, %v8043_v35  ;;  %v2628_v35 = vld [vmem:[#allocation2 + $0x48] sm:$0xff]  ;;  %v7393_v48 = vld [vmem:[%s9453_s3 + $0x100] sm:$0xff]  }
 0x19f   : > { %7047 = vmatprep.mubr.msk.bf16.mxu0 %vm679_vm2, %v1384_v32  ;;  %v2659_v1 = vpack.c.bf16 %v2629_v58, %v2628_v35 }
 0x1a5   : > { %7008 = vmatmul.mubr.msk.bf16.gmra.mxu1 %vm679_vm2, %v8249_v56 }
 0x1a6   : > { %7048 = vmatmul.mubr.msk.bf16.gmra.mxu0 %vm679_vm2, %v8251_v8  ;;  %7059 = vmatprep.mubr.msk.bf16.mxu1 %vm679_vm2, %v2658_v23  ;;  %v2961_v23 = vld [vmem:[#allocation2 + $0xc9] sm:$0xff] }
 0x1a7   : > { %7099 = vmatprep.mubr.msk.bf16.mxu0 %vm679_vm2, %v2980_v55  ;;  %v2986_v58 = vpack.c.bf16 %v2961_v23, %v2960_v24  ;;  %v2969_v24 = vld [vmem:[#allocation2 + $0x129] sm:$0xff] }
 0x1ad   : > { %v6821_v7 = vpop.f32.mrf.mxu1  ;;  %7060 = vmatmul.mubr.msk.bf16.vlgmr.msra.gmra.mxu1 %vm679_vm2, %v2659_v1 }
 0x1ae   : > { %v6861_v11 = vpop.f32.mrf.mxu0  ;;  %7100 = vmatmul.mubr.msk.bf16.vlgmr.msra.gmra.mxu0 %vm679_vm2, %v2981_v2  ;;  %7132 = vmatpush3.bf16.msra.mxu1 %v7390_v60  ;;  %v2638_v60 = vld [vmem:[#allocation2 + $0xc0] sm:$0xff]  ;;  %v2640_v2 = vld [vmem:[#allocation2 + $0xd8] sm:$0xff] }
 0x1af   : > { %v8264_v13 = vadd.f32 %v6861_v11, %v6821_v7  ;;  %7063 = vmatprep.mubr.msk.bf16.mxu1 %vm679_vm2, %v2660_v3  ;;  %7103 = vmatprep.mubr.msk.bf16.mxu0 %vm679_vm2, %v2982_v12  ;;  %v977_v14 = vpop.f32.mrf.mxu1  ;;  %v2664_v35 = vpack.c.bf16 %v2639_v10, %v2638_v60  ;;  %v2962_v3 = vld [vmem:[#allocation2 + $0xd9] sm:$0xff]  ;;  %v2642_v11 = vld [vmem:[#allocation2 + $0xf0] sm:$0xff] }
 0x1b0   : > { %v1210_v15 = vpop.f32.mrf.mxu0  ;;  %7133 = vmatprep.subr.bf16.mxu1 %v7391_v61  ;;  %v2643_v12 = vld [vmem:[#allocation2 + $0xf8] sm:$0xff] }
 0x1b1   : > { %v8271_v19 = vadd.f32 %v1210_v15, %v977_v14  ;;  %v6822_v27 = vpop.f32.mrf.mxu1  ;;  %v2964_v14 = vld [vmem:[#allocation2 + $0xf1] sm:$0xff]  ;;  %v2666_v29 = vpack.c.bf16 %v2643_v12, %v2642_v11  ;;  %v2971_v12 = vld [vmem:[#allocation2 + $0x141] sm:$0xff] }
 0x1b2   : > { %v6862_v28 = vpop.f32.mrf.mxu0  ;;  %7134 = vmatpush3.bf16.msra.mxu1 %v7391_v61  ;;  %v2641_v61 = vld [vmem:[#allocation2 + $0xe0] sm:$0xff] }
 0x1b3   : > { %v8273_v6 = vadd.f32 %v6862_v28, %v6822_v27  ;;  %v980_v33 = vpop.f32.mrf.mxu1  ;;  %7135 = vmatprep.subr.bf16.mxu1 %v7392_v16  ;;  %v2665_v39 = vpack.c.bf16 %v2641_v61, %v2640_v2  ;;  %v2965_v28 = vld [vmem:[#allocation2 + $0xf9] sm:$0xff] }
 0x1b4   : > { %v1213_v34 = vpop.f32.mrf.mxu0  ;;  %v2988_v54 = vpack.c.bf16 %v2965_v28, %v2964_v14 }
 0x1b5   : > { %v8275_v42 = vadd.f32 %v1213_v34, %v980_v33  ;;  %v6825_v57 = vpop.f32.mrf.mxu1  ;;  %7064 = vmatmul.mubr.msk.bf16.gmra.mxu1 %vm679_vm2, %v2661_v41 }
 0x1b6   : > { %v6865_v18 = vpop.f32.mrf.mxu0  ;;  %7104 = vmatmul.mubr.msk.bf16.gmra.mxu0 %vm679_vm2, %v2983_v22  ;;  %7067 = vmatprep.mubr.msk.bf16.mxu1 %vm679_vm2, %v2662_v43  ;;  %v2644_v43 = vld [vmem:[#allocation2 + $0x108] sm:$0xff] }
 0x1b7   : > { %v8282_v50 = vadd.f32 %v6865_v18, %v6825_v57  ;;  %7107 = vmatprep.mubr.msk.bf16.mxu0 %vm679_vm2, %v2984_v47  ;;  %v993_v51 = vpop.f32.mrf.mxu1  ;;  %7136 = vmatpush3.bf16.msra.mxu1 %v7392_v16  ;;  %v2963_v16 = vld [vmem:[#allocation2 + $0xe1] sm:$0xff]  ;;  %v2645_v47 = vld [vmem:[#allocation2 + $0x110] sm:$0xff] }
 0x1b8   : > { %v1226_v32 = vpop.f32.mrf.mxu0  ;;  %7137 = vmatprep.subr.bf16.mxu1 %v7393_v48  ;;  %v2987_v27 = vpack.c.bf16 %v2963_v16, %v2962_v3  ;;  %v2667_v60 = vpack.c.bf16 %v2645_v47, %v2644_v43  ;;  %v2650_v3 = vld [vmem:[#allocation2 + $0x150] sm:$0xff]  ;;  %v2652_v43 = vld [vmem:[#allocation2 + $0x168] sm:$0xff] }
 0x1b9   : > { %v8286_v26 = vadd.f32 %v1226_v32, %v993_v51  ;;  %v6826_v45 = vpop.f32.mrf.mxu1  ;;  %v2646_v51 = vld [vmem:[#allocation2 + $0x120] sm:$0xff]  ;;  %v2647_v32 = vld [vmem:[#allocation2 + $0x128] sm:$0xff]  ;;  %v2653_v47 = vld [vmem:[#allocation2 + $0x170] sm:$0xff] }
 0x1ba   : > { %v6866_v44 = vpop.f32.mrf.mxu0 }
 0x1bb   : > { %v8288_v38 = vadd.f32 %v6866_v44, %v6826_v45  ;;  %v996_v5 = vpop.f32.mrf.mxu1  ;;  %7138 = vmatpush3.bf16.msra.mxu1 %v7393_v48  ;;  %v2966_v48 = vld [vmem:[#allocation2 + $0x109] sm:$0xff] }
 0x1bc   : > { %v1229_v21 = vpop.f32.mrf.mxu0  ;;  %v2989_v10 = vpack.c.bf16 %v2967_v31, %v2966_v48  ;;  %v2974_v48 = vld [vmem:[#allocation2 + $0x169] sm:$0xff] }
 0x1bd   : > { %v8290_v55 = vadd.f32 %v1229_v21, %v996_v5  ;;  %v6829_v62 = vpop.f32.mrf.mxu1  ;;  %7068 = vmatmul.mubr.msk.bf16.gmra.mxu1 %vm679_vm2, %v2663_v37  ;;  %v2668_v5 = vpack.c.bf16 %v2647_v32, %v2646_v51  ;;  %v2990_v21 = vpack.c.bf16 %v2969_v24, %v2968_v36  ;;  %v2975_v32 = vld [vmem:[#allocation2 + $0x171] sm:$0xff] }
 0x1be   : > { %v6869_v46 = vpop.f32.mrf.mxu0  ;;  %7108 = vmatmul.mubr.msk.bf16.gmra.mxu0 %vm679_vm2, %v2985_v49  ;;  %7071 = vmatprep.mubr.msk.bf16.mxu1 %vm679_vm2, %v2664_v35  ;;  %v2656_v24 = vld [vmem:[#allocation2 + $0x198] sm:$0xff] }
 0x1bf   : > { %v8294_v59 = vadd.f32 %v6869_v46, %v6829_v62  ;;  %7111 = vmatprep.mubr.msk.bf16.mxu0 %vm679_vm2, %v2986_v58  ;;  %v1009_v0 = vpop.f32.mrf.mxu1  ;;  %v2648_v46 = vld [vmem:[#allocation2 + $0x138] sm:$0xff] }
 0x1c0   : > { %v1242_v63 = vpop.f32.mrf.mxu0 }
 0x1c1   : > { %v8298_v1 = vadd.f32 %v1242_v63, %v1009_v0  ;;  %v6830_v4 = vpop.f32.mrf.mxu1  ;;  %v2649_v0 = vld [vmem:[#allocation2 + $0x140] sm:$0xff] }
 0x1c2   : > { %v6870_v7 = vpop.f32.mrf.mxu0  ;;  %v2970_v63 = vld [vmem:[#allocation2 + $0x139] sm:$0xff] }
 0x1c3   : > { %v8300_v15 = vadd.f32 %v6870_v7, %v6830_v4  ;;  %v1012_v20 = vpop.f32.mrf.mxu1  ;;  %v2651_v4 = vld [vmem:[#allocation2 + $0x158] sm:$0xff] }
 0x1c4   : > { %v1245_v25 = vpop.f32.mrf.mxu0  ;;  %v2972_v7 = vld [vmem:[#allocation2 + $0x151] sm:$0xff] }
 0x1c5   : > { %v8302_v53 = vadd.f32 %v1245_v25, %v1012_v20  ;;  %v6833_v30 = vpop.f32.mrf.mxu1  ;;  %7072 = vmatmul.mubr.msk.bf16.gmra.mxu1 %vm679_vm2, %v2665_v39  ;;  %v2669_v20 = vpack.c.bf16 %v2649_v0, %v2648_v46  ;;  %v2991_v25 = vpack.c.bf16 %v2971_v12, %v2970_v63  ;;  %v2973_v39 = vld [vmem:[#allocation2 + $0x159] sm:$0xff] }
 0x1c6   : > { %v6873_v33 = vpop.f32.mrf.mxu0  ;;  %7112 = vmatmul.mubr.msk.bf16.gmra.mxu0 %vm679_vm2, %v2987_v27  ;;  %7075 = vmatprep.mubr.msk.bf16.mxu1 %vm679_vm2, %v2666_v29  ;;  %v2670_v27 = vpack.c.bf16 %v2651_v4, %v2650_v3  ;;  %v2992_v28 = vpack.c.bf16 %v2973_v39, %v2972_v7  ;;  %v3271_v12 = vld [vmem:[#allocation2 + $0x3a] sm:$0xff] }
 0x1c7   : > { %v8306_v34 = vadd.f32 %v6873_v33, %v6833_v30  ;;  %7115 = vmatprep.mubr.msk.bf16.mxu0 %vm679_vm2, %v2988_v54  ;;  %v1025_v41 = vpop.f32.mrf.mxu1 }
 0x1c8   : > { %v1258_v22 = vpop.f32.mrf.mxu0 }
 0x1c9   : > { %v8310_v40 = vadd.f32 %v1258_v22, %v1025_v41  ;;  %v6834_v57 = vpop.f32.mrf.mxu1 }
 0x1ca   : > { %v6874_v18 = vpop.f32.mrf.mxu0 }
 0x1cb   : > { %v8312_v17 = vadd.f32 %v6874_v18, %v6834_v57  ;;  %v1028_v45 = vpop.f32.mrf.mxu1 }
 0x1cc   : > { %v1261_v44 = vpop.f32.mrf.mxu0 }
 0x1cd   : > { %v8314_v52 = vadd.f32 %v1261_v44, %v1028_v45  ;;  %v6837_v37 = vpop.f32.mrf.mxu1  ;;  %7076 = vmatmul.mubr.msk.bf16.gmra.mxu1 %vm679_vm2, %v2667_v60  ;;  %v2671_v45 = vpack.c.bf16 %v2653_v47, %v2652_v43  ;;  %v2993_v44 = vpack.c.bf16 %v2975_v32, %v2974_v48  ;;  %v3274_v43 = vld [vmem:[#allocation2 + $0x62] sm:$0xff]  ;;  %v3273_v48 = vld [vmem:[#allocation2 + $0x52] sm:$0xff] }
 0x1ce   : > { %v6877_v49 = vpop.f32.mrf.mxu0  ;;  %7116 = vmatmul.mubr.msk.bf16.gmra.mxu0 %vm679_vm2, %v2989_v10  ;;  %7079 = vmatprep.mubr.msk.bf16.mxu1 %vm679_vm2, %v2668_v5 }
 0x1cf   : > { %v8318_v23 = vadd.f32 %v6877_v49, %v6837_v37  ;;  %7119 = vmatprep.mubr.msk.bf16.mxu0 %vm679_vm2, %v2990_v21  ;;  %v1041_v35 = vpop.f32.mrf.mxu1  ;;  %v2657_v21 = vld [vmem:[#allocation2 + $0x1a0] sm:$0xff] }
 0x1d0   : > { %v1274_v58 = vpop.f32.mrf.mxu0  ;;  %v2978_v37 = vld [vmem:[#allocation2 + $0x199] sm:$0xff]  ;;  %v2979_v49 = vld [vmem:[#allocation2 + $0x1a1] sm:$0xff] }
 0x1d1   : > { %v8322_v62 = vadd.f32 %v1274_v58, %v1041_v35  ;;  %v6838_v2 = vpop.f32.mrf.mxu1  ;;  %v2995_v3 = vpack.c.bf16 %v2979_v49, %v2978_v37 }
 0x1d2   : > { %v6878_v61 = vpop.f32.mrf.mxu0 }
 0x1d3   : > { %v8324_v11 = vadd.f32 %v6878_v61, %v6838_v2  ;;  %v8326_v14 = vpop.f32.mrf.mxu1  ;;  %v2673_v2 = vpack.c.bf16 %v2657_v21, %v2656_v24  ;;  %v3270_v61 = vld [vmem:[#allocation2 + $0x32] sm:$0xff] }
 0x1d4   : > { %v8328_v16 = vpop.f32.mrf.mxu0 }
 0x1d5   : > { %v6841_v29 = vpop.f32.mrf.mxu1  ;;  %7080 = vmatmul.mubr.msk.bf16.gmra.mxu1 %vm679_vm2, %v2669_v20 }
 0x1d6   : > { %v6881_v54 = vpop.f32.mrf.mxu0  ;;  %7120 = vmatmul.mubr.msk.bf16.gmra.mxu0 %vm679_vm2, %v2991_v25  ;;  %7083 = vmatprep.mubr.msk.bf16.mxu1 %vm679_vm2, %v2670_v27 }
 0x1d7   : > { %v8332_v30 = vadd.f32 %v6881_v54, %v6841_v29  ;;  %7123 = vmatprep.mubr.msk.bf16.mxu0 %vm679_vm2, %v2992_v28  ;;  %v1057_v33 = vpop.f32.mrf.mxu1  ;;  %v3272_v54 = vld [vmem:[#allocation2 + $0x4a] sm:$0xff] }
 0x1d8   : > { %v1290_v41 = vpop.f32.mrf.mxu0  ;;  %v3303_v32 = vpack.c.bf16 %v3273_v48, %v3272_v54 }
 0x1d9   : > { %v8336_v22 = vadd.f32 %v1290_v41, %v1057_v33  ;;  %v6842_v57 = vpop.f32.mrf.mxu1 }
 0x1da   : > { %v6882_v18 = vpop.f32.mrf.mxu0 }
 0x1db   : > { %v8338_v51 = vadd.f32 %v6882_v18, %v6842_v57  ;;  %v8340_v36 = vpop.f32.mrf.mxu1 }
 0x1dc   : > { %v8342_v31 = vpop.f32.mrf.mxu0 }
 0x1dd   : > { %v6845_v60 = vpop.f32.mrf.mxu1  ;;  %7084 = vmatmul.mubr.msk.bf16.gmra.mxu1 %vm679_vm2, %v2671_v45  ;;  %v3275_v45 = vld [vmem:[#allocation2 + $0x6a] sm:$0xff] }
 0x1de   : > { %v6885_v10 = vpop.f32.mrf.mxu0  ;;  %7124 = vmatmul.mubr.msk.bf16.gmra.mxu0 %vm679_vm2, %v2993_v44  ;;  %7087 = vmatprep.mubr.msk.bf16.mxu1 %vm679_vm2, %v8164_v9  ;;  %v3304_v44 = vpack.c.bf16 %v3275_v45, %v3274_v43  ;;  %v3280_v45 = vld [vmem:[#allocation2 + $0xaa] sm:$0xff] }
 0x1df   : > { %v8346_v5 = vadd.f32 %v6885_v10, %v6845_v60  ;;  %7127 = vmatprep.mubr.msk.bf16.mxu0 %vm679_vm2, %v8249_v56  ;;  %v1073_v35 = vpop.f32.mrf.mxu1  ;;  %v3302_v56 = vpack.c.bf16 %v3271_v12, %v3270_v61  ;;  %v3277_v12 = vld [vmem:[#allocation2 + $0x82] sm:$0xff] }
 0x1e0   : > { %v1306_v58 = vpop.f32.mrf.mxu0 }
 0x1e1   : > { %v8352_v46 = vadd.f32 %v1306_v58, %v1073_v35  ;;  %v6846_v0 = vpop.f32.mrf.mxu1  ;;  %v3276_v58 = vld [vmem:[#allocation2 + $0x7a] sm:$0xff] }
 0x1e2   : > { %v6886_v63 = vpop.f32.mrf.mxu0 }
 0x1e3   : > { %v8354_v4 = vadd.f32 %v6886_v63, %v6846_v0  ;;  %v8356_v7 = vpop.f32.mrf.mxu1 }
 0x1e4   : > { %v8358_v9 = vpop.f32.mrf.mxu0 }
 0x1e5   : > { %v6849_v20 = vpop.f32.mrf.mxu1  ;;  %7088 = vmatmul.mubr.msk.bf16.gmra.mxu1 %vm679_vm2, %v2673_v2  ;;  %v3278_v2 = vld [vmem:[#allocation2 + $0x92] sm:$0xff] }
 0x1e6   : > { %v6889_v25 = vpop.f32.mrf.mxu0  ;;  %7128 = vmatmul.mubr.msk.bf16.gmra.mxu0 %vm679_vm2, %v2995_v3  ;;  %7139 = vmatprep.mubr.msk.bf16.mxu1 %vm679_vm2, %v3302_v56 }
 0x1e7   : > { %v8362_v39 = vadd.f32 %v6889_v25, %v6849_v20  ;;  %v1089_v27 = vpop.f32.mrf.mxu1  ;;  %v3279_v25 = vld [vmem:[#allocation2 + $0x9a] sm:$0xff] }
 0x1e8   : > { %v1322_v28 = vpop.f32.mrf.mxu0 }
 0x1e9   : > { %v8365_v29 = vadd.f32 %v1322_v28, %v1089_v27  ;;  %v6850_v33 = vpop.f32.mrf.mxu1 }
 0x1ea   : > { %v6890_v41 = vpop.f32.mrf.mxu0 }
 0x1eb   : > { %v8367_v47 = vadd.f32 %v6890_v41, %v6850_v33  ;;  %v8369_v57 = vpop.f32.mrf.mxu1 }
 0x1ec   : > { %v8371_v18 = vpop.f32.mrf.mxu0 }
 0x1ed   : > { %v6901_v60 = vpop.f32.mrf.mxu1  ;;  %7140 = vmatmul.mubr.msk.bf16.vlgmr.msra.gmra.mxu1 %vm679_vm2, %v3303_v32 }
 0x1ee   : > { %v6941_v10 = vpop.f32.mrf.mxu0  ;;  %v1629_v24 = vadd.f32 %v6901_v60, %v8264_v13  ;;  %7143 = vmatprep.mubr.msk.bf16.mxu1 %vm679_vm2, %v3304_v44  ;;  %v3305_v13 = vpack.c.bf16 %v3277_v12, %v3276_v58  ;;  %v3283_v58 = vld [vmem:[#allocation2 + $0xca] sm:$0xff] }
 0x1ef   : > { %v1500_v21 = vpop.f32.mrf.mxu1 }
 0x1f0   : > { %v1822_v37 = vpop.f32.mrf.mxu0  ;;  %v8376_v49 = vadd.f32 %v6941_v10, %v1629_v24  ;;  %v1627_v35 = vadd.f32 %v1500_v21, %v8271_v19  ;;  %v3306_v19 = vpack.c.bf16 %v3279_v25, %v3278_v2  ;;  %v3281_v21 = vld [vmem:[#allocation2 + $0xb2] sm:$0xff] }
 0x1f1   : > { %v6902_v0 = vpop.f32.mrf.mxu1 }
 0x1f2   : > { %v6942_v63 = vpop.f32.mrf.mxu0  ;;  %v8379_v61 = vadd.f32 %v1822_v37, %v1627_v35  ;;  %v1630_v3 = vadd.f32 %v6902_v0, %v8273_v6 }
 0x1f3   : > { %v1503_v56 = vpop.f32.mrf.mxu1 }
 0x1f4   : > { %v8382_v20 = vpop.f32.mrf.mxu0  ;;  %v8384_v27 = vadd.f32 %v6942_v63, %v1630_v3  ;;  %v8387_v28 = vadd.f32 %v1503_v56, %v8275_v42  ;;  %v3282_v42 = vld [vmem:[#allocation2 + $0xc2] sm:$0xff] }
 0x1f5   : > { %v6905_v54 = vpop.f32.mrf.mxu1  ;;  %7144 = vmatmul.mubr.msk.bf16.gmra.mxu1 %vm679_vm2, %v3305_v13 }
 0x1f6   : > { %v6945_v33 = vpop.f32.mrf.mxu0  ;;  %v1633_v41 = vadd.f32 %v6905_v54, %v8282_v50  ;;  %7147 = vmatprep.mubr.msk.bf16.mxu1 %vm679_vm2, %v3306_v19  ;;  %v3307_v50 = vpack.c.bf16 %v3281_v21, %v3280_v45  ;;  %v3284_v19 = vld [vmem:[#allocation2 + $0xda] sm:$0xff] }
 0x1f7   : > { %v1516_v6 = vpop.f32.mrf.mxu1 }
 0x1f8   : > { %v1838_v43 = vpop.f32.mrf.mxu0  ;;  %v8392_v48 = vadd.f32 %v6945_v33, %v1633_v41  ;;  %v1631_v32 = vadd.f32 %v1516_v6, %v8286_v26  ;;  %v3308_v26 = vpack.c.bf16 %v3283_v58, %v3282_v42 }
 0x1f9   : > { %v6906_v44 = vpop.f32.mrf.mxu1 }
 0x1fa   : > { %v6946_v60 = vpop.f32.mrf.mxu0  ;;  %v8395_v10 = vadd.f32 %v1838_v43, %v1631_v32  ;;  %v1634_v24 = vadd.f32 %v6906_v44, %v8288_v38  ;;  %v3285_v43 = vld [vmem:[#allocation2 + $0xe2] sm:$0xff]  ;;  %v3287_v44 = vld [vmem:[#allocation2 + $0xfa] sm:$0xff] }
 0x1fb   : > { %v1519_v37 = vpop.f32.mrf.mxu1 }
 0x1fc   : > { %v8398_v35 = vpop.f32.mrf.mxu0  ;;  %v8400_v0 = vadd.f32 %v6946_v60, %v1634_v24  ;;  %v8403_v63 = vadd.f32 %v1519_v37, %v8290_v55  ;;  %v3286_v55 = vld [vmem:[#allocation2 + $0xf2] sm:$0xff] }
 0x1fd   : > { %v6909_v2 = vpop.f32.mrf.mxu1  ;;  %7148 = vmatmul.mubr.msk.bf16.gmra.mxu1 %vm679_vm2, %v3307_v50 }
 0x1fe   : > { %v6949_v3 = vpop.f32.mrf.mxu0  ;;  %v1637_v12 = vadd.f32 %v6909_v2, %v8294_v59  ;;  %7151 = vmatprep.mubr.msk.bf16.mxu1 %vm679_vm2, %v3308_v26  ;;  %v3309_v59 = vpack.c.bf16 %v3285_v43, %v3284_v19  ;;  %v3288_v2 = vld [vmem:[#allocation2 + $0x10a] sm:$0xff] }
 0x1ff   : > { %v1532_v38 = vpop.f32.mrf.mxu1 }
 0x200   : > { %v1854_v56 = vpop.f32.mrf.mxu0  ;;  %v8408_v13 = vadd.f32 %v6949_v3, %v1637_v12  ;;  %v1635_v25 = vadd.f32 %v1532_v38, %v8298_v1  ;;  %v3310_v1 = vpack.c.bf16 %v3287_v44, %v3286_v55 }
 0x201   : > { %v6910_v54 = vpop.f32.mrf.mxu1 }
 0x202   : > { %v6950_v33 = vpop.f32.mrf.mxu0  ;;  %v8411_v41 = vadd.f32 %v1854_v56, %v1635_v25  ;;  %v1638_v6 = vadd.f32 %v6910_v54, %v8300_v15  ;;  %v3289_v25 = vld [vmem:[#allocation2 + $0x112] sm:$0xff] }
 0x203   : > { %v1535_v32 = vpop.f32.mrf.mxu1 }
 0x204   : > { %v8414_v45 = vpop.f32.mrf.mxu0  ;;  %v8416_v60 = vadd.f32 %v6950_v33, %v1638_v6  ;;  %v8419_v42 = vadd.f32 %v1535_v32, %v8302_v53  ;;  %v3290_v53 = vld [vmem:[#allocation2 + $0x122] sm:$0xff]  ;;  %v3291_v33 = vld [vmem:[#allocation2 + $0x12a] sm:$0xff] }
 0x205   : > { %v6913_v24 = vpop.f32.mrf.mxu1  ;;  %7152 = vmatmul.mubr.msk.bf16.gmra.mxu1 %vm679_vm2, %v3309_v59 }
 0x206   : > { %v6953_v21 = vpop.f32.mrf.mxu0  ;;  %v1641_v37 = vadd.f32 %v6913_v24, %v8306_v34  ;;  %7155 = vmatprep.mubr.msk.bf16.mxu1 %vm679_vm2, %v3310_v1  ;;  %v3311_v34 = vpack.c.bf16 %v3289_v25, %v3288_v2  ;;  %v3293_v2 = vld [vmem:[#allocation2 + $0x142] sm:$0xff] }
 0x207   : > { %v1548_v15 = vpop.f32.mrf.mxu1 }
 0x208   : > { %v1870_v50 = vpop.f32.mrf.mxu0  ;;  %v8424_v58 = vadd.f32 %v6953_v21, %v1641_v37  ;;  %v1639_v26 = vadd.f32 %v1548_v15, %v8310_v40  ;;  %v3312_v40 = vpack.c.bf16 %v3291_v33, %v3290_v53  ;;  %v3292_v21 = vld [vmem:[#allocation2 + $0x13a] sm:$0xff] }
 0x209   : > { %v6914_v3 = vpop.f32.mrf.mxu1  ;;  %v3295_v53 = vld [vmem:[#allocation2 + $0x15a] sm:$0xff] }
 0x20a   : > { %v6954_v12 = vpop.f32.mrf.mxu0  ;;  %v8427_v38 = vadd.f32 %v1870_v50, %v1639_v26  ;;  %v1642_v56 = vadd.f32 %v6914_v3, %v8312_v17 }
 0x20b   : > { %v1551_v19 = vpop.f32.mrf.mxu1 }
 0x20c   : > { %v8430_v54 = vpop.f32.mrf.mxu0  ;;  %v8432_v55 = vadd.f32 %v6954_v12, %v1642_v56  ;;  %v8435_v6 = vadd.f32 %v1551_v19, %v8314_v52  ;;  %v3294_v52 = vld [vmem:[#allocation2 + $0x152] sm:$0xff]  ;;  %v3313_v12 = vpack.c.bf16 %v3293_v2, %v3292_v21 }
 0x20d   : > { %v6917_v43 = vpop.f32.mrf.mxu1  ;;  %7156 = vmatmul.mubr.msk.bf16.gmra.mxu1 %vm679_vm2, %v3311_v34  ;;  %v3314_v25 = vpack.c.bf16 %v3295_v53, %v3294_v52  ;;  %v3297_v21 = vld [vmem:[#allocation2 + $0x172] sm:$0xff]  ;;  %v3301_v53 = vld [vmem:[#allocation2 + $0x1a2] sm:$0xff] }
 0x20e   : > { %v6957_v32 = vpop.f32.mrf.mxu0  ;;  %v1645_v59 = vadd.f32 %v6917_v43, %v8318_v23  ;;  %7159 = vmatprep.mubr.msk.bf16.mxu1 %vm679_vm2, %v3312_v40 }
 0x20f   : > { %v1564_v17 = vpop.f32.mrf.mxu1 }
 0x210   : > { %v1886_v44 = vpop.f32.mrf.mxu0  ;;  %v8440_v1 = vadd.f32 %v6957_v32, %v1645_v59  ;;  %v1643_v24 = vadd.f32 %v1564_v17, %v8322_v62  ;;  %v3296_v32 = vld [vmem:[#allocation2 + $0x16a] sm:$0xff] }
 0x211   : > { %v6918_v37 = vpop.f32.mrf.mxu1 }
 0x212   : > { %v6958_v15 = vpop.f32.mrf.mxu0  ;;  %v8443_v50 = vadd.f32 %v1886_v44, %v1643_v24  ;;  %v1646_v26 = vadd.f32 %v6918_v37, %v8324_v11 }
 0x213   : > { %v8446_v3 = vpop.f32.mrf.mxu1 }
 0x214   : > { %v8448_v23 = vpop.f32.mrf.mxu0  ;;  %v8450_v56 = vadd.f32 %v6958_v15, %v1646_v26 }
 0x215   : > { %v6921_v19 = vpop.f32.mrf.mxu1  ;;  %7160 = vmatmul.mubr.msk.bf16.gmra.mxu1 %vm679_vm2, %v3313_v12  ;;  %v3300_v12 = vld [vmem:[#allocation2 + $0x19a] sm:$0xff] }
 0x216   : > { %v6961_v62 = vpop.f32.mrf.mxu0  ;;  %v1649_v34 = vadd.f32 %v6921_v19, %v8332_v30  ;;  %7163 = vmatprep.mubr.msk.bf16.mxu1 %vm679_vm2, %v3314_v25  ;;  %v3315_v30 = vpack.c.bf16 %v3297_v21, %v3296_v32 }
 0x217   : > { %v1580_v33 = vpop.f32.mrf.mxu1 }
 0x218   : > { %v1902_v11 = vpop.f32.mrf.mxu0  ;;  %v8455_v40 = vadd.f32 %v6961_v62, %v1649_v34  ;;  %v1647_v43 = vadd.f32 %v1580_v33, %v8336_v22 }
 0x219   : > { %v6922_v59 = vpop.f32.mrf.mxu1 }
 0x21a   : > { %v6962_v17 = vpop.f32.mrf.mxu0  ;;  %v8458_v44 = vadd.f32 %v1902_v11, %v1647_v43  ;;  %v1650_v24 = vadd.f32 %v6922_v59, %v8338_v51  ;;  %v3317_v11 = vpack.c.bf16 %v3301_v53, %v3300_v12  ;;  %v1310_v43 = vadd.f32 %v8358_v9, %v8356_v7 }
 0x21b   : > { %v8461_v37 = vpop.f32.mrf.mxu1  ;;  %v1326_v53 = vadd.f32 %v8371_v18, %v8369_v57 }
 0x21c   : > { %v8463_v15 = vpop.f32.mrf.mxu0  ;;  %v8465_v52 = vadd.f32 %v6962_v17, %v1650_v24 }
 0x21d   : > { %v6925_v26 = vpop.f32.mrf.mxu1  ;;  %7164 = vmatmul.mubr.msk.bf16.gmra.mxu1 %vm679_vm2, %v3315_v30 }
 0x21e   : > { %v6965_v2 = vpop.f32.mrf.mxu0  ;;  %v1653_v22 = vadd.f32 %v6925_v26, %v8346_v5  ;;  %7167 = vmatprep.mubr.msk.bf16.mxu1 %vm679_vm2, %v8251_v8 }
 0x21f   : > { %v1596_v51 = vpop.f32.mrf.mxu1 }
 0x220   : > { %v1918_v25 = vpop.f32.mrf.mxu0  ;;  %v8471_v19 = vadd.f32 %v6965_v2, %v1653_v22  ;;  %v1651_v62 = vadd.f32 %v1596_v51, %v8352_v46 }
 0x221   : > { %v6926_v34 = vpop.f32.mrf.mxu1 }
 0x222   : > { %v6966_v33 = vpop.f32.mrf.mxu0  ;;  %v8476_v32 = vadd.f32 %v1918_v25, %v1651_v62  ;;  %v1654_v5 = vadd.f32 %v6926_v34, %v8354_v4 }
 0x223   : > { %v1599_v59 = vpop.f32.mrf.mxu1 }
 0x224   : > { %v1921_v8 = vpop.f32.mrf.mxu0  ;;  %v8479_v17 = vadd.f32 %v6966_v33, %v1654_v5  ;;  %v1652_v24 = vadd.f32 %v1599_v59, %v1310_v43 }
 0x225   : > { %v6929_v21 = vpop.f32.mrf.mxu1  ;;  %7168 = vmatmul.mubr.msk.bf16.gmra.mxu1 %vm679_vm2, %v3317_v11 }
 0x226   : > { %v6969_v30 = vpop.f32.mrf.mxu0  ;;  %v8482_v46 = vadd.f32 %v1921_v8, %v1652_v24  ;;  %v1657_v26 = vadd.f32 %v6929_v21, %v8362_v39 }
 0x227   : > { %v1612_v2 = vpop.f32.mrf.mxu1 }
 0x228   : > { %v1934_v22 = vpop.f32.mrf.mxu0  ;;  %v8485_v7 = vadd.f32 %v6969_v30, %v1657_v26  ;;  %v1655_v9 = vadd.f32 %v1612_v2, %v8365_v29 }
 0x229   : > { %v6930_v4 = vpop.f32.mrf.mxu1 }
 0x22a   : > { %v6970_v12 = vpop.f32.mrf.mxu0  ;;  %v8490_v51 = vadd.f32 %v1934_v22, %v1655_v9  ;;  %v1658_v25 = vadd.f32 %v6930_v4, %v8367_v47 }
 0x22b   : > { %v1615_v62 = vpop.f32.mrf.mxu1 }
 0x22c   : > { %v1937_v34 = vpop.f32.mrf.mxu0  ;;  %v8493_v33 = vadd.f32 %v6970_v12, %v1658_v25  ;;  %v1656_v39 = vadd.f32 %v1615_v62, %v1326_v53 }
 0x22d   : > { %v6981_v11 = vpop.f32.mrf.mxu1 }
 0x22e   : > { %v8495_v43 = vpop.f32.mrf.mxu0  ;;  %v8497_v5 = vadd.f32 %v1937_v34, %v1656_v39  ;;  %v8500_v29 = vadd.f32 %v6981_v11, %v8376_v49 }
 0x22f   : > { %v2144_v59 = vpop.f32.mrf.mxu1 }
 0x230   : > { %v8502_v8 = vpop.f32.mrf.mxu0  ;;  %v8505_v57 = vadd.f32 %v2144_v59, %v8379_v61 }
 0x231   : > { %v6982_v47 = vpop.f32.mrf.mxu1 }
 0x232   : > { %v8507_v18 = vpop.f32.mrf.mxu0  ;;  %v8510_v24 = vadd.f32 %v6982_v47, %v8384_v27  ;;  %v1954_v27 = vadd.f32 %v8398_v35, %v8403_v63 }
 0x233   : > { %v8512_v21 = vpop.f32.mrf.mxu1 }
 0x234   : > { %v8514_v30 = vpop.f32.mrf.mxu0 }
 0x235   : > { %v6985_v26 = vpop.f32.mrf.mxu1 }
 0x236   : > { %v7025_v2 = vpop.f32.mrf.mxu0  ;;  %v2277_v49 = vadd.f32 %v6985_v26, %v8392_v48 }
 0x237   : > { %v2160_v22 = vpop.f32.mrf.mxu1 }
 0x238   : > { %v2482_v9 = vpop.f32.mrf.mxu0  ;;  %v8517_v4 = vadd.f32 %v7025_v2, %v2277_v49  ;;  %v2275_v61 = vadd.f32 %v2160_v22, %v8395_v10 }
 0x239   : > { %v6986_v12 = vpop.f32.mrf.mxu1 }
 0x23a   : > { %v7026_v53 = vpop.f32.mrf.mxu0  ;;  %v8522_v25 = vadd.f32 %v2482_v9, %v2275_v61  ;;  %v2278_v62 = vadd.f32 %v6986_v12, %v8400_v0  ;;  %v1958_v0 = vadd.f32 %v8414_v45, %v8419_v42 }
 0x23b   : > { %v2163_v34 = vpop.f32.mrf.mxu1 }
 0x23c   : > { %v2485_v39 = vpop.f32.mrf.mxu0  ;;  %v8525_v11 = vadd.f32 %v7026_v53, %v2278_v62  ;;  %v2276_v48 = vadd.f32 %v2163_v34, %v1954_v27 }
 0x23d   : > { %v6989_v59 = vpop.f32.mrf.mxu1 }
 0x23e   : > { %v7029_v47 = vpop.f32.mrf.mxu0  ;;  %v8527_v26 = vadd.f32 %v2485_v39, %v2276_v48  ;;  %v2281_v10 = vadd.f32 %v6989_v59, %v8408_v13 }
 0x23f   : > { %v2176_v2 = vpop.f32.mrf.mxu1 }
 0x240   : > { %v2498_v49 = vpop.f32.mrf.mxu0  ;;  %v8530_v22 = vadd.f32 %v7029_v47, %v2281_v10  ;;  %v2279_v35 = vadd.f32 %v2176_v2, %v8411_v41 }
 0x241   : > { %v6990_v63 = vpop.f32.mrf.mxu1 }
 0x242   : > { %v7030_v9 = vpop.f32.mrf.mxu0  ;;  %v8535_v61 = vadd.f32 %v2498_v49, %v2279_v35  ;;  %v2282_v12 = vadd.f32 %v6990_v63, %v8416_v60  ;;  %v1962_v60 = vadd.f32 %v8430_v54, %v8435_v6 }
 0x243   : > { %v2179_v53 = vpop.f32.mrf.mxu1 }
 0x244   : > { %v2501_v27 = vpop.f32.mrf.mxu0  ;;  %v8538_v62 = vadd.f32 %v7030_v9, %v2282_v12  ;;  %v2280_v13 = vadd.f32 %v2179_v53, %v1958_v0 }
 0x245   : > { %v6993_v34 = vpop.f32.mrf.mxu1 }
 0x246   : > { %v7033_v39 = vpop.f32.mrf.mxu0  ;;  %v8540_v48 = vadd.f32 %v2501_v27, %v2280_v13  ;;  %v2285_v41 = vadd.f32 %v6993_v34, %v8424_v58  ;;  %v1278_v58 = vadd.f32 %v8328_v16, %v8326_v14 }
 0x247   : > { %v2192_v59 = vpop.f32.mrf.mxu1 }
 0x248   : > { %v2514_v47 = vpop.f32.mrf.mxu0  ;;  %v8543_v10 = vadd.f32 %v7033_v39, %v2285_v41  ;;  %v2283_v45 = vadd.f32 %v2192_v59, %v8427_v38  ;;  %v7394_v38 = vld [vmem:[%s9455_s5 + $0x38] sm:$0xff]   ;;  %v1644_v54 = vadd.f32 %v8446_v3, %v1278_v58 }
 0x249   : > { %v6994_v42 = vpop.f32.mrf.mxu1  ;;  %7171 = vmatprep.subr.bf16.mxu0 %v7394_v38 }
 0x24a   : > { %v7034_v2 = vpop.f32.mrf.mxu0  ;;  %v8548_v49 = vadd.f32 %v2514_v47, %v2283_v45  ;;  %v2286_v35 = vadd.f32 %v6994_v42, %v8432_v55  ;;  %7172 = vmatpush3.bf16.msra.mxu0 %v7394_v38  ;;  %v1966_v59 = vadd.f32 %v8448_v23, %v1644_v54 }
 0x24b   : > { %v2195_v63 = vpop.f32.mrf.mxu1 }
 0x24c   : > { %v2517_v9 = vpop.f32.mrf.mxu0  ;;  %v8553_v0 = vadd.f32 %v7034_v2, %v2286_v35  ;;  %v2284_v12 = vadd.f32 %v2195_v63, %v1962_v60 }
 0x24d   : > { %v6997_v53 = vpop.f32.mrf.mxu1 }
 0x24e   : > { %v7037_v27 = vpop.f32.mrf.mxu0  ;;  %v8559_v6 = vadd.f32 %v2517_v9, %v2284_v12  ;;  %v2289_v55 = vadd.f32 %v6997_v53, %v8440_v1  ;;  %v1294_v1 = vadd.f32 %v8342_v31, %v8340_v36 }
 0x24f   : > { %v2208_v13 = vpop.f32.mrf.mxu1 }
 0x250   : > { %v2530_v34 = vpop.f32.mrf.mxu0  ;;  %v8562_v39 = vadd.f32 %v7037_v27, %v2289_v55  ;;  %v2287_v14 = vadd.f32 %v2208_v13, %v8443_v50  ;;  %v1648_v50 = vadd.f32 %v8461_v37, %v1294_v1 }
 0x251   : > { %v6998_v16 = vpop.f32.mrf.mxu1 }
 0x252   : > { %v7038_v41 = vpop.f32.mrf.mxu0  ;;  %v8566_v47 = vadd.f32 %v2530_v34, %v2287_v14  ;;  %v2290_v3 = vadd.f32 %v6998_v16, %v8450_v56  ;;  %v1970_v36 = vadd.f32 %v8463_v15, %v1648_v50 }
 0x253   : > { %v2211_v45 = vpop.f32.mrf.mxu1 }
 0x254   : > { %v2533_v42 = vpop.f32.mrf.mxu0  ;;  %v8571_v2 = vadd.f32 %v7038_v41, %v2290_v3  ;;  %v2288_v60 = vadd.f32 %v2211_v45, %v1966_v59 }
 0x255   : > { %v7001_v35 = vpop.f32.mrf.mxu1 }
 0x256   : > { %v7041_v63 = vpop.f32.mrf.mxu0  ;;  %v8574_v9 = vadd.f32 %v2533_v42, %v2288_v60  ;;  %v2293_v23 = vadd.f32 %v7001_v35, %v8455_v40  ;;  %v7395_v60 = vld [vmem:[%s9455_s5 + $0x18] sm:$0xff]  }
 0x257   : > { %v2224_v58 = vpop.f32.mrf.mxu1  ;;  %7187 = vmatprep.subr.bf16.mxu1 %v7395_v60 }
 0x258   : > { %v2546_v12 = vpop.f32.mrf.mxu0  ;;  %v8577_v53 = vadd.f32 %v7041_v63, %v2293_v23  ;;  %v2291_v56 = vadd.f32 %v2224_v58, %v8458_v44  ;;  %7188 = vmatpush3.bf16.msra.mxu1 %v7395_v60 }
 0x259   : > { %v7002_v27 = vpop.f32.mrf.mxu1 }
 0x25a   : > { %v7042_v38 = vpop.f32.mrf.mxu0  ;;  %v8581_v31 = vadd.f32 %v2546_v12, %v2291_v56  ;;  %v2294_v54 = vadd.f32 %v7002_v27, %v8465_v52 }
 0x25b   : > { %v2227_v55 = vpop.f32.mrf.mxu1 }
 0x25c   : > { %v2549_v37 = vpop.f32.mrf.mxu0  ;;  %v8584_v13 = vadd.f32 %v7042_v38, %v2294_v54  ;;  %v2292_v34 = vadd.f32 %v2227_v55, %v1970_v36 }
 0x25d   : > { %v7005_v40 = vpop.f32.mrf.mxu1 }
 0x25e   : > { %v7045_v14 = vpop.f32.mrf.mxu0  ;;  %v8586_v16 = vadd.f32 %v2549_v37, %v2292_v34  ;;  %v2297_v41 = vadd.f32 %v7005_v40, %v8471_v19 }
 0x25f   : > { %v2240_v44 = vpop.f32.mrf.mxu1 }
 0x260   : > { %v2562_v59 = vpop.f32.mrf.mxu0  ;;  %v8589_v3 = vadd.f32 %v7045_v14, %v2297_v41  ;;  %v2295_v15 = vadd.f32 %v2240_v44, %v8476_v32 }
 0x261   : > { %v7006_v45 = vpop.f32.mrf.mxu1 }
 0x262   : > { %v7046_v42 = vpop.f32.mrf.mxu0  ;;  %v8592_v52 = vadd.f32 %v2562_v59, %v2295_v15  ;;  %v2298_v1 = vadd.f32 %v7006_v45, %v8479_v17  ;;  %v7396_v17 = vld [vmem:[%s9455_s5 + $0x30] sm:$0xff]  }
 0x263   : > { %v2243_v35 = vpop.f32.mrf.mxu1  ;;  %7173 = vmatprep.subr.bf16.mxu0 %v7396_v17 }
 0x264   : > { %v2565_v63 = vpop.f32.mrf.mxu0  ;;  %v8598_v50 = vadd.f32 %v7046_v42, %v2298_v1  ;;  %v2296_v19 = vadd.f32 %v2243_v35, %v8482_v46  ;;  %7174 = vmatpush3.bf16.msra.mxu0 %v7396_v17  ;;  %v7397_v17 = vld [vmem:[%s9455_s5 + $0x10] sm:$0xff]  }
 0x265   : > { %v7009_v23 = vpop.f32.mrf.mxu1  ;;  %7189 = vmatprep.subr.bf16.mxu1 %v7397_v17 }
 0x266   : > { %v7049_v58 = vpop.f32.mrf.mxu0  ;;  %v8601_v32 = vadd.f32 %v2565_v63, %v2296_v19  ;;  %v2301_v12 = vadd.f32 %v7009_v23, %v8485_v7  ;;  %7190 = vmatpush3.bf16.msra.mxu1 %v7397_v17 }
 0x267   : > { %v2256_v56 = vpop.f32.mrf.mxu1 }
 0x268   : > { %v2578_v27 = vpop.f32.mrf.mxu0  ;;  %v8607_v38 = vadd.f32 %v7049_v58, %v2301_v12  ;;  %v2299_v36 = vadd.f32 %v2256_v56, %v8490_v51 }
 0x269   : > { %v7010_v46 = vpop.f32.mrf.mxu1 }
 0x26a   : > { %v7050_v54 = vpop.f32.mrf.mxu0  ;;  %v8610_v55 = vadd.f32 %v2578_v27, %v2299_v36  ;;  %v2302_v37 = vadd.f32 %v7010_v46, %v8493_v33 }
 0x26b   : > { %v2259_v34 = vpop.f32.mrf.mxu1 }
 0x26c   : > { %v2581_v7 = vpop.f32.mrf.mxu0  ;;  %v8613_v40 = vadd.f32 %v7050_v54, %v2302_v37  ;;  %v2300_v14 = vadd.f32 %v2259_v34, %v8497_v5  ;;  %v7398_v54 = vld [vmem:[%s9455_s5 + $0x28] sm:$0xff]  }
 0x26d   : > { %v8616_v41 = vpop.f32.mrf.mxu1  ;;  %7175 = vmatprep.subr.bf16.mxu0 %v7398_v54 }
 0x26e   : > { %v8618_v44 = vpop.f32.mrf.mxu0  ;;  %v8620_v59 = vadd.f32 %v2581_v7, %v2300_v14  ;;  %7176 = vmatpush3.bf16.msra.mxu0 %v7398_v54 }
 0x26f   : > { %v8622_v51 = vpop.f32.mrf.mxu1 }
 0x270   : > { %v8624_v15 = vpop.f32.mrf.mxu0 }
 0x271   : > { %v8626_v45 = vpop.f32.mrf.mxu1 }
 0x272   : > { %v8628_v42 = vpop.f32.mrf.mxu0 }
 0x273   : > { %v8630_v33 = vpop.f32.mrf.mxu1 }
 0x274   : > { %v8632_v1 = vpop.f32.mrf.mxu0 }
 0x275   : > { %v7065_v60 = vpop.f32.mrf.mxu1 }
 0x276   : > { %v8634_v5 = vpop.f32.mrf.mxu0  ;;  %v8637_v35 = vadd.f32 %v7065_v60, %v8517_v4 }
 0x277   : > { %v2805_v63 = vpop.f32.mrf.mxu1 }
 0x278   : > { %v8639_v19 = vpop.f32.mrf.mxu0  ;;  %v8642_v23 = vadd.f32 %v2805_v63, %v8522_v25  ;;  %v7400_v63 = vld [vmem:[%s9455_s5 + $0x20] sm:$0xff]  }
 0x279   : > { %v7066_v58 = vpop.f32.mrf.mxu1  ;;  %7177 = vmatprep.subr.bf16.mxu0 %v7400_v63 }
 0x27a   : > { %v8644_v12 = vpop.f32.mrf.mxu0  ;;  %v8650_v56 = vadd.f32 %v7066_v58, %v8525_v11  ;;  %v7399_v11 = vld [vmem:[%s9455_s5 + $0x8] sm:$0xff]   ;;  %7178 = vmatpush3.bf16.msra.mxu0 %v7400_v63 }
 0x27b   : > { %v2808_v27 = vpop.f32.mrf.mxu1  ;;  %7191 = vmatprep.subr.bf16.mxu1 %v7399_v11 }
 0x27c   : > { %v8652_v36 = vpop.f32.mrf.mxu0  ;;  %v8655_v4 = vadd.f32 %v2808_v27, %v8527_v26  ;;  %7192 = vmatpush3.bf16.msra.mxu1 %v7399_v11 }
 0x27d   : > { %v7069_v25 = vpop.f32.mrf.mxu1 }
 0x27e   : > { %v8657_v46 = vpop.f32.mrf.mxu0  ;;  %v8666_v37 = vadd.f32 %v7069_v25, %v8530_v22  ;;  %v7401_v22 = vld [vmem:[%s9455_s5] sm:$0xff]  }
 0x27f   : > { %v2821_v34 = vpop.f32.mrf.mxu1  ;;  %7193 = vmatprep.subr.bf16.mxu1 %v7401_v22 }
 0x280   : > { %v8668_v7 = vpop.f32.mrf.mxu0  ;;  %v8671_v26 = vadd.f32 %v2821_v34, %v8535_v61  ;;  %7194 = vmatpush3.bf16.msra.mxu1 %v7401_v22 }
 0x281   : > { %v7070_v14 = vpop.f32.mrf.mxu1 }
 0x282   : > { %v8673_v60 = vpop.f32.mrf.mxu0  ;;  %v8682_v58 = vadd.f32 %v7070_v14, %v8538_v62 }
 0x283   : > { %9460 = vst [vmem:[#allocation7_spill] sm:$0xff] %v8673_v60  ;;  %v2824_v17 = vpop.f32.mrf.mxu1 }
 0x284   : > { %v8684_v27 = vpop.f32.mrf.mxu0  ;;  %v8687_v61 = vadd.f32 %v2824_v17, %v8540_v48 }
 0x285   : > { %9461 = vst [vmem:[#allocation8_spill] sm:$0xff] %v8684_v27  ;;  %v7073_v25 = vpop.f32.mrf.mxu1 }
 0x286   : > { %v8689_v54 = vpop.f32.mrf.mxu0  ;;  %v8692_v11 = vadd.f32 %v7073_v25, %v8543_v10 }
 0x287   : > { %v2837_v34 = vpop.f32.mrf.mxu1 }
 0x288   : > { %v8694_v60 = vpop.f32.mrf.mxu0  ;;  %v8697_v62 = vadd.f32 %v2837_v34, %v8548_v49 }
 0x289   : > { %9462 = vst [vmem:[#allocation9_spill] sm:$0xff] %v8694_v60  ;;  %v7074_v14 = vpop.f32.mrf.mxu1 }
 0x28a   : > { %v8699_v27 = vpop.f32.mrf.mxu0  ;;  %v8702_v48 = vadd.f32 %v7074_v14, %v8553_v0 }
 0x28b   : > { %9463 = vst [vmem:[#allocation10_spill] sm:$0xff] %v8699_v27  ;;  %v2840_v63 = vpop.f32.mrf.mxu1 }
 0x28c   : > { %v8704_v22 = vpop.f32.mrf.mxu0  ;;  %v8707_v17 = vadd.f32 %v2840_v63, %v8559_v6 }
 0x28d   : > { %9464 = vst [vmem:[#allocation11_spill] sm:$0xff] %v8704_v22  ;;  %v7077_v10 = vpop.f32.mrf.mxu1 }
 0x28e   : > { %v8709_v25 = vpop.f32.mrf.mxu0  ;;  %v8712_v60 = vadd.f32 %v7077_v10, %v8562_v39 }
 0x28f   : > { %9465 = vst [vmem:[#allocation12_spill] sm:$0xff] %v8709_v25  ;;  %v2853_v49 = vpop.f32.mrf.mxu1 }
 0x290   : > { %v8714_v34 = vpop.f32.mrf.mxu0  ;;  %v8717_v27 = vadd.f32 %v2853_v49, %v8566_v47 }
 0x291   : > { %9466 = vst [vmem:[#allocation13_spill] sm:$0xff] %v8714_v34  ;;  %v7078_v0 = vpop.f32.mrf.mxu1 }
 0x292   : > { %v8719_v14 = vpop.f32.mrf.mxu0  ;;  %v8722_v22 = vadd.f32 %v7078_v0, %v8571_v2 }
 0x293   : > { %9467 = vst [vmem:[#allocation14_spill] sm:$0xff] %v8719_v14  ;;  %v2856_v6 = vpop.f32.mrf.mxu1 }
 0x294   : > { %v8724_v63 = vpop.f32.mrf.mxu0  ;;  %v8727_v25 = vadd.f32 %v2856_v6, %v8574_v9 }
 0x295   : > { %9468 = vst [vmem:[#allocation15_spill] sm:$0xff] %v8724_v63  ;;  %v7081_v39 = vpop.f32.mrf.mxu1 }
 0x296   : > { %9469 = vst [vmem:[#allocation16_spill] sm:$0xff] %v8727_v25  ;;  %v8729_v10 = vpop.f32.mrf.mxu0  ;;  %v8732_v34 = vadd.f32 %v7081_v39, %v8577_v53 }
 0x297   : > { %9470 = vst [vmem:[#allocation17_spill] sm:$0xff] %v8729_v10  ;;  %v2869_v47 = vpop.f32.mrf.mxu1 }
 0x298   : > { %v8734_v49 = vpop.f32.mrf.mxu0  ;;  %v8737_v14 = vadd.f32 %v2869_v47, %v8581_v31 }
 0x299   : > { %9471 = vst [vmem:[#allocation18_spill] sm:$0xff] %v8734_v49  ;;  %v7082_v2 = vpop.f32.mrf.mxu1 }
 0x29a   : > { %v8740_v0 = vadd.f32 %v7082_v2, %v8584_v13  ;;  %v8742_v63 = vpop.f32.mrf.mxu0 }
 0x29b   : > { %v2872_v9 = vpop.f32.mrf.mxu1 }
 0x29c   : > { %v8745_v6 = vadd.f32 %v2872_v9, %v8586_v16  ;;  %v8747_v25 = vpop.f32.mrf.mxu0  ;;  %v1950_v16 = vadd.f32 %v8382_v20, %v8387_v28  ;;  %v2593_v20 = vadd.f32 %v8502_v8, %v8505_v57  ;;  %v2596_v28 = vadd.f32 %v8507_v18, %v8510_v24 }
 0x29d   : > { %v7085_v10 = vpop.f32.mrf.mxu1  ;;  %9472 = vst [vmem:[#allocation19_spill] sm:$0xff] %v8747_v25 }
 0x29e   : > { %v8750_v53 = vadd.f32 %v7085_v10, %v8589_v3  ;;  %v8755_v49 = vpop.f32.mrf.mxu0  ;;  %v2272_v3 = vadd.f32 %v8512_v21, %v1950_v16  ;;  %v2916_v24 = vadd.f32 %v8622_v51, %v2593_v20  ;;  %v8807_v51 = vld [vmem:[%s9454_s4] ss:$0 sm:$0xff]  ;;  %v3245_v20 = vadd.f32 %v8644_v12, %v8650_v56 }
 0x29f   : > { %v2885_v39 = vpop.f32.mrf.mxu1  ;;  %v8845_v56 = vadd.f32 %v8689_v54, %v8692_v11  ;;  %v9481_v11 = vld [vmem:[#allocation13_spill] sm:$0xff] }
 0x2a0   : > { %9473 = vst [vmem:[#allocation20_spill] sm:$0xff] %v8750_v53  ;;  %v8753_v31 = vadd.f32 %v2885_v39, %v8592_v52  ;;  %v7493_v53 = vmov 1983009808   ;;  %v3699_v52 = vlaneseq  ;;  %v2595_v39 = vadd.f32 %v8495_v43, %v8500_v29  ;;  %v8784_v43 = vld [vmem:[%s9455_s5 + $0x58] sm:$0xff]  }
 0x2a1   : > { %v7086_v47 = vpop.f32.mrf.mxu1  ;;  %v3697_v25 = vunpack.c.l.s4 %v7493_v53  ;;  %v8789_v29 = vld [vmem:[%s9455_s5 + $0x78] sm:$0xff]   ;;  %v2594_v8 = vadd.f32 %v8514_v30, %v2272_v3  ;;  %7203 = vmatprep.subr.bf16.mxu0 %v8784_v43 }
 0x2a2   : > { %9474 = vst [vmem:[#allocation21_spill] sm:$0xff] %v8753_v31  ;;  %v8758_v13 = vadd.f32 %v7086_v47, %v8598_v50  ;;  %v8768_v31 = vpop.f32.mrf.mxu0  ;;  %v2918_v21 = vadd.f32 %v8616_v41, %v2595_v39  ;;  %v3700_v18 = vshrl.u32 %v3699_v52, 7  ;;  %7219 = vmatprep.subr.bf16.mxu1 %v8789_v29 }
 0x2a3   : > { %v2888_v2 = vpop.f32.mrf.mxu1  ;;  %v2917_v16 = vadd.f32 %v8630_v33, %v2594_v8 }
 0x2a4   : > { %v8763_v9 = vadd.f32 %v2888_v2, %v8601_v32  ;;  %v7126_v41 = vpop.f32.mrf.mxu0  ;;  %v3240_v30 = vadd.f32 %v8618_v44, %v2918_v21  ;;  %v8813_v39 = vsub.s32 0, %v3700_v18 }
 0x2a5   : > { %v7089_v10 = vpop.f32.mrf.mxu1  ;;  %v3239_v44 = vadd.f32 %v8632_v1, %v2917_v16 }
 0x2a6   : > { %v8771_v50 = vadd.f32 %v7089_v10, %v8607_v38  ;;  %v3698_v38 = vunpack.c.0.s8 %v3697_v25  ;;  %v3210_v52 = vpop.f32.mrf.mxu0 }
 0x2a7   : > { %v2901_v47 = vpop.f32.mrf.mxu1 }
 0x2a8   : > { %v8779_v32 = vadd.f32 %v2901_v47, %v8610_v55  ;;  %v2919_v55 = vadd.f32 %v8626_v45, %v2596_v28  ;;  %v3238_v45 = vadd.f32 %v8624_v15, %v2916_v24  ;;  %v3242_v47 = vadd.f32 %v8639_v19, %v8642_v23  ;;  %v7129_v21 = vpop.f32.mrf.mxu0  ;;  %v9476_v23 = vld [vmem:[#allocation8_spill] sm:$0xff] }
 0x2a9   : > { %v7090_v57 = vpop.f32.mrf.mxu1  ;;  %v8824_v15 = vadd.f32 %v8652_v36, %v8655_v4  ;;  %v8841_v12 = vadd.f32 %v9476_v23, %v8687_v61  ;;  %v9477_v4 = vld [vmem:[#allocation9_spill] sm:$0xff] }
 0x2aa   : > { %v8795_v53 = vadd.f32 %v7090_v57, %v8613_v40  ;;  %v8809_v40 = vsub.s32 %v3698_v38, %v3700_v18  ;;  %v3241_v10 = vadd.f32 %v8628_v42, %v2919_v55  ;;  %v8828_v42 = vadd.f32 %v8657_v46, %v8666_v37  ;;  %v9478_v37 = vld [vmem:[#allocation10_spill] sm:$0xff]  ;;  %v9479_v57 = vld [vmem:[#allocation11_spill] sm:$0xff]  ;;  %v9480_v38 = vld [vmem:[#allocation12_spill] sm:$0xff]  ;;  %v3223_v55 = vpop.f32.mrf.mxu0 }
 0x2ab   : > { %v2904_v2 = vpop.f32.mrf.mxu1  ;;  %v8849_v46 = vadd.f32 %v9477_v4, %v8697_v62  ;;  %v8858_v61 = vadd.f32 %v9479_v57, %v8707_v17  ;;  %v8862_v54 = vadd.f32 %v9480_v38, %v8712_v60  ;;  %v8866_v18 = vadd.f32 %v9481_v11, %v8717_v27  ;;  %v9482_v62 = vld [vmem:[#allocation14_spill] sm:$0xff]  ;;  %v9485_v60 = vld [vmem:[#allocation17_spill] sm:$0xff]  ;;  %v9488_v4 = vld [vmem:[#allocation20_spill] sm:$0xff] }
 0x2ac   : > { %v8802_v25 = vadd.f32 %v2904_v2, %v8620_v59  ;;  %v3244_v59 = vadd.f32 %v8634_v5, %v8637_v35  ;;  %v8833_v5 = vadd.f32 %v8668_v7, %v8671_v26  ;;  %v9475_v35 = vld [vmem:[#allocation7_spill] sm:$0xff]  ;;  %v8853_v7 = vadd.f32 %v9478_v37, %v8702_v48  ;;  %v9486_v27 = vld [vmem:[#allocation18_spill] sm:$0xff]  ;;  %v9489_v37 = vld [vmem:[#allocation21_spill] sm:$0xff] }
 0x2ad   : > { %v7141_v3 = vpop.f32.mrf.mxu1  ;;  %v8837_v19 = vadd.f32 %v9475_v35, %v8682_v58  ;;  %v8870_v24 = vadd.f32 %v9482_v62, %v8722_v22  ;;  %v8887_v22 = vadd.f32 %v8742_v63, %v8740_v0  ;;  %v8903_v63 = vadd.f32 %v7126_v41, %v8758_v13 }
 0x2ae   : > { %v3562_v33 = vadd.f32 %v7141_v3, %v3240_v30  ;;  %v9483_v3 = vld [vmem:[#allocation16_spill] sm:$0xff]  ;;  %v8914_v13 = vadd.f32 %v3223_v55, %v8779_v32 }
 0x2af   : > { %v3433_v28 = vpop.f32.mrf.mxu1 }
 0x2b0   : > { %v3601_v1 = vadd.f32 %v8807_v51, %v3562_v33  ;;  %v3560_v8 = vadd.f32 %v3433_v28, %v3238_v45  ;;  %v9484_v45 = vld [vmem:[#allocation15_spill] sm:$0xff]  ;;  %v8879_v33 = vadd.f32 %v9485_v60, %v8732_v34  ;;  %v8883_v28 = vadd.f32 %v9486_v27, %v8737_v14 }
 0x2b1   : > { %v7142_v36 = vpop.f32.mrf.mxu1  ;;  %v8896_v34 = vadd.f32 %v8755_v49, %v9488_v4  ;;  %v8900_v14 = vadd.f32 %v8768_v31, %v9489_v37  ;;  %v8908_v49 = vadd.f32 %v3210_v52, %v8763_v9  ;;  %v8911_v31 = vadd.f32 %v7129_v21, %v8771_v50 }
 0x2b2   : > { %v3599_v26 = vadd.f32 %v8807_v51, %v3560_v8  ;;  %v3563_v58 = vadd.f32 %v7142_v36, %v3241_v10  ;;  %v3633_v16 = vmax.f32 %v3601_v1, 0.0  ;;  %v8875_v10 = vadd.f32 %v9484_v45, %v9483_v3  ;;  %v9487_v8 = vld [vmem:[#allocation19_spill] sm:$0xff] }
 0x2b3   : > { %v3436_v48 = vpop.f32.mrf.mxu1 }
 0x2b4   : > { %v3631_v2 = vmax.f32 %v3599_v26, 0.0  ;;  %v3602_v30 = vadd.f32 %v8807_v51, %v3563_v58  ;;  %v3561_v17 = vadd.f32 %v3436_v48, %v3239_v44  ;;  %v8891_v44 = vadd.f32 %v9487_v8, %v8745_v6  ;;  %v7130_v6 = vpop.f32.mrf.mxu0 }
 0x2b5   : > { %v7145_v1 = vpop.f32.mrf.mxu1 }
 0x2b6   : > { %v3663_v35 = vmax.f32 %v3631_v2, %v3633_v16  ;;  %v3600_v23 = vadd.f32 %v8807_v51, %v3561_v17  ;;  %v3566_v36 = vadd.f32 %v7145_v1, %v3244_v59  ;;  %v3634_v0 = vmax.f32 %v3602_v30, 0.0 }
 0x2b7   : > { %v3449_v26 = vpop.f32.mrf.mxu1  ;;  %v8918_v30 = vadd.f32 %v7130_v6, %v8795_v53 }
 0x2b8   : > { %v3695_v58 = vcombine.high %v3663_v35, %v3663_v35  ;;  %v3702_v57 = vrot.slane %v3663_v35, %v8809_v40  ;;  %v3632_v59 = vmax.f32 %v3600_v23, 0.0  ;;  %v3605_v38 = vadd.f32 %v8807_v51, %v3566_v36 }
 0x2b9   : > { %v3564_v41 = vadd.f32 %v3449_v26, %v3242_v47  ;;  %v7146_v11 = vpop.f32.mrf.mxu1 }
 0x2ba   : > { %v3709_v62 = vrot.slane %v3695_v58, %v8809_v40  ;;  %v3710_v48 = vcombine.high %v3702_v57, %v3702_v57  ;;  %v6259_v16 = vrot.slane %v3702_v57, 9  ;;  %v3664_v2 = vmax.f32 %v3632_v59, %v3634_v0 }
 0x2bb   : > { %v3637_v9 = vmax.f32 %v3605_v38, 0.0  ;;  %v3603_v52 = vadd.f32 %v8807_v51, %v3564_v41  ;;  %v3567_v50 = vadd.f32 %v7146_v11, %v3245_v20  ;;  %v3452_v21 = vpop.f32.mrf.mxu1 }
 0x2bc   : > { %v3711_v17 = vcombine.high %v3709_v62, %v3709_v62  ;;  %v6260_v32 = vrot.slane %v3710_v48, 9  ;;  %v6261_v55 = vrot.slane %v3709_v62, 9  ;;  %v4223_v3 = vmax.f32 %v3702_v57, %v6259_v16 }
 0x2bd   : > { %v3712_v47 = vcombine.high %v3664_v2, %v3664_v2  ;;  %v3719_v45 = vrot.slane %v3664_v2, %v8809_v40  ;;  %v3635_v60 = vmax.f32 %v3603_v52, 0.0  ;;  %v8923_v27 = vadd.f32 %v8807_v51, %v3567_v50  ;;  %v7149_v53 = vpop.f32.mrf.mxu1 }
 0x2be   : > { %v6262_v1 = vrot.slane %v3711_v17, 9  ;;  %v4224_v8 = vmax.f32 %v3710_v48, %v6260_v32  ;;  %v4225_v35 = vmax.f32 %v3709_v62, %v6261_v55  ;;  %v4379_v20 = vrot.slane %v4223_v3, %v8813_v39 }
 0x2bf   : > { %v3726_v23 = vrot.slane %v3712_v47, %v8809_v40  ;;  %v3727_v36 = vcombine.high %v3719_v45, %v3719_v45  ;;  %v6263_v4 = vrot.slane %v3719_v45, 9  ;;  %v3665_v37 = vmax.f32 %v3635_v60, %v3637_v9  ;;  %v3465_v0 = vpop.f32.mrf.mxu1 }
 0x2c0   : > { %v4226_v26 = vmax.f32 %v3711_v17, %v6262_v1  ;;  %v4383_v6 = vrot.slane %v4224_v8, %v8813_v39  ;;  %v4387_v58 = vrot.slane %v4225_v35, %v8813_v39  ;;  %v3638_v57 = vmax.f32 %v8923_v27, 0.0 }
 0x2c1   : > { %v3728_v59 = vcombine.high %v3726_v23, %v3726_v23  ;;  %v6264_v38 = vrot.slane %v3727_v36, 9  ;;  %v6265_v41 = vrot.slane %v3726_v23, 9  ;;  %v4227_v11 = vmax.f32 %v3719_v45, %v6263_v4  ;;  %v7150_v62 = vpop.f32.mrf.mxu1 }
 0x2c2   : > { %v4391_v48 = vrot.slane %v4226_v26, %v8813_v39  ;;  %v4633_v16 = vsel %vm4632_vm5, %v4383_v6, %v4379_v20  ;;  %v3729_v2 = vcombine.high %v3665_v37, %v3665_v37  ;;  %v3736_v9 = vrot.slane %v3665_v37, %v8809_v40 }
 0x2c3   : > { %v4635_v52 = vsel %vm4634_vm6, %v4387_v58, %v4633_v16  ;;  %v6266_v50 = vrot.slane %v3728_v59, 9  ;;  %v4228_v17 = vmax.f32 %v3727_v36, %v6264_v38  ;;  %v4229_v32 = vmax.f32 %v3726_v23, %v6265_v41  ;;  %v3468_v55 = vpop.f32.mrf.mxu1 }
 0x2c4   : > { %v4395_v3 = vrot.slane %v4227_v11, %v8813_v39  ;;  %v4637_v47 = vsel %vm4636_vm7, %v4391_v48, %v4635_v52  ;;  %v3743_v45 = vrot.slane %v3729_v2, %v8809_v40  ;;  %v3744_v60 = vcombine.high %v3736_v9, %v3736_v9 }
 0x2c5   : > { %v4230_v27 = vmax.f32 %v3728_v59, %v6266_v50  ;;  %v4399_v1 = vrot.slane %v4228_v17, %v8813_v39  ;;  %v4403_v8 = vrot.slane %v4229_v32, %v8813_v39  ;;  %v6267_v35 = vrot.slane %v3736_v9, 9  ;;  %v7153_v20 = vpop.f32.mrf.mxu1 }
 0x2c6   : > { %v4639_v4 = vsel %vm4638_vm8, %v4395_v3, %v4637_v47  ;;  %v3745_v37 = vcombine.high %v3743_v45, %v3743_v45  ;;  %v6268_v36 = vrot.slane %v3744_v60, 9  ;;  %v6269_v23 = vrot.slane %v3743_v45, 9 }
 0x2c7   : > { %v4407_v26 = vrot.slane %v4230_v27, %v8813_v39  ;;  %v4641_v6 = vsel %vm4640_vm9, %v4399_v1, %v4639_v4  ;;  %v4231_v58 = vmax.f32 %v3736_v9, %v6267_v35  ;;  %v3565_v38 = vadd.f32 %v3452_v21, %v8824_v15  ;;  %v3481_v41 = vpop.f32.mrf.mxu1 }
 0x2c8   : > { %v4643_v59 = vsel %vm4642_vm10, %v4403_v8, %v4641_v6  ;;  %v6270_v11 = vrot.slane %v3745_v37, 9  ;;  %v4232_v48 = vmax.f32 %v3744_v60, %v6268_v36  ;;  %v4233_v16 = vmax.f32 %v3743_v45, %v6269_v23 }
 0x2c9   : > { %v4645_v2 = vsel %vm4644_vm11, %v4407_v26, %v4643_v59  ;;  %v4411_v52 = vrot.slane %v4231_v58, %v8813_v39  ;;  %v3604_v50 = vadd.f32 %v8807_v51, %v3565_v38  ;;  %v3570_v17 = vadd.f32 %v7149_v53, %v8828_v42  ;;  %v7154_v3 = vpop.f32.mrf.mxu1 }
 0x2ca   : > { %4704 = vst.msk [vmem:[#allocation3 + $0x11] sm:$0xff] %vm679_vm2, %v4645_v2  ;;  %v4234_v32 = vmax.f32 %v3745_v37, %v6270_v11  ;;  %v4415_v9 = vrot.slane %v4232_v48, %v8813_v39  ;;  %v4419_v15 = vrot.slane %v4233_v16, %v8813_v39  ;;  %v3568_v21 = vadd.f32 %v3465_v0, %v8833_v5 }
 0x2cb   : > { %v3636_v47 = vmax.f32 %v3604_v50, 0.0  ;;  %v3609_v45 = vadd.f32 %v8807_v51, %v3570_v17  ;;  %v3571_v60 = vadd.f32 %v7150_v62, %v8837_v19  ;;  %v3569_v27 = vadd.f32 %v3468_v55, %v8841_v12  ;;  %v8966_v62 = vpop.f32.mrf.mxu1 }
 0x2cc   : > { %v4423_v1 = vrot.slane %v4234_v32, %v8813_v39  ;;  %v4646_v42 = vsel %vm4632_vm5, %v4415_v9, %v4411_v52  ;;  %v3607_v53 = vadd.f32 %v8807_v51, %v3568_v21  ;;  %v3574_v8 = vadd.f32 %v7153_v20, %v8845_v56 }
 0x2cd   : > { %v4647_v35 = vsel %vm4634_vm6, %v4419_v15, %v4646_v42  ;;  %v3666_v4 = vmax.f32 %v3636_v47, %v3638_v57  ;;  %v3641_v5 = vmax.f32 %v3609_v45, 0.0  ;;  %v3610_v0 = vadd.f32 %v8807_v51, %v3571_v60 }
 0x2ce   : > { %v4648_v37 = vsel %vm4636_vm7, %v4423_v1, %v4647_v35  ;;  %v3639_v36 = vmax.f32 %v3607_v53, 0.0  ;;  %v3608_v19 = vadd.f32 %v8807_v51, %v3569_v27  ;;  %v8964_v12 = vadd.f32 %v8807_v51, %v3574_v8 }
 0x2cf   : > { %v3746_v55 = vcombine.high %v3666_v4, %v3666_v4  ;;  %v3753_v23 = vrot.slane %v3666_v4, %v8809_v40  ;;  %v3642_v56 = vmax.f32 %v3610_v0, 0.0  ;;  %v3572_v20 = vadd.f32 %v3481_v41, %v8849_v46  ;;  %v7157_v46 = vpop.f32.mrf.mxu1 }
 0x2d0   : > { %v3667_v57 = vmax.f32 %v3639_v36, %v3641_v5  ;;  %v3640_v26 = vmax.f32 %v3608_v19, 0.0  ;;  %v3645_v6 = vmax.f32 %v8964_v12, 0.0  ;;  %v3575_v58 = vadd.f32 %v7154_v3, %v8853_v7 }
 0x2d1   : > { %v3760_v38 = vrot.slane %v3746_v55, %v8809_v40  ;;  %v3761_v59 = vcombine.high %v3753_v23, %v3753_v23  ;;  %v6271_v11 = vrot.slane %v3753_v23, 9  ;;  %v3611_v48 = vadd.f32 %v8807_v51, %v3572_v20  ;;  %v3497_v35 = vpop.f32.mrf.mxu1 }
 0x2d2   : > { %v3763_v16 = vcombine.high %v3667_v57, %v3667_v57  ;;  %v3770_v2 = vrot.slane %v3667_v57, %v8809_v40  ;;  %v3668_v52 = vmax.f32 %v3640_v26, %v3642_v56  ;;  %v8976_v50 = vadd.f32 %v8807_v51, %v3575_v58 }
 0x2d3   : > { %v3762_v41 = vcombine.high %v3760_v38, %v3760_v38  ;;  %v6272_v17 = vrot.slane %v3761_v59, 9  ;;  %v6273_v32 = vrot.slane %v3760_v38, 9  ;;  %v4235_v9 = vmax.f32 %v3753_v23, %v6271_v11  ;;  %v7158_v11 = vpop.f32.mrf.mxu1 }
 0x2d4   : > { %v3777_v7 = vrot.slane %v3763_v16, %v8809_v40  ;;  %v3778_v15 = vcombine.high %v3770_v2, %v3770_v2  ;;  %v6275_v21 = vrot.slane %v3770_v2, 9  ;;  %v3780_v3 = vcombine.high %v3668_v52, %v3668_v52 }
 0x2d5   : > { %v6274_v47 = vrot.slane %v3762_v41, 9  ;;  %v4236_v45 = vmax.f32 %v3761_v59, %v6272_v17  ;;  %v4237_v60 = vmax.f32 %v3760_v38, %v6273_v32  ;;  %v4427_v27 = vrot.slane %v4235_v9, %v8813_v39 }
 0x2d6   : > { %v3779_v1 = vcombine.high %v3777_v7, %v3777_v7  ;;  %v6276_v42 = vrot.slane %v3778_v15, 9  ;;  %v6277_v53 = vrot.slane %v3777_v7, 9  ;;  %v4239_v8 = vmax.f32 %v3770_v2, %v6275_v21 }
 0x2d7   : > { %v4238_v4 = vmax.f32 %v3762_v41, %v6274_v47  ;;  %v4431_v5 = vrot.slane %v4236_v45, %v8813_v39  ;;  %v4435_v0 = vrot.slane %v4237_v60, %v8813_v39  ;;  %v4649_v36 = vsel %vm4638_vm8, %v4427_v27, %v4648_v37 }
 0x2d8   : > { %v6278_v19 = vrot.slane %v3779_v1, 9  ;;  %v4240_v12 = vmax.f32 %v3778_v15, %v6276_v42  ;;  %v4241_v55 = vmax.f32 %v3777_v7, %v6277_v53  ;;  %v4443_v23 = vrot.slane %v4239_v8, %v8813_v39  ;;  %v3500_v42 = vpop.f32.mrf.mxu1 }
 0x2d9   : > { %v4439_v56 = vrot.slane %v4238_v4, %v8813_v39  ;;  %v4650_v20 = vsel %vm4640_vm9, %v4431_v5, %v4649_v36  ;;  %v3787_v57 = vrot.slane %v3668_v52, %v8809_v40  ;;  %v3794_v26 = vrot.slane %v3780_v3, %v8809_v40 }
 0x2da   : > { %v4651_v58 = vsel %vm4642_vm10, %v4435_v0, %v4650_v20  ;;  %v4242_v38 = vmax.f32 %v3779_v1, %v6278_v19  ;;  %v4447_v59 = vrot.slane %v4240_v12, %v8813_v39  ;;  %v4451_v37 = vrot.slane %v4241_v55, %v8813_v39 }
 0x2db   : > { %v4652_v16 = vsel %vm4644_vm11, %v4439_v56, %v4651_v58  ;;  %v3795_v2 = vcombine.high %v3787_v57, %v3787_v57  ;;  %v3796_v41 = vcombine.high %v3794_v26, %v3794_v26  ;;  %v6279_v17 = vrot.slane %v3787_v57, 9 }
 0x2dc   : > { %4705 = vst.msk [vmem:[#allocation3 + $0x21] sm:$0xff] %vm679_vm2, %v4652_v16  ;;  %v4455_v32 = vrot.slane %v4242_v38, %v8813_v39  ;;  %v4653_v52 = vsel %vm4632_vm5, %v4447_v59, %v4443_v23  ;;  %v6281_v9 = vrot.slane %v3794_v26, 9  ;;  %v3643_v7 = vmax.f32 %v3611_v48, 0.0 }
 0x2dd   : > { %v4654_v15 = vsel %vm4634_vm6, %v4451_v37, %v4653_v52  ;;  %v6280_v21 = vrot.slane %v3795_v2, 9  ;;  %v6282_v3 = vrot.slane %v3796_v41, 9  ;;  %v4243_v47 = vmax.f32 %v3787_v57, %v6279_v17 }
 0x2de   : > { %v4245_v45 = vmax.f32 %v3794_v26, %v6281_v9  ;;  %v4655_v60 = vsel %vm4636_vm7, %v4455_v32, %v4654_v15  ;;  %v3669_v27 = vmax.f32 %v3643_v7, %v3645_v6  ;;  %v3646_v1 = vmax.f32 %v8976_v50, 0.0 }
 0x2df   : > { %v4244_v53 = vmax.f32 %v3795_v2, %v6280_v21  ;;  %v4246_v8 = vmax.f32 %v3796_v41, %v6282_v3  ;;  %v4459_v4 = vrot.slane %v4243_v47, %v8813_v39  ;;  %v3573_v5 = vadd.f32 %v8966_v62, %v8858_v61  ;;  %v9010_v62 = vpop.f32.mrf.mxu1 }
 0x2e0   : > { %v4467_v48 = vrot.slane %v4245_v45, %v8813_v39  ;;  %v3797_v0 = vcombine.high %v3669_v27, %v3669_v27  ;;  %v3804_v36 = vrot.slane %v3669_v27, %v8809_v40  ;;  %v3578_v19 = vadd.f32 %v7157_v46, %v8862_v54 }
 0x2e1   : > { %v4463_v12 = vrot.slane %v4244_v53, %v8813_v39  ;;  %v4471_v6 = vrot.slane %v4246_v8, %v8813_v39  ;;  %v4656_v50 = vsel %vm4638_vm8, %v4459_v4, %v4655_v60  ;;  %v3612_v55 = vadd.f32 %v8807_v51, %v3573_v5 }
 0x2e2   : > { %v3811_v23 = vrot.slane %v3797_v0, %v8809_v40  ;;  %v3812_v56 = vcombine.high %v3804_v36, %v3804_v36  ;;  %v6283_v20 = vrot.slane %v3804_v36, 9  ;;  %v3617_v61 = vadd.f32 %v8807_v51, %v3578_v19 }
 0x2e3   : > { %v4657_v57 = vsel %vm4640_vm9, %v4463_v12, %v4656_v50  ;;  %v3644_v26 = vmax.f32 %v3612_v55, 0.0  ;;  %v3576_v54 = vadd.f32 %v3497_v35, %v8866_v18  ;;  %v3579_v46 = vadd.f32 %v7158_v11, %v8870_v24  ;;  %v9019_v18 = vpop.f32.mrf.mxu1 }
 0x2e4   : > { %v4658_v58 = vsel %vm4642_vm10, %v4467_v48, %v4657_v57  ;;  %v3813_v38 = vcombine.high %v3811_v23, %v3811_v23  ;;  %v6284_v59 = vrot.slane %v3812_v56, 9  ;;  %v6285_v37 = vrot.slane %v3811_v23, 9 }
 0x2e5   : > { %v4659_v16 = vsel %vm4644_vm11, %v4471_v6, %v4658_v58  ;;  %v4247_v2 = vmax.f32 %v3804_v36, %v6283_v20  ;;  %v3670_v41 = vmax.f32 %v3644_v26, %v3646_v1  ;;  %v3649_v17 = vmax.f32 %v3617_v61, 0.0  ;;  %v9030_v0 = vpop.f32.mrf.mxu1 }
 0x2e6   : > { %4706 = vst.msk [vmem:[#allocation3 + $0x31] sm:$0xff] %vm679_vm2, %v4659_v16  ;;  %v6286_v32 = vrot.slane %v3813_v38, 9  ;;  %v4248_v52 = vmax.f32 %v3812_v56, %v6284_v59  ;;  %v4249_v9 = vmax.f32 %v3811_v23, %v6285_v37  ;;  %v3615_v7 = vadd.f32 %v8807_v51, %v3576_v54 }
 0x2e7   : > { %v4475_v24 = vrot.slane %v4247_v2, %v8813_v39  ;;  %v3814_v35 = vcombine.high %v3670_v41, %v3670_v41  ;;  %v3821_v11 = vrot.slane %v3670_v41, %v8809_v40  ;;  %v3618_v15 = vadd.f32 %v8807_v51, %v3579_v46  ;;  %v3516_v58 = vpop.f32.mrf.mxu1 }
 0x2e8   : > { %v4250_v21 = vmax.f32 %v3813_v38, %v6286_v32  ;;  %v4479_v3 = vrot.slane %v4248_v52, %v8813_v39  ;;  %v4483_v47 = vrot.slane %v4249_v9, %v8813_v39  ;;  %v3647_v45 = vmax.f32 %v3615_v7, 0.0 }
 0x2e9   : > { %v3828_v60 = vrot.slane %v3814_v35, %v8809_v40  ;;  %v3829_v27 = vcombine.high %v3821_v11, %v3821_v11  ;;  %v6287_v1 = vrot.slane %v3821_v11, 9  ;;  %v3650_v53 = vmax.f32 %v3618_v15, 0.0  ;;  %v4732_v35 = vld [vmem:[#allocation3 + $0x1] sm:$0xff] }
 0x2ea   : > { %v4487_v8 = vrot.slane %v4250_v21, %v8813_v39  ;;  %v4660_v4 = vsel %vm4632_vm5, %v4479_v3, %v4475_v24  ;;  %v3671_v5 = vmax.f32 %v3647_v45, %v3649_v17  ;;  %v3577_v48 = vadd.f32 %v3500_v42, %v8875_v10  ;;  %v4712_v45 = vld [vmem:[#allocation3] sm:$0xff] }
 0x2eb   : > { %v4661_v36 = vsel %vm4634_vm6, %v4483_v47, %v4660_v4  ;;  %v3830_v19 = vcombine.high %v3828_v60, %v3828_v60  ;;  %v6288_v12 = vrot.slane %v3829_v27, 9  ;;  %v6289_v6 = vrot.slane %v3828_v60, 9 }
 0x2ec   : > { %v4251_v50 = vmax.f32 %v3821_v11, %v6287_v1  ;;  %v4662_v55 = vsel %vm4636_vm7, %v4487_v8, %v4661_v36  ;;  %v3831_v23 = vcombine.high %v3671_v5, %v3671_v5  ;;  %v3838_v56 = vrot.slane %v3671_v5, %v8809_v40  ;;  %v9043_v11 = vld [vmem:[#allocation3 + $0x11] sm:$0xff] }
 0x2ed   : > { %v6290_v20 = vrot.slane %v3830_v19, 9  ;;  %v4252_v61 = vmax.f32 %v3829_v27, %v6288_v12  ;;  %v4253_v57 = vmax.f32 %v3828_v60, %v6289_v6  ;;  %v3616_v26 = vadd.f32 %v8807_v51, %v3577_v48  ;;  %v9046_v60 = vld [vmem:[#allocation3 + $0x10] sm:$0xff]  ;;  %v7165_v27 = vpop.f32.mrf.mxu1 }
 0x2ee   : > { %v4491_v10 = vrot.slane %v4251_v50, %v8813_v39  ;;  %v3845_v42 = vrot.slane %v3831_v23, %v8809_v40  ;;  %v3846_v54 = vcombine.high %v3838_v56, %v3838_v56  ;;  %v6291_v46 = vrot.slane %v3838_v56, 9 }
 0x2ef   : > { %v4254_v38 = vmax.f32 %v3830_v19, %v6290_v20  ;;  %v4495_v59 = vrot.slane %v4252_v61, %v8813_v39  ;;  %v4499_v37 = vrot.slane %v4253_v57, %v8813_v39  ;;  %v3648_v16 = vmax.f32 %v3616_v26, 0.0  ;;  %v3529_v57 = vpop.f32.mrf.mxu1 }
 0x2f0   : > { %v4663_v2 = vsel %vm4638_vm8, %v4491_v10, %v4662_v55  ;;  %v3847_v41 = vcombine.high %v3845_v42, %v3845_v42  ;;  %v6292_v17 = vrot.slane %v3846_v54, 9  ;;  %v6293_v32 = vrot.slane %v3845_v42, 9 }
 0x2f1   : > { %v4503_v52 = vrot.slane %v4254_v38, %v8813_v39  ;;  %v4664_v9 = vsel %vm4640_vm9, %v4495_v59, %v4663_v2  ;;  %v4255_v7 = vmax.f32 %v3838_v56, %v6291_v46  ;;  %v3672_v24 = vmax.f32 %v3648_v16, %v3650_v53 }
 0x2f2   : > { %v4665_v15 = vsel %vm4642_vm10, %v4499_v37, %v4664_v9  ;;  %v6294_v21 = vrot.slane %v3847_v41, 9  ;;  %v4256_v3 = vmax.f32 %v3846_v54, %v6292_v17  ;;  %v4257_v47 = vmax.f32 %v3845_v42, %v6293_v32  ;;  %v7166_v32 = vpop.f32.mrf.mxu1 }
 0x2f3   : > { %v4666_v1 = vsel %vm4644_vm11, %v4503_v52, %v4665_v15  ;;  %v4507_v8 = vrot.slane %v4255_v7, %v8813_v39  ;;  %v3848_v4 = vcombine.high %v3672_v24, %v3672_v24  ;;  %v3855_v5 = vrot.slane %v3672_v24, %v8809_v40 }
 0x2f4   : > { %4707 = vst.msk [vmem:[#allocation3 + $0x41] sm:$0xff] %vm679_vm2, %v4666_v1  ;;  %v4258_v53 = vmax.f32 %v3847_v41, %v6294_v21  ;;  %v4511_v48 = vrot.slane %v4256_v3, %v8813_v39  ;;  %v4515_v36 = vrot.slane %v4257_v47, %v8813_v39  ;;  %v4740_v19 = vpack.c.bf16 %v9043_v11, %v4732_v35 }
 0x2f5   : > { %v3862_v12 = vrot.slane %v3848_v4, %v8809_v40  ;;  %v3863_v6 = vcombine.high %v3855_v5, %v3855_v5  ;;  %v6295_v50 = vrot.slane %v3855_v5, 9  ;;  %v4720_v55 = vpack.c.bf16 %v9046_v60, %v4712_v45  ;;  %v3532_v4 = vpop.f32.mrf.mxu1 }
 0x2f6   : > { %v4519_v23 = vrot.slane %v4258_v53, %v8813_v39  ;;  %v4667_v56 = vsel %vm4632_vm5, %v4511_v48, %v4507_v8  ;;  %7179 = vmatprep.mubr.msk.bf16.mxu0 %vm679_vm2, %v4740_v19  ;;  %v3582_v20 = vadd.f32 %v9010_v62, %v8879_v33  ;;  %v3580_v61 = vadd.f32 %v9019_v18, %v8883_v28 }
 0x2f7   : > { %v4668_v26 = vsel %vm4634_vm6, %v4515_v36, %v4667_v56  ;;  %v3864_v10 = vcombine.high %v3862_v12, %v3862_v12  ;;  %v6296_v42 = vrot.slane %v3863_v6, 9  ;;  %v6297_v54 = vrot.slane %v3862_v12, 9  ;;  %7195 = vmatprep.mubr.msk.bf16.mxu1 %vm679_vm2, %v4720_v55 }
 0x2f8   : > { %v4259_v46 = vmax.f32 %v3855_v5, %v6295_v50  ;;  %v4669_v38 = vsel %vm4636_vm7, %v4519_v23, %v4668_v26  ;;  %v3621_v59 = vadd.f32 %v8807_v51, %v3582_v20  ;;  %v3619_v37 = vadd.f32 %v8807_v51, %v3580_v61 }
 0x2f9   : > { %v6298_v16 = vrot.slane %v3864_v10, 9  ;;  %v4260_v33 = vmax.f32 %v3863_v6, %v6296_v42  ;;  %v4261_v62 = vmax.f32 %v3862_v12, %v6297_v54  ;;  %v3583_v28 = vadd.f32 %v9030_v0, %v8887_v22  ;;  %v7169_v42 = vpop.f32.mrf.mxu1 }
 0x2fa   : > { %v4523_v18 = vrot.slane %v4259_v46, %v8813_v39  ;;  %v3653_v2 = vmax.f32 %v3621_v59, 0.0  ;;  %v3651_v41 = vmax.f32 %v3619_v37, 0.0  ;;  %v3581_v17 = vadd.f32 %v3516_v58, %v8891_v44 }
 0x2fb   : > { %v4262_v52 = vmax.f32 %v3864_v10, %v6298_v16  ;;  %v4527_v9 = vrot.slane %v4260_v33, %v8813_v39  ;;  %v4531_v7 = vrot.slane %v4261_v62, %v8813_v39  ;;  %v3622_v24 = vadd.f32 %v8807_v51, %v3583_v28 }
 0x2fc   : > { %v4670_v35 = vsel %vm4638_vm8, %v4523_v18, %v4669_v38  ;;  %v3673_v15 = vmax.f32 %v3651_v41, %v3653_v2  ;;  %v3620_v21 = vadd.f32 %v8807_v51, %v3581_v17  ;;  %v3586_v22 = vadd.f32 %v7165_v27, %v8896_v34 }
 0x2fd   : > { %v4535_v0 = vrot.slane %v4262_v52, %v8813_v39  ;;  %v4671_v3 = vsel %vm4640_vm9, %v4527_v9, %v4670_v35  ;;  %v3654_v44 = vmax.f32 %v3622_v24, 0.0  ;;  %v3584_v58 = vadd.f32 %v3529_v57, %v8900_v14  ;;  %v3545_v9 = vpop.f32.mrf.mxu1 }
 0x2fe   : > { %v4672_v47 = vsel %vm4642_vm10, %v4531_v7, %v4671_v3  ;;  %v3865_v45 = vcombine.high %v3673_v15, %v3673_v15  ;;  %v3872_v1 = vrot.slane %v3673_v15, %v8809_v40  ;;  %v3652_v8 = vmax.f32 %v3620_v21, 0.0 }
 0x2ff   : > { %v4673_v5 = vsel %vm4644_vm11, %v4535_v0, %v4672_v47  ;;  %v3625_v53 = vadd.f32 %v8807_v51, %v3586_v22  ;;  %v3623_v34 = vadd.f32 %v8807_v51, %v3584_v58  ;;  %v3587_v27 = vadd.f32 %v7166_v32, %v8903_v63 }
 0x300   : > { %4708 = vst.msk [vmem:[#allocation3 + $0x51] sm:$0xff] %vm679_vm2, %v4673_v5  ;;  %v3879_v48 = vrot.slane %v3865_v45, %v8809_v40  ;;  %v3880_v14 = vcombine.high %v3872_v1, %v3872_v1  ;;  %v6299_v36 = vrot.slane %v3872_v1, 9  ;;  %v3674_v19 = vmax.f32 %v3652_v8, %v3654_v44 }
 0x301   : > { %v3657_v12 = vmax.f32 %v3625_v53, 0.0  ;;  %v3655_v6 = vmax.f32 %v3623_v34, 0.0  ;;  %v9091_v50 = vadd.f32 %v8807_v51, %v3587_v27  ;;  %v3585_v55 = vadd.f32 %v3532_v4, %v8908_v49  ;;  %v7170_v53 = vpop.f32.mrf.mxu1 }
 0x302   : > { %v3881_v23 = vcombine.high %v3879_v48, %v3879_v48  ;;  %v6300_v56 = vrot.slane %v3880_v14, 9  ;;  %v6301_v20 = vrot.slane %v3879_v48, 9  ;;  %v4263_v61 = vmax.f32 %v3872_v1, %v6299_v36  ;;  %v9110_v36 = vld [vmem:[#allocation3 + $0x31] sm:$0xff] }
 0x303   : > { %v3882_v57 = vcombine.high %v3674_v19, %v3674_v19  ;;  %v3889_v63 = vrot.slane %v3674_v19, %v8809_v40  ;;  %v3675_v26 = vmax.f32 %v3655_v6, %v3657_v12  ;;  %v3658_v10 = vmax.f32 %v9091_v50, 0.0  ;;  %v3226_v19 = vpop.f32.mrf.mxu0 }
 0x304   : > { %v6302_v54 = vrot.slane %v3881_v23, 9  ;;  %v4264_v46 = vmax.f32 %v3880_v14, %v6300_v56  ;;  %v4265_v38 = vmax.f32 %v3879_v48, %v6301_v20  ;;  %v4539_v59 = vrot.slane %v4263_v61, %v8813_v39  ;;  %v9115_v20 = vld [vmem:[#allocation3 + $0x30] sm:$0xff] }
 0x305   : > { %v3896_v37 = vrot.slane %v3882_v57, %v8809_v40  ;;  %v3897_v16 = vcombine.high %v3889_v63, %v3889_v63  ;;  %v6303_v49 = vrot.slane %v3889_v63, 9  ;;  %v3899_v33 = vcombine.high %v3675_v26, %v3675_v26 }
 0x306   : > { %v4266_v62 = vmax.f32 %v3881_v23, %v6302_v54  ;;  %v4543_v28 = vrot.slane %v4264_v46, %v8813_v39  ;;  %v4547_v18 = vrot.slane %v4265_v38, %v8813_v39  ;;  %v3906_v2 = vrot.slane %v3675_v26, %v8809_v40  ;;  %v9119_v54 = vld [vmem:[#allocation3 + $0x21] sm:$0xff] }
 0x307   : > { %v3898_v41 = vcombine.high %v3896_v37, %v3896_v37  ;;  %v6304_v17 = vrot.slane %v3897_v16, 9  ;;  %v6305_v32 = vrot.slane %v3896_v37, 9  ;;  %v4267_v52 = vmax.f32 %v3889_v63, %v6303_v49  ;;  %v9129_v49 = vld [vmem:[#allocation3 + $0x51] sm:$0xff] }
 0x308   : > { %v4551_v7 = vrot.slane %v4266_v62, %v8813_v39  ;;  %v4674_v24 = vsel %vm4632_vm5, %v4543_v28, %v4539_v59  ;;  %v3913_v35 = vrot.slane %v3899_v33, %v8809_v40  ;;  %v3914_v15 = vcombine.high %v3906_v2, %v3906_v2 }
 0x309   : > { %v4675_v21 = vsel %vm4634_vm6, %v4547_v18, %v4674_v24  ;;  %v6306_v22 = vrot.slane %v3898_v41, 9  ;;  %v4268_v0 = vmax.f32 %v3897_v16, %v6304_v17  ;;  %v4269_v3 = vmax.f32 %v3896_v37, %v6305_v32  ;;  %v3548_v16 = vpop.f32.mrf.mxu1 }
 0x30a   : > { %v4555_v44 = vrot.slane %v4267_v52, %v8813_v39  ;;  %v4676_v58 = vsel %vm4636_vm7, %v4551_v7, %v4675_v21  ;;  %v3915_v47 = vcombine.high %v3913_v35, %v3913_v35  ;;  %v6307_v45 = vrot.slane %v3906_v2, 9  ;;  %v9149_v52 = vld [vmem:[#allocation3 + $0x41] sm:$0xff]  ;;  %v9151_v7 = vld [vmem:[#allocation3 + $0x50] sm:$0xff] }
 0x30b   : > { %v4270_v1 = vmax.f32 %v3898_v41, %v6306_v22  ;;  %v4559_v8 = vrot.slane %v4268_v0, %v8813_v39  ;;  %v4563_v4 = vrot.slane %v4269_v3, %v8813_v39  ;;  %v6308_v5 = vrot.slane %v3914_v15, 9  ;;  %v7406_v3 = vld [vmem:[%s9455_s5 + $0x48] sm:$0xff]  }
 0x30c   : > { %v4677_v34 = vsel %vm4638_vm8, %v4555_v44, %v4676_v58  ;;  %v6309_v27 = vrot.slane %v3913_v35, 9  ;;  %v6310_v48 = vrot.slane %v3915_v47, 9  ;;  %v4271_v14 = vmax.f32 %v3906_v2, %v6307_v45  ;;  %v7404_v2 = vld [vmem:[%s9455_s5 + $0x50] sm:$0xff]  }
 0x30d   : > { %v4567_v12 = vrot.slane %v4270_v1, %v8813_v39  ;;  %v4678_v6 = vsel %vm4640_vm9, %v4559_v8, %v4677_v34  ;;  %v4272_v23 = vmax.f32 %v3914_v15, %v6308_v5  ;;  %v3624_v56 = vadd.f32 %v8807_v51, %v3585_v55  ;;  %v9127_v55 = vld [vmem:[#allocation3 + $0x20] sm:$0xff] }
 0x30e   : > { %v4679_v61 = vsel %vm4642_vm10, %v4563_v4, %v4678_v6  ;;  %v4273_v57 = vmax.f32 %v3913_v35, %v6309_v27  ;;  %v4274_v63 = vmax.f32 %v3915_v47, %v6310_v48  ;;  %v4571_v26 = vrot.slane %v4271_v14, %v8813_v39  ;;  %v9167_v15 = vld [vmem:[#allocation3 + $0x40] sm:$0xff]  ;;  %v7408_v14 = vld [vmem:[%s9455_s5 + $0x40] sm:$0xff]  }
 0x30f   : > { %v4680_v46 = vsel %vm4644_vm11, %v4567_v12, %v4679_v61  ;;  %v4575_v38 = vrot.slane %v4272_v23, %v8813_v39  ;;  %v3656_v59 = vmax.f32 %v3624_v56, 0.0  ;;  %v9125_v37 = vpack.c.bf16 %v9110_v36, %v9119_v54  ;;  %v7409_v56 = vld [vmem:[%s9455_s5 + $0x60] sm:$0xff]  }
 0x310   : > { %v3267_v33 = vadd.f32 %v3226_v19, %v8802_v25  ;;  %4709 = vst.msk [vmem:[#allocation3 + $0x61] sm:$0xff] %vm679_vm2, %v4680_v46  ;;  %v4579_v62 = vrot.slane %v4273_v57, %v8813_v39  ;;  %v9136_v28 = vpack.c.bf16 %v9115_v20, %v9127_v55  ;;  %v3590_v18 = vadd.f32 %v7169_v42, %v8911_v31  ;;  %v7405_v31 = vld [vmem:[%s9455_s5 + $0x70] sm:$0xff]  }
 0x311   : > { %v4681_v41 = vsel %vm4632_vm5, %v4575_v38, %v4571_v26  ;;  %v3676_v17 = vmax.f32 %v3656_v59, %v3658_v10  ;;  %7180 = vmatmul.mubr.msk.bf16.vlgmr.msra.gmra.mxu0 %vm679_vm2, %v9125_v37  ;;  %v3588_v25 = vadd.f32 %v3545_v9, %v8914_v13  ;;  %v3591_v32 = vadd.f32 %v7170_v53, %v8918_v30 }
 0x312   : > { %v4583_v42 = vrot.slane %v4274_v63, %v8813_v39  ;;  %7196 = vmatmul.mubr.msk.bf16.vlgmr.msra.gmra.mxu1 %vm679_vm2, %v9136_v28  ;;  %v3629_v50 = vadd.f32 %v8807_v51, %v3590_v18  ;;  %v3589_v10 = vadd.f32 %v3548_v16, %v3267_v33  ;;  %v9162_v13 = vpack.c.bf16 %v9129_v49, %v9149_v52 }
 0x313   : > { %v4682_v30 = vsel %vm4634_vm6, %v4579_v62, %v4681_v41  ;;  %v3916_v9 = vcombine.high %v3676_v17, %v3676_v17  ;;  %v3923_v24 = vrot.slane %v3676_v17, %v8809_v40  ;;  %v3627_v35 = vadd.f32 %v8807_v51, %v3588_v25  ;;  %7204 = vmatpush3.bf16.msra.mxu0 %v8784_v43  ;;  %v9206_v41 = vld [vmem:[%s9455_s5 + $0x98] sm:$0xff]  }
 0x314   : > { %v3630_v21 = vadd.f32 %v8807_v51, %v3591_v32  ;;  %v3628_v22 = vadd.f32 %v8807_v51, %v3589_v10  ;;  %7183 = vmatprep.mubr.msk.bf16.mxu0 %vm679_vm2, %v9162_v13  ;;  %v9176_v0 = vpack.c.bf16 %v9151_v7, %v9167_v15  ;;  %7220 = vmatpush3.bf16.msra.mxu1 %v8789_v29  ;;  %v7407_v51 = vld [vmem:[%s9455_s5 + $0x68] sm:$0xff]   ;;  %v3661_v45 = vmax.f32 %v3629_v50, 0.0 }
 0x315   : > { %v3930_v44 = vrot.slane %v3916_v9, %v8809_v40  ;;  %v3931_v43 = vcombine.high %v3923_v24, %v3923_v24  ;;  %v6311_v58 = vrot.slane %v3923_v24, 9  ;;  %v3659_v47 = vmax.f32 %v3627_v35, 0.0  ;;  %7205 = vmatprep.subr.bf16.mxu0 %v7404_v2  ;;  %7221 = vmatprep.subr.bf16.mxu1 %v7405_v31 }
 0x316   : > { %v3662_v1 = vmax.f32 %v3630_v21, 0.0  ;;  %v3660_v8 = vmax.f32 %v3628_v22, 0.0  ;;  %7199 = vmatprep.mubr.msk.bf16.mxu1 %vm679_vm2, %v9176_v0  ;;  %v4683_v34 = vsel %vm4636_vm7, %v4583_v42, %v4682_v30  ;;  %v9213_v42 = vld [vmem:[%s9455_s5 + $0xb8] sm:$0xff]  }
 0x317   : > { %v3932_v29 = vcombine.high %v3930_v44, %v3930_v44  ;;  %v6312_v4 = vrot.slane %v3931_v43, 9  ;;  %v6313_v5 = vrot.slane %v3930_v44, 9  ;;  %v4275_v53 = vmax.f32 %v3923_v24, %v6311_v58  ;;  %7206 = vmatpush3.bf16.msra.mxu0 %v7404_v2 }
 0x318   : > { %v3677_v27 = vmax.f32 %v3659_v47, %v3661_v45  ;;  %v3678_v48 = vmax.f32 %v3660_v8, %v3662_v1  ;;  %7222 = vmatpush3.bf16.msra.mxu1 %v7405_v31  ;;  %7207 = vmatprep.subr.bf16.mxu0 %v7406_v3 }
 0x319   : > { %v6314_v19 = vrot.slane %v3932_v29, 9  ;;  %v4276_v12 = vmax.f32 %v3931_v43, %v6312_v4  ;;  %v4277_v6 = vmax.f32 %v3930_v44, %v6313_v5  ;;  %v4587_v23 = vrot.slane %v4275_v53, %v8813_v39  ;;  %7223 = vmatprep.subr.bf16.mxu1 %v7407_v51 }
 0x31a   : > { %v3933_v61 = vcombine.high %v3677_v27, %v3677_v27  ;;  %v3940_v57 = vrot.slane %v3677_v27, %v8809_v40  ;;  %v3950_v63 = vcombine.high %v3678_v48, %v3678_v48  ;;  %v3957_v26 = vrot.slane %v3678_v48, %v8809_v40 }
 0x31b   : > { %v4278_v46 = vmax.f32 %v3932_v29, %v6314_v19  ;;  %v4591_v38 = vrot.slane %v4276_v12, %v8813_v39  ;;  %v4595_v59 = vrot.slane %v4277_v6, %v8813_v39  ;;  %v4684_v16 = vsel %vm4638_vm8, %v4587_v23, %v4683_v34  ;;  %7208 = vmatpush3.bf16.msra.mxu0 %v7406_v3  ;;  %v9231_v23 = vld [vmem:[#allocation3 + $0x61] sm:$0xff] }
 0x31c   : > { %v3947_v33 = vrot.slane %v3933_v61, %v8809_v40  ;;  %v3948_v62 = vcombine.high %v3940_v57, %v3940_v57  ;;  %v6315_v18 = vrot.slane %v3940_v57, 9  ;;  %v3964_v2 = vrot.slane %v3950_v63, %v8809_v40  ;;  %7224 = vmatpush3.bf16.msra.mxu1 %v7407_v51  ;;  %7209 = vmatprep.subr.bf16.mxu0 %v7408_v14  ;;  %v4956_v61 = vld [vmem:[#allocation3 + $0x12] sm:$0xff] }
 0x31d   : > { %v4599_v17 = vrot.slane %v4278_v46, %v8813_v39  ;;  %v4685_v25 = vsel %vm4640_vm9, %v4591_v38, %v4684_v16  ;;  %v3965_v32 = vcombine.high %v3957_v26, %v3957_v26  ;;  %v6319_v31 = vrot.slane %v3957_v26, 9  ;;  %7225 = vmatprep.subr.bf16.mxu1 %v7409_v56 }
 0x31e   : > { %v4686_v40 = vsel %vm4642_vm10, %v4595_v59, %v4685_v25  ;;  %v3949_v50 = vcombine.high %v3947_v33, %v3947_v33  ;;  %v6316_v10 = vrot.slane %v3948_v62, 9  ;;  %v6317_v30 = vrot.slane %v3947_v33, 9  ;;  %v4957_v25 = vld [vmem:[#allocation3 + $0x22] sm:$0xff] }
 0x31f   : > { %v4687_v9 = vsel %vm4644_vm11, %v4599_v17, %v4686_v40  ;;  %v4279_v24 = vmax.f32 %v3940_v57, %v6315_v18  ;;  %v3966_v35 = vcombine.high %v3964_v2, %v3964_v2  ;;  %v6320_v21 = vrot.slane %v3965_v32, 9  ;;  %7210 = vmatpush3.bf16.msra.mxu0 %v7408_v14  ;;  %v4960_v17 = vld [vmem:[#allocation3 + $0x52] sm:$0xff]  ;;  %v7412_v40 = vld [vmem:[%s9455_s5 + $0x90] sm:$0xff]  }
 0x320   : > { %4710 = vst.msk [vmem:[#allocation3 + $0x71] sm:$0xff] %vm679_vm2, %v4687_v9  ;;  %v6318_v22 = vrot.slane %v3949_v50, 9  ;;  %v4280_v3 = vmax.f32 %v3948_v62, %v6316_v10  ;;  %v4281_v44 = vmax.f32 %v3947_v33, %v6317_v30  ;;  %v6321_v43 = vrot.slane %v3964_v2, 9  ;;  %7226 = vmatpush3.bf16.msra.mxu1 %v7409_v56  ;;  %7235 = vmatprep.subr.bf16.mxu0 %v9206_v41  ;;  %v4955_v56 = vld [vmem:[#allocation3 + $0x2] sm:$0xff] }
 0x321   : > { %v4603_v58 = vrot.slane %v4279_v24, %v8813_v39  ;;  %v6322_v47 = vrot.slane %v3966_v35, 9  ;;  %v4283_v51 = vmax.f32 %v3957_v26, %v6319_v31  ;;  %v4284_v45 = vmax.f32 %v3965_v32, %v6320_v21  ;;  %7251 = vmatprep.subr.bf16.mxu1 %v9213_v42  ;;  %v4718_v26 = vld [vmem:[#allocation3 + $0x60] sm:$0xff]  ;;  %v7417_v21 = vld [vmem:[%s9455_s5 + $0xa0] sm:$0xff]  }
 0x322   : > { %v4282_v1 = vmax.f32 %v3949_v50, %v6318_v22  ;;  %v4607_v8 = vrot.slane %v4280_v3, %v8813_v39  ;;  %v4611_v29 = vrot.slane %v4281_v44, %v8813_v39  ;;  %v4285_v4 = vmax.f32 %v3964_v2, %v6321_v43  ;;  %v4958_v2 = vld [vmem:[#allocation3 + $0x32] sm:$0xff]  ;;  %v7413_v50 = vld [vmem:[%s9455_s5 + $0xb0] sm:$0xff]  }
 0x323   : > { %v4286_v5 = vmax.f32 %v3966_v35, %v6322_v47  ;;  %v4619_v53 = vrot.slane %v4283_v51, %v8813_v39  ;;  %v4623_v48 = vrot.slane %v4284_v45, %v8813_v39  ;;  %v4963_v33 = vpack.c.bf16 %v4956_v61, %v4955_v56  ;;  %v7416_v35 = vld [vmem:[%s9455_s5 + $0x80] sm:$0xff]   ;;  %v7420_v43 = vld [vmem:[%s9455_s5 + $0xd0] sm:$0xff]   ;;  %v7423_v45 = vld [vmem:[%s9455_s5 + $0xe8] sm:$0xff]  }
 0x324   : > { %v4615_v34 = vrot.slane %v4282_v1, %v8813_v39  ;;  %v4688_v27 = vsel %vm4632_vm5, %v4607_v8, %v4603_v58  ;;  %v4627_v19 = vrot.slane %v4285_v4, %v8813_v39  ;;  %v5093_v62 = vpack.c.bf16 %v9127_v55, %v9046_v60  ;;  %v4959_v55 = vld [vmem:[#allocation3 + $0x42] sm:$0xff]  ;;  %v7425_v4 = vld [vmem:[%s9455_s5 + $0xe0] sm:$0xff]  }
 0x325   : > { %v4689_v14 = vsel %vm4634_vm6, %v4611_v29, %v4688_v27  ;;  %v4631_v12 = vrot.slane %v4286_v5, %v8813_v39  ;;  %v9254_v32 = vpack.c.bf16 %v4958_v2, %v4957_v25  ;;  %v5094_v60 = vpack.c.bf16 %v9167_v15, %v9115_v20  ;;  %v7414_v20 = vld [vmem:[%s9455_s5 + $0x88] sm:$0xff]   ;;  %v7421_v51 = vld [vmem:[%s9455_s5 + $0xf0] sm:$0xff]   ;;  %v7424_v29 = vld [vmem:[%s9455_s5 + $0xc0] sm:$0xff]  }
 0x326   : > { %v4690_v6 = vsel %vm4636_vm7, %v4615_v34, %v4689_v14  ;;  %v9258_v31 = vpack.c.bf16 %v4960_v17, %v4959_v55  ;;  %v5095_v10 = vpack.c.bf16 %v4718_v26, %v9151_v7  ;;  %v7415_v7 = vld [vmem:[%s9455_s5 + $0xa8] sm:$0xff]   ;;  %v5223_v24 = vpack.c.bf16 %v9119_v54, %v9043_v11  ;;  %v7418_v11 = vld [vmem:[%s9455_s5 + $0xd8] sm:$0xff]   ;;  %v7429_v27 = vld [vmem:[%s9455_s5 + $0x100] sm:$0xff]  }
 0x327   : > { %v4691_v57 = vsel %vm4638_vm8, %v4619_v53, %v4690_v6  ;;  %v9234_v63 = vld [vmem:[#allocation3 + $0x71] sm:$0xff]  ;;  %v5353_v22 = vpack.c.bf16 %v4957_v25, %v4956_v61  ;;  %v7419_v54 = vld [vmem:[%s9455_s5 + $0xf8] sm:$0xff]   ;;  %v5224_v3 = vpack.c.bf16 %v9149_v52, %v9110_v36  ;;  %v5354_v44 = vpack.c.bf16 %v4959_v55, %v4958_v2  ;;  %v7427_v53 = vld [vmem:[%s9455_s5 + $0x110] sm:$0xff]  }
 0x328   : > { %v4719_v46 = vld [vmem:[#allocation3 + $0x70] sm:$0xff]  ;;  %v4692_v38 = vsel %vm4640_vm9, %v4623_v48, %v4691_v57  ;;  %v9239_v59 = vpack.c.bf16 %v9234_v63, %v9231_v23  ;;  %v5225_v58 = vpack.c.bf16 %v9231_v23, %v9129_v49  ;;  %v7422_v36 = vld [vmem:[%s9455_s5 + $0xc8] sm:$0xff]   ;;  %v7426_v5 = vld [vmem:[%s9455_s5 + $0x118] sm:$0xff]  }
 0x329   : > { %v9241_v16 = vpack.c.bf16 %v4719_v46, %v4718_v26  ;;  %v4693_v39 = vsel %vm4642_vm10, %v4627_v19, %v4692_v38  ;;  %v4962_v15 = vld [vmem:[#allocation3 + $0x72] sm:$0xff] }
 0x32a   : > { %v4694_v18 = vsel %vm4644_vm11, %v4631_v12, %v4693_v39  ;;  %7184 = vmatmul.mubr.msk.bf16.gmra.mxu0 %vm679_vm2, %v9239_v59  ;;  %v5613_v34 = vld [vmem:[#allocation3 + $0x91] sm:$0xff] }
 0x32b   : > { %7200 = vmatmul.mubr.msk.bf16.gmra.mxu1 %vm679_vm2, %v9241_v16  ;;  %4711 = vst.msk [vmem:[#allocation3 + $0x81] sm:$0xff] %vm679_vm2, %v4694_v18  ;;  %7211 = vmatprep.mubr.msk.bf16.mxu0 %vm679_vm2, %v4963_v33  ;;  %v5743_v48 = vld [vmem:[#allocation3 + $0x92] sm:$0xff] }
 0x32c   : > { %7227 = vmatprep.mubr.msk.bf16.mxu1 %vm679_vm2, %v5093_v62 }
 0x332   : > { %7212 = vmatmul.mubr.msk.bf16.vlgmr.msra.gmra.mxu0 %vm679_vm2, %v9254_v32  ;;  %v9278_v30 = vld [vmem:[#allocation3 + $0x80] sm:$0xff] }
 0x333   : > { %7228 = vmatmul.mubr.msk.bf16.vlgmr.msra.gmra.mxu1 %vm679_vm2, %v5094_v60  ;;  %7236 = vmatpush3.bf16.msra.mxu0 %v9206_v41  ;;  %v4961_v41 = vld [vmem:[#allocation3 + $0x62] sm:$0xff] }
 0x334   : > { %7215 = vmatprep.mubr.msk.bf16.mxu0 %vm679_vm2, %v9258_v31  ;;  %7231 = vmatprep.mubr.msk.bf16.mxu1 %vm679_vm2, %v5095_v10  ;;  %v9283_v9 = vpack.c.bf16 %v4962_v15, %v4961_v41  ;;  %v5355_v47 = vpack.c.bf16 %v4961_v41, %v4960_v17  ;;  %v5222_v52 = vld [vmem:[#allocation3 + $0x81] sm:$0xff] }
 0x335   : > { %7252 = vmatpush3.bf16.msra.mxu1 %v9213_v42  ;;  %7237 = vmatprep.subr.bf16.mxu0 %v7412_v40  ;;  %v5096_v42 = vpack.c.bf16 %v9278_v30, %v4719_v46  ;;  %v5352_v49 = vld [vmem:[#allocation3 + $0x82] sm:$0xff]  ;;  %v5226_v1 = vpack.c.bf16 %v5222_v52, %v9234_v63 }
 0x336   : > { %7253 = vmatprep.subr.bf16.mxu1 %v7413_v50  ;;  %v5356_v8 = vpack.c.bf16 %v5352_v49, %v4962_v15  ;;  %v5747_v14 = vpack.c.bf16 %v5743_v48, %v5352_v49 }
 0x337   : > { %7238 = vmatpush3.bf16.msra.mxu0 %v7412_v40 }
 0x338   : > { %7239 = vmatprep.subr.bf16.mxu0 %v7414_v20 }
 0x339   : > { %7254 = vmatpush3.bf16.msra.mxu1 %v7413_v50 }
 0x33a   : > { %7255 = vmatprep.subr.bf16.mxu1 %v7415_v7  ;;  %7216 = vmatmul.mubr.msk.bf16.gmra.mxu0 %vm679_vm2, %v9283_v9 }
 0x33b   : > { %7232 = vmatmul.mubr.msk.bf16.gmra.mxu1 %vm679_vm2, %v5096_v42  ;;  %7240 = vmatpush3.bf16.msra.mxu0 %v7414_v20 }
 0x33c   : > { %7243 = vmatprep.mubr.msk.bf16.mxu0 %vm679_vm2, %v5223_v24  ;;  %7259 = vmatprep.mubr.msk.bf16.mxu1 %vm679_vm2, %v5353_v22 }
 0x33d   : > { %7256 = vmatpush3.bf16.msra.mxu1 %v7415_v7  ;;  %7241 = vmatprep.subr.bf16.mxu0 %v7416_v35 }
 0x33e   : > { %7257 = vmatprep.subr.bf16.mxu1 %v7417_v21 }
 0x33f   : > { %7242 = vmatpush3.bf16.msra.mxu0 %v7416_v35 }
 0x340   : > { %7267 = vmatprep.subr.bf16.mxu0 %v7418_v11 }
 0x341   : > { %7258 = vmatpush3.bf16.msra.mxu1 %v7417_v21 }
 0x342   : > { %7283 = vmatprep.subr.bf16.mxu1 %v7419_v54  ;;  %7244 = vmatmul.mubr.msk.bf16.vlgmr.msra.gmra.mxu0 %vm679_vm2, %v5224_v3 }
 0x343   : > { %7268 = vmatpush3.bf16.msra.mxu0 %v7418_v11  ;;  %7247 = vmatprep.mubr.msk.bf16.mxu0 %vm679_vm2, %v5225_v58 }
 0x344   : > { %7260 = vmatmul.mubr.msk.bf16.vlgmr.msra.gmra.mxu1 %vm679_vm2, %v5354_v44  ;;  %7269 = vmatprep.subr.bf16.mxu0 %v7420_v43 }
 0x345   : > { %7263 = vmatprep.mubr.msk.bf16.mxu1 %vm679_vm2, %v5355_v47  ;;  %7284 = vmatpush3.bf16.msra.mxu1 %v7419_v54 }
 0x346   : > { %7285 = vmatprep.subr.bf16.mxu1 %v7421_v51 }
 0x347   : > { %7270 = vmatpush3.bf16.msra.mxu0 %v7420_v43 }
 0x348   : > { %7271 = vmatprep.subr.bf16.mxu0 %v7422_v36 }
 0x349   : > { %7286 = vmatpush3.bf16.msra.mxu1 %v7421_v51 }
 0x34a   : > { %7248 = vmatmul.mubr.msk.bf16.gmra.mxu0 %vm679_vm2, %v5226_v1  ;;  %7287 = vmatprep.subr.bf16.mxu1 %v7423_v45 }
 0x34b   : > { %7272 = vmatpush3.bf16.msra.mxu0 %v7422_v36  ;;  %7275 = vmatprep.mubr.msk.bf16.mxu0 %vm679_vm2, %v9136_v28  ;;  %v5483_v28 = vld [vmem:[#allocation3 + $0x90] sm:$0xff] }
 0x34c   : > { %7264 = vmatmul.mubr.msk.bf16.gmra.mxu1 %vm679_vm2, %v5356_v8  ;;  %7273 = vmatprep.subr.bf16.mxu0 %v7424_v29 }
 0x34d   : > { %7291 = vmatprep.mubr.msk.bf16.mxu1 %vm679_vm2, %v9125_v37  ;;  %7288 = vmatpush3.bf16.msra.mxu1 %v7423_v45  ;;  %v7428_v37 = vld [vmem:[%s9455_s5 + $0x108] sm:$0xff]  }
 0x34e   : > { %7289 = vmatprep.subr.bf16.mxu1 %v7425_v4 }
 0x34f   : > { %7274 = vmatpush3.bf16.msra.mxu0 %v7424_v29 }
 0x350   : > { %7299 = vmatprep.subr.bf16.mxu0 %v7426_v5 }
 0x351   : > { %7290 = vmatpush3.bf16.msra.mxu1 %v7425_v4 }
 0x352   : > { %7276 = vmatmul.mubr.msk.bf16.vlgmr.msra.gmra.mxu0 %vm679_vm2, %v9176_v0  ;;  %v5487_v0 = vpack.c.bf16 %v5483_v28, %v9278_v30 }
 0x353   : > { %7300 = vmatpush3.bf16.msra.mxu0 %v7426_v5  ;;  %7279 = vmatprep.mubr.msk.bf16.mxu0 %vm679_vm2, %v9241_v16 }
 0x354   : > { %7292 = vmatmul.mubr.msk.bf16.vlgmr.msra.gmra.mxu1 %vm679_vm2, %v9162_v13  ;;  %7301 = vmatprep.subr.bf16.mxu0 %v7427_v53  ;;  %v5617_v13 = vpack.c.bf16 %v5613_v34, %v5222_v52 }
 0x355   : > { %7295 = vmatprep.mubr.msk.bf16.mxu1 %vm679_vm2, %v9239_v59 }
 0x357   : > { %7302 = vmatpush3.bf16.msra.mxu0 %v7427_v53 }
 0x358   : > { %7303 = vmatprep.subr.bf16.mxu0 %v7428_v37 }
 0x35a   : > { %7280 = vmatmul.mubr.msk.bf16.gmra.mxu0 %vm679_vm2, %v5487_v0 }
 0x35b   : > { %7304 = vmatpush3.bf16.msra.mxu0 %v7428_v37  ;;  %7307 = vmatprep.mubr.msk.bf16.mxu0 %vm679_vm2, %v9254_v32 }
 0x35c   : > { %7296 = vmatmul.mubr.msk.bf16.gmra.mxu1 %vm679_vm2, %v5617_v13  ;;  %7305 = vmatprep.subr.bf16.mxu0 %v7429_v27 }
 0x35f   : > { %7306 = vmatpush3.bf16.msra.mxu0 %v7429_v27 }
 0x362   : > { %7308 = vmatmul.mubr.msk.bf16.vlgmr.msra.gmra.mxu0 %vm679_vm2, %v9258_v31 }
 0x363   : > { %7311 = vmatprep.mubr.msk.bf16.mxu0 %vm679_vm2, %v9283_v9 }
 0x36a   : > { %7312 = vmatmul.mubr.msk.bf16.gmra.mxu0 %vm679_vm2, %v5747_v14 }
 0x3d1   : > { %v7181_v19 = vpop.f32.mrf.mxu0 }
 0x3d2   : > { %v7197_v12 = vpop.f32.mrf.mxu1 }
 0x3d3   : > { %v4823_v6 = vpop.f32.mrf.mxu0  ;;  %v4933_v51 = vadd.f32 %v7197_v12, %v7181_v19 }
 0x3d4   : > { %v4924_v23 = vpop.f32.mrf.mxu1 }
 0x3d5   : > { %v7182_v56 = vpop.f32.mrf.mxu0  ;;  %v4925_v49 = vadd.f32 %v4924_v23, %v4823_v6 }
 0x3d6   : > { %v7198_v61 = vpop.f32.mrf.mxu1 }
 0x3d7   : > { %v4826_v57 = vpop.f32.mrf.mxu0  ;;  %v4936_v29 = vadd.f32 %v7198_v61, %v7182_v56 }
 0x3d8   : > { %v4927_v63 = vpop.f32.mrf.mxu1 }
 0x3d9   : > { %v4928_v37 = vadd.f32 %v4927_v63, %v4826_v57 }
 0x3ea   : > { %v7185_v26 = vpop.f32.mrf.mxu0 }
 0x3eb   : > { %v7201_v46 = vpop.f32.mrf.mxu1 }
 0x3ec   : > { %v4839_v38 = vpop.f32.mrf.mxu0  ;;  %v4949_v0 = vadd.f32 %v7201_v46, %v7185_v26 }
 0x3ed   : > { %v4940_v59 = vpop.f32.mrf.mxu1 }
 0x3ee   : > { %v7186_v16 = vpop.f32.mrf.mxu0  ;;  %v4941_v12 = vadd.f32 %v4940_v59, %v4839_v38 }
 0x3ef   : > { %v7202_v39 = vpop.f32.mrf.mxu1 }
 0x3f0   : > { %v9368_v33 = vpop.f32.mrf.mxu0 }
 0x3f1   : > { %v4943_v62 = vpop.f32.mrf.mxu1 }
 0x3f2   : > { %v7213_v18 = vpop.f32.mrf.mxu0  ;;  %v4944_v63 = vadd.f32 %v4943_v62, %v9368_v33 }
 0x3f3   : > { %v7229_v2 = vpop.f32.mrf.mxu1  ;;  %v5079_v45 = vadd.f32 %v7213_v18, %v4933_v51  ;;  %v4952_v51 = vadd.f32 %v7202_v39, %v7186_v16 }
 0x3f4   : > { %v5046_v17 = vpop.f32.mrf.mxu0 }
 0x3f5   : > { %v5176_v25 = vpop.f32.mrf.mxu1  ;;  %v5077_v4 = vadd.f32 %v5046_v17, %v4925_v49  ;;  %v5209_v28 = vadd.f32 %v7229_v2, %v5079_v45 }
 0x3f6   : > { %v7214_v32 = vpop.f32.mrf.mxu0 }
 0x3f7   : > { %v7230_v60 = vpop.f32.mrf.mxu1  ;;  %v5080_v34 = vadd.f32 %v7214_v32, %v4936_v29  ;;  %v5207_v48 = vadd.f32 %v5176_v25, %v5077_v4 }
 0x3f8   : > { %v5049_v55 = vpop.f32.mrf.mxu0 }
 0x3f9   : > { %v5179_v31 = vpop.f32.mrf.mxu1  ;;  %v5078_v14 = vadd.f32 %v5049_v55, %v4928_v37  ;;  %v5210_v23 = vadd.f32 %v7230_v60, %v5080_v34 }
 0x3fa   : > { %v7217_v40 = vpop.f32.mrf.mxu0 }
 0x3fb   : > { %v7233_v50 = vpop.f32.mrf.mxu1  ;;  %v5208_v17 = vadd.f32 %v5179_v31, %v5078_v14 }
 0x3fc   : > { %v5062_v10 = vpop.f32.mrf.mxu0 }
 0x3fd   : > { %v5192_v20 = vpop.f32.mrf.mxu1 }
 0x3fe   : > { %v7218_v15 = vpop.f32.mrf.mxu0 }
 0x3ff   : > { %v7234_v30 = vpop.f32.mrf.mxu1  ;;  %v5084_v46 = vadd.f32 %v7218_v15, %v4952_v51 }
 0x400   : > { %v5065_v7 = vpop.f32.mrf.mxu0 }
 0x401   : > { %v9370_v41 = vpop.f32.mrf.mxu1  ;;  %v5082_v55 = vadd.f32 %v5065_v7, %v4944_v63  ;;  %v5214_v31 = vadd.f32 %v7234_v30, %v5084_v46  ;;  %v6459_v7 = vld [vmem:[%s9456_s6] ss:$0 sm:$0xff] }
 0x402   : > { %v7245_v9 = vpop.f32.mrf.mxu0 }
 0x403   : > { %v5339_v19 = vadd.f32 %v7245_v9, %v5209_v28  ;;  %v5212_v15 = vadd.f32 %v9370_v41, %v5082_v55 }
 0x404   : > { %v7261_v42 = vpop.f32.mrf.mxu1  ;;  %v5306_v24 = vpop.f32.mrf.mxu0 }
 0x405   : > { %v5337_v18 = vadd.f32 %v5306_v24, %v5207_v48  ;;  %v5469_v49 = vadd.f32 %v7261_v42, %v5339_v19 }
 0x406   : > { %v5436_v35 = vpop.f32.mrf.mxu1  ;;  %v7246_v21 = vpop.f32.mrf.mxu0 }
 0x407   : > { %v5340_v57 = vadd.f32 %v7246_v21, %v5210_v23  ;;  %v5467_v25 = vadd.f32 %v5436_v35, %v5337_v18 }
 0x408   : > { %v7262_v22 = vpop.f32.mrf.mxu1  ;;  %v5309_v11 = vpop.f32.mrf.mxu0 }
 0x409   : > { %v5338_v32 = vadd.f32 %v5309_v11, %v5208_v17  ;;  %v5470_v39 = vadd.f32 %v7262_v22, %v5340_v57 }
 0x40a   : > { %v5439_v54 = vpop.f32.mrf.mxu1  ;;  %v7249_v3 = vpop.f32.mrf.mxu0 }
 0x40b   : > { %v5468_v33 = vadd.f32 %v5439_v54, %v5338_v32 }
 0x40c   : > { %v7265_v44 = vpop.f32.mrf.mxu1  ;;  %v5322_v43 = vpop.f32.mrf.mxu0 }
 0x40e   : > { %v9372_v58 = vpop.f32.mrf.mxu1  ;;  %v7250_v47 = vpop.f32.mrf.mxu0 }
 0x40f   : > { %v5344_v35 = vadd.f32 %v7250_v47, %v5214_v31 }
 0x410   : > { %v9374_v36 = vpop.f32.mrf.mxu1  ;;  %v5325_v52 = vpop.f32.mrf.mxu0 }
 0x411   : > { %9490 = vst [vmem:[#allocation7_spill] sm:$0xff] %v9374_v36  ;;  %v5083_v36 = vadd.f32 %v7217_v40, %v4949_v0  ;;  %v5342_v54 = vadd.f32 %v5325_v52, %v5212_v15 }
 0x412   : > { %v9376_v1 = vpop.f32.mrf.mxu1  ;;  %v7277_v8 = vpop.f32.mrf.mxu0 }
 0x413   : > { %9491 = vst [vmem:[#allocation8_spill] sm:$0xff] %v9376_v1  ;;  %v5081_v1 = vadd.f32 %v5062_v10, %v4941_v12  ;;  %v5213_v26 = vadd.f32 %v7233_v50, %v5083_v36  ;;  %v5600_v38 = vadd.f32 %v7277_v8, %v5469_v49 }
 0x414   : > { %v7293_v5 = vpop.f32.mrf.mxu1  ;;  %v5567_v53 = vpop.f32.mrf.mxu0 }
 0x415   : > { %v5211_v59 = vadd.f32 %v5192_v20, %v5081_v1  ;;  %v5343_v60 = vadd.f32 %v7249_v3, %v5213_v26  ;;  %v5598_v10 = vadd.f32 %v5567_v53, %v5467_v25  ;;  %v5730_v62 = vadd.f32 %v7293_v5, %v5600_v38 }
 0x416   : > { %v5697_v27 = vpop.f32.mrf.mxu1  ;;  %v7278_v13 = vpop.f32.mrf.mxu0 }
 0x417   : > { %v5341_v9 = vadd.f32 %v5322_v43, %v5211_v59  ;;  %v5601_v50 = vadd.f32 %v7278_v13, %v5470_v39  ;;  %v5473_v24 = vadd.f32 %v7265_v44, %v5343_v60  ;;  %v5728_v22 = vadd.f32 %v5697_v27, %v5598_v10 }
 0x418   : > { %v5570_v6 = vpop.f32.mrf.mxu0  ;;  %v7294_v56 = vpop.f32.mrf.mxu1  ;;  %v9492_v47 = vld [vmem:[#allocation7_spill] sm:$0xff] }
 0x419   : > { %v5599_v11 = vadd.f32 %v5570_v6, %v5468_v33  ;;  %v5471_v3 = vadd.f32 %v9372_v58, %v5341_v9  ;;  %v5731_v45 = vadd.f32 %v7294_v56, %v5601_v50  ;;  %v5474_v1 = vadd.f32 %v9492_v47, %v5344_v35 }
 0x41a   : > { %v7281_v61 = vpop.f32.mrf.mxu0  ;;  %v5700_v40 = vpop.f32.mrf.mxu1  ;;  %v9493_v34 = vld [vmem:[#allocation8_spill] sm:$0xff] }
 0x41b   : > { %v5604_v43 = vadd.f32 %v7281_v61, %v5473_v24  ;;  %v5729_v5 = vadd.f32 %v5700_v40, %v5599_v11  ;;  %v5472_v0 = vadd.f32 %v9493_v34, %v5342_v54 }
 0x41c   : > { %v5583_v2 = vpop.f32.mrf.mxu0  ;;  %v7297_v21 = vpop.f32.mrf.mxu1 }
 0x41d   : > { %v5602_v8 = vadd.f32 %v5583_v2, %v5471_v3  ;;  %v5734_v27 = vadd.f32 %v7297_v21, %v5604_v43 }
 0x41e   : > { %v7282_v16 = vpop.f32.mrf.mxu0  ;;  %v5713_v29 = vpop.f32.mrf.mxu1 }
 0x41f   : > { %v5605_v58 = vadd.f32 %v7282_v16, %v5474_v1  ;;  %v5732_v19 = vadd.f32 %v5713_v29, %v5602_v8 }
 0x420   : > { %v5586_v42 = vpop.f32.mrf.mxu0  ;;  %v7298_v12 = vpop.f32.mrf.mxu1 }
 0x421   : > { %v5603_v23 = vadd.f32 %v5586_v42, %v5472_v0  ;;  %v5735_v17 = vadd.f32 %v7298_v12, %v5605_v58 }
 0x422   : > { %v7309_v20 = vpop.f32.mrf.mxu0  ;;  %v5716_v26 = vpop.f32.mrf.mxu1 }
 0x423   : > { %v5860_v30 = vadd.f32 %v7309_v20, %v5730_v62  ;;  %v5733_v2 = vadd.f32 %v5716_v26, %v5603_v23 }
 0x424   : > { %v5827_v36 = vpop.f32.mrf.mxu0 }
 0x425   : > { %v5875_v41 = vadd.f32 %v6459_v7, %v5860_v30  ;;  %v5858_v44 = vadd.f32 %v5827_v36, %v5728_v22 }
 0x426   : > { %v7310_v4 = vpop.f32.mrf.mxu0 }
 0x427   : > { %v5883_v53 = vmax.f32 %v5875_v41, 0.0  ;;  %v5873_v37 = vadd.f32 %v6459_v7, %v5858_v44  ;;  %v5861_v28 = vadd.f32 %v7310_v4, %v5731_v45 }
 0x428   : > { %v5830_v13 = vpop.f32.mrf.mxu0 }
 0x429   : > { %5891 = vst [vmem:[%s9389_s29 + $0x10] sm:$0xff] %v5883_v53  ;;  %v5881_v52 = vmax.f32 %v5873_v37, 0.0  ;;  %v5876_v48 = vadd.f32 %v6459_v7, %v5861_v28  ;;  %v5859_v14 = vadd.f32 %v5830_v13, %v5729_v5 }
 0x42a   : > { %v7313_v6 = vpop.f32.mrf.mxu0 }
 0x42b   : > { %5889 = vst [vmem:[%s9389_s29] sm:$0xff] %v5881_v52  ;;  %v5884_v18 = vmax.f32 %v5876_v48, 0.0  ;;  %v5874_v51 = vadd.f32 %v6459_v7, %v5859_v14  ;;  %v5864_v56 = vadd.f32 %v7313_v6, %v5734_v27 }
 0x42c   : > { %v5843_v61 = vpop.f32.mrf.mxu0 }
 0x42d   : > { %5892 = vst [vmem:[%s9389_s29 + $0x18] sm:$0xff] %v5884_v18  ;;  %v5882_v49 = vmax.f32 %v5874_v51, 0.0  ;;  %v5879_v57 = vadd.f32 %v6459_v7, %v5864_v56  ;;  %v5862_v63 = vadd.f32 %v5843_v61, %v5732_v19 }
 0x42e   : > { %v7314_v46 = vpop.f32.mrf.mxu0 }
 0x42f   : > { %5890 = vst [vmem:[%s9389_s29 + $0x8] sm:$0xff] %v5882_v49  ;;  %v5887_v25 = vmax.f32 %v5879_v57, 0.0  ;;  %v5877_v32 = vadd.f32 %v6459_v7, %v5862_v63  ;;  %v5865_v38 = vadd.f32 %v7314_v46, %v5735_v17 }
 0x430   : > { %v5846_v59 = vpop.f32.mrf.mxu0 }
 0x431   : > { %5895 = vst [vmem:[%s9389_s29 + $0x30] sm:$0xff] %v5887_v25  ;;  %v5885_v55 = vmax.f32 %v5877_v32, 0.0  ;;  %v5880_v60 = vadd.f32 %v6459_v7, %v5865_v38  ;;  %v5863_v40 = vadd.f32 %v5846_v59, %v5733_v2 }
 0x433   : > { %5893 = vst [vmem:[%s9389_s29 + $0x20] sm:$0xff] %v5885_v55  ;;  %v5888_v16 = vmax.f32 %v5880_v60, 0.0  ;;  %v5878_v39 = vadd.f32 %v6459_v7, %v5863_v40 }
 0x435   : > { %5896 = vst [vmem:[%s9389_s29 + $0x38] sm:$0xff] %v5888_v16  ;;  %v5886_v10 = vmax.f32 %v5878_v39, 0.0 }
 0x437   : > { %5894 = vst [vmem:[%s9389_s29 + $0x28] sm:$0xff] %v5886_v10 }
 0x438   : > { %7443 = shalt.err (!%p7440_p3)
}
 0x439   : > { %s7444_s20 = scalar_lea.hbm %s9402_s15, 1024  ;;  %s7448_s23 = scalar_lea.hbm %s9457_s7, 2048 }
 0x43a   : > { %p7445_p4 = scmp.ne.s32.totalorder %s9402_s15, %s7444_s20  ;;  %p7449_p9 = scmp.lt.s32.totalorder %s9402_s15, %s9457_s7 }
 0x43b   : > { %p7450_p10 = scmp.lt.s32.totalorder %s7448_s23, %s7444_s20 }
 0x43c   : > { %p7446_p7 = pnand %p7445_p4, %p7575_p5 }
 0x43d   : > { %p7451_p11 = por %p7450_p10, %p7449_p9 }
 0x43e   : > { %p7447_p8 = pneg %p7446_p7 }
 0x440   : > { %p7452_p12 = pnand %p7451_p11, %p7447_p8 }
 0x442   : > { %7455 = shalt.err (!%p7452_p12)
}
 0x443   : > { %s7495_s13 = smov 128   ;;  %s7496_s14 = smov 8  }
 0x444   : > { %7315 = dma.vmem_to_hbm [thread:$0]  (%p7575_p5), %s9404_s9, 1024, %s9402_s15, %s9410_s16, %s7495_s13, %s7495_s13, %s7496_s14  }
 0x445 PF: > { %p7321_p13 = scmp.ge.s32.totalorder %s7490_s27, 2  ;;  %s5926_s28 = sand.u32 1, %s7478_s24  }
 0x446   : > { %s5927_s17 = scalar_lea.sflag [#allocation5], %s5926_s28 }
 0x447   : > { %p7318_p0 = pnand %p7321_p13, %p7579_p6 }
 0x449   : > { %p7319_p1 = pneg %p7318_p0 }
 0x44b   : > { %7473 = dma.done.wait (%p7319_p1), %s5927_s17, 1024  }
 0x44c   : > { %7475 = vsyncadd (%p7319_p1), %s5927_s17, 4294966272  ;;  %p17_p2 = scmp.ge.s32.totalorder %s7562_s30, 4   ;;  %s9494_s24 = smov %s7482_s25 }
 0x44d   : > { %s9495_s25 = smov %s7486_s26  ;;  %s9496_s26 = smov %s7573_s10 }
 0x44e   : > { %s9497_s27 = smov %s7562_s30  ;;  %19 = sbr.rel (!%p17_p2) target bundleno = 3 (0x3), region = 105 }
 0x453   :  { %5932 = vsyncpa [#allocation5], 1 }
 0x454   :  { %5934 = vsyncpa [#allocation5 + $0x1], 1 }

</bundles_post_ra>
